<compile_context>
chip_gen: v5e
topology: v5e:2x2
jax: 0.10.0
libtpu: 0.0.40
codegen_flags: <defaults>
</compile_context>

<pallas_src>
import functools

import jax
import jax.numpy as jnp
from jax.experimental import pallas as pl
from jax.experimental.pallas import tpu as pltpu

LRELU_SLOPE = 0.2
CP = 128     # channel padding -> lane-dense activations, weights and stores


# ------------------------------ static geometry ------------------------------

def _build_layer_cfg(t0, channels, kernels, strides):
    """Static per-layer geometry. The projection conv (C_last -> 1, k=3, s=1) is
    appended, mirroring MBD.__init__. Layer 0 (cin==1) is marked as a single
    im2col matmul (k_eff=1, s_eff=1, p_eff=0) built on the host."""
    all_c = list(channels) + [1]
    all_k = list(kernels) + [3]
    all_s = list(strides) + [1]
    cfg, t_in, cin = [], t0, 1
    n = len(all_c)
    for i in range(n):
        k, s, c = all_k[i], all_s[i], all_c[i]
        p = (k - 1) // 2
        t_out = (t_in + 2 * p - k) // s + 1
        assert c <= CP and cin <= CP
        ent = dict(k=k, s=s, p=p, cin=cin, cout=c,
                   t_raw=t_in, t_in=t_in, t_out=t_out, relu=(i < n - 1))
        if i == 0:
            assert k <= CP      # im2col taps must fit in the 128 contraction lanes
            ent.update(k_eff=1, s_eff=1, p_eff=0, t_in=t_out)
        else:
            ent.update(k_eff=k, s_eff=s, p_eff=p)
        cfg.append(ent)
        t_in, cin = t_out, c
    return cfg


# ------------------------------ fused Pallas kernel ---------------------------

def _mbd_fused_kernel(*refs, cfg, halo):
    """refs = (x_col, w0, b0, ..., wL-1, bL-1, fmap0..fmapL-1, act0, act1).

    One grid step = one batch element; all intermediate activations stay in the
    two VMEM scratch slabs (stored at sublane-aligned offset `halo` with the
    exact halo rows the next layer reads zeroed, so every conv tap is a plain
    static (possibly strided) slice)."""
    L = len(cfg)
    H = halo
    x_ref = refs[0]
    w_refs = [refs[1 + 2 * i] for i in range(L)]
    b_refs = [refs[2 + 2 * i] for i in range(L)]
    fmap_refs = list(refs[1 + 2 * L:1 + 3 * L])
    act = [refs[1 + 3 * L], refs[2 + 3 * L]]

    for l, c in enumerate(cfg):
        k, s, p = c["k_eff"], c["s_eff"], c["p_eff"]
        t_out = c["t_out"]
        in_buf = act[l % 2]
        out_buf = act[(l + 1) % 2]

        # Per-tap MXU accumulation: bf16 operands (native MXU dtype), f32
        # accumulate.  Stride is folded into the tap slices, so each tap is a
        # [t_out, 128] @ [128, 128] matmul with no stride-selection matmul.
        acc = None
        for tap in range(k):
            if l == 0:
                lhs = x_ref[...]                       # im2col slab, k_eff == 1
            else:
                start = H - p + tap                    # static offset
                if s == 1:
                    lhs = in_buf[start:start + t_out, :]
                else:
                    lhs = in_buf[pl.ds(start, t_out, stride=s), :]
            contrib = jnp.dot(lhs.astype(jnp.bfloat16), w_refs[l][tap],
                              preferred_element_type=jnp.float32)
            acc = contrib if acc is None else acc + contrib

        acc = acc + b_refs[l][...]                     # fused bias
        if c["relu"]:                                  # fused leaky_relu
            acc = jnp.where(acc >= 0.0, acc, acc * LRELU_SLOPE)

        fmap_refs[l][...] = acc                        # lane-dense 128-wide store

        if l + 1 < L:
            # Stage the activation for the next layer, zeroing only the halo
            # rows that layer actually reads.
            # TODO(synk): halo-extended fmap outputs would remove this duplicate
            # store (v5e vst-slot concern once MXU work is this small).
            p_next = cfg[l + 1]["p_eff"]
            if p_next > 0:
                zh = jnp.zeros((p_next, CP), jnp.float32)
                out_buf[H - p_next:H, :] = zh
                out_buf[H + t_out:H + t_out + p_next, :] = zh
            out_buf[H:H + t_out, :] = acc


# ------------------------------ host wrapper ----------------------------------

def _layer0_im2col(xs, cfg0):
    """[B, 1, T] -> [B, t_out0, CP]; column j holds x[o*s - p + j] (zero padded).
    Folds the cin==1 first conv into a single lane-dense matmul in the kernel."""
    B = xs.shape[0]
    k, s, p, t_out = cfg0["k"], cfg0["s"], cfg0["p"], cfg0["t_out"]
    xpad = jnp.pad(xs[:, 0, :], ((0, 0), (p, p)))
    cols = [xpad[:, j:j + (t_out - 1) * s + 1:s] for j in range(k)]
    xcol = jnp.stack(cols, axis=-1)                    # [B, t_out, k]
    return jnp.zeros((B, t_out, CP), jnp.float32).at[:, :, :k].set(xcol)


def mbd_forward(params, xs):
    """xs: [B, 1, T] raw audio. Returns (flat [B, T_proj], fmap list in NCL layout),
    matching the PyTorch MBD.forward semantics."""
    cfg = params["cfg"]
    L = len(cfg)
    B = xs.shape[0]
    assert xs.shape == (B, 1, cfg[0]["t_raw"]), xs.shape

    x_col = _layer0_im2col(xs.astype(jnp.float32), cfg[0])

    # Halo rounded up to 8 so the main activation store stays sublane-aligned.
    p_need = max([c["p_eff"] for c in cfg[1:]], default=0)
    halo = max(8, ((p_need + 7) // 8) * 8)
    t_in_max = max([c["t_in"] for c in cfg[1:]], default=8)
    t_buf = ((2 * halo + t_in_max + 7) // 8) * 8

    # Static guarantee (correctness-review): every row a layer reads lies inside
    # the rows its producer wrote or zeroed, and inside the scratch slab.
    for c in cfg[1:]:
        lo = halo - c["p_eff"]
        hi = halo - c["p_eff"] + (c["k_eff"] - 1) + (c["t_out"] - 1) * c["s_eff"]
        assert lo >= 0 and hi <= halo + c["t_in"] + c["p_eff"] - 1 and hi < t_buf, \
            (c, halo, t_buf)

    t0c = cfg[0]["t_in"]
    in_specs = [pl.BlockSpec((None, t0c, CP), lambda b: (b, 0, 0))]
    inputs = [x_col]
    for l in range(L):
        w = params["w"][l]      # [K_eff, CP, CP] bf16 (block-diagonal for groups)
        bia = params["b"][l]    # [1, CP] f32
        in_specs.append(pl.BlockSpec(w.shape, lambda b: (0, 0, 0)))
        in_specs.append(pl.BlockSpec(bia.shape, lambda b: (0, 0)))
        inputs += [w, bia]

    out_shape = tuple(jax.ShapeDtypeStruct((B, c["t_out"], CP), jnp.float32)
                      for c in cfg)
    out_specs = tuple(pl.BlockSpec((None, c["t_out"], CP), lambda b: (b, 0, 0))
                      for c in cfg)

    fmaps_padded = pl.pallas_call(
        functools.partial(_mbd_fused_kernel, cfg=cfg, halo=halo),
        grid=(B,),
        in_specs=in_specs,
        out_specs=out_specs,
        out_shape=out_shape,
        scratch_shapes=[pltpu.VMEM((t_buf, CP), jnp.float32),
                        pltpu.VMEM((t_buf, CP), jnp.float32)],
        compiler_params=pltpu.CompilerParams(
            dimension_semantics=("parallel",)),   # batch axis -> both v7x TCs
    )(*inputs)

    # fmap in torch NCL layout; flattened output (proj has cout == 1).
    fmap = [jnp.transpose(fp[:, :, :c["cout"]], (0, 2, 1))
            for fp, c in zip(fmaps_padded, cfg)]
    flat = fmaps_padded[-1][:, :, 0]
    return flat, fmap


# ------------------------------ parameters ------------------------------------

def _dense_taps(w, cin, cout, groups):
    """Grouped Conv1d weight [cout, cin//groups, K] -> dense block-diagonal per-tap
    matrices [K, CP, CP] (zero-padded to 128 in/out channels), stored bf16."""
    K = w.shape[-1]
    cing = cin // groups
    coutg = cout // groups
    dense = jnp.zeros((K, CP, CP), jnp.float32)
    for g in range(groups):
        blk = jnp.transpose(w[g * coutg:(g + 1) * coutg], (2, 1, 0))  # [K,cing,coutg]
        dense = dense.at[:, g * cing:(g + 1) * cing,
                         g * coutg:(g + 1) * coutg].set(blk)
    return dense.astype(jnp.bfloat16)


def _dense_im2col_w(w, k, cout):
    """Layer-0 weight [cout, 1, k] -> [1, CP, CP] bf16 with rows = taps."""
    dense = jnp.zeros((1, CP, CP), jnp.float32)
    dense = dense.at[0, :k, :cout].set(jnp.transpose(w[:, 0, :], (1, 0)))
    return dense.astype(jnp.bfloat16)


def init_mbd_params(key, t0, channels, kernels, strides, groups):
    """Deterministic init. weight_norm at init is the identity on the effective
    weight, so effective conv weights are used directly.
    NOTE: loading a trained PyTorch checkpoint would require folding g/||v||
    into the packed dense taps before the bf16 cast."""
    cfg = _build_layer_cfg(t0, channels, kernels, strides)
    all_g = list(groups) + [1]
    assert all_g[0] == 1                      # cin == 1 => groups must be 1
    ws, bs, raw = [], [], []
    for i, (c, g) in enumerate(zip(cfg, all_g)):
        key, kw, kb = jax.random.split(key, 3)
        w = jax.random.normal(kw, (c["cout"], c["cin"] // g, c["k"]), jnp.float32) * 0.05
        b = jax.random.normal(kb, (c["cout"],), jnp.float32) * 0.01
        if i == 0:
            ws.append(_dense_im2col_w(w, c["k"], c["cout"]))
        else:
            ws.append(_dense_taps(w, c["cin"], c["cout"], g))
        bs.append(jnp.zeros((1, CP), jnp.float32).at[0, :c["cout"]].set(b))
        raw.append((w, b, g))
    return dict(cfg=cfg, w=ws, b=bs, raw=raw), key


# ------------------------------ plain-JAX reference ----------------------------

def mbd_reference(params, xs):
    cfg = params["cfg"]
    x = xs
    fmap = []
    for c, (w, b, g) in zip(cfg, params["raw"]):
        y = jax.lax.conv_general_dilated(
            x, w, window_strides=(c["s"],), padding=[(c["p"], c["p"])],
            dimension_numbers=("NCH", "OIH", "NCH"), feature_group_count=g)
        y = y + b[None, :, None]
        if c["relu"]:
            y = jnp.where(y >= 0.0, y, y * LRELU_SLOPE)
        fmap.append(y)
        x = y
    return x.reshape(x.shape[0], -1), fmap


# ---------------------------------- main ---------------------------------------

if __name__ == "__main__":
    # Small MBD config (channels / kernels / strides / groups as in the ctor).
    channels = [32, 64, 64, 32]
    kernels = [15, 7, 7, 5]
    strides = [1, 2, 2, 1]
    groups = [1, 4, 16, 4]
    B, T = 2, 256

    key = jax.random.PRNGKey(0)
    params, key = init_mbd_params(key, T, channels, kernels, strides, groups)

    key, xkey = jax.random.split(key)
    xs = jax.random.normal(xkey, (B, 1, T), jnp.float32)   # [B, 1, T] like PyTorch

    flat, fmap = mbd_forward(params, xs)
    jax.block_until_ready(flat)
    for f in fmap:
        jax.block_until_ready(f)

    # Shapes implied by the PyTorch module.
    assert flat.shape == (B, 64), flat.shape
    assert [f.shape for f in fmap] == [
        (B, 32, 256), (B, 64, 128), (B, 64, 64), (B, 32, 64), (B, 1, 64)], \
        [f.shape for f in fmap]

    # Numerical check against the plain-JAX (XLA conv, f32) reference.
    # bf16 MXU operands => use a relative tolerance instead of the old hard 2e-3.
    flat_ref, fmap_ref = mbd_reference(params, xs)

    def _close(a, r):
        tol = 5e-2 * float(jnp.max(jnp.abs(r))) + 5e-4
        return float(jnp.max(jnp.abs(a - r))) < tol

    assert _close(flat, flat_ref)
    for a, r in zip(fmap, fmap_ref):
        assert _close(a, r)

    print("KERNEL_OK")
</pallas_src>

<mosaic_0001>
module attributes {stable_mosaic.version = 11 : i64} {
  func.func @_mbd_fused_kernel(%arg0: i32, %arg1: memref<1x256x128xf32, #tpu.memory_space<vmem>>, %arg2: memref<1x128x128xbf16, #tpu.memory_space<vmem>>, %arg3: memref<1x128xf32, #tpu.memory_space<vmem>>, %arg4: memref<7x128x128xbf16, #tpu.memory_space<vmem>>, %arg5: memref<1x128xf32, #tpu.memory_space<vmem>>, %arg6: memref<7x128x128xbf16, #tpu.memory_space<vmem>>, %arg7: memref<1x128xf32, #tpu.memory_space<vmem>>, %arg8: memref<5x128x128xbf16, #tpu.memory_space<vmem>>, %arg9: memref<1x128xf32, #tpu.memory_space<vmem>>, %arg10: memref<3x128x128xbf16, #tpu.memory_space<vmem>>, %arg11: memref<1x128xf32, #tpu.memory_space<vmem>>, %arg12: memref<1x256x128xf32, #tpu.memory_space<vmem>>, %arg13: memref<1x128x128xf32, #tpu.memory_space<vmem>>, %arg14: memref<1x64x128xf32, #tpu.memory_space<vmem>>, %arg15: memref<1x64x128xf32, #tpu.memory_space<vmem>>, %arg16: memref<1x64x128xf32, #tpu.memory_space<vmem>>, %arg17: memref<272x128xf32, #tpu.memory_space<vmem>>, %arg18: memref<272x128xf32, #tpu.memory_space<vmem>>) attributes {dimension_semantics = [#tpu.dimension_semantics<parallel>], iteration_bounds = array<i64: 2>, scalar_prefetch = 0 : i64, scratch_operands = 2 : i64, tpu.core_type = #tpu.core_type<tc>, window_params = [{transform_indices = @transform_0, window_bounds = array<i64: 1, 256, 128>}, {pipeline_mode = #tpu.pipeline_mode<synchronous>, transform_indices = @transform_1, window_bounds = array<i64: 1, 128, 128>}, {pipeline_mode = #tpu.pipeline_mode<synchronous>, transform_indices = @transform_2, window_bounds = array<i64: 1, 128>}, {pipeline_mode = #tpu.pipeline_mode<synchronous>, transform_indices = @transform_3, window_bounds = array<i64: 7, 128, 128>}, {pipeline_mode = #tpu.pipeline_mode<synchronous>, transform_indices = @transform_4, window_bounds = array<i64: 1, 128>}, {pipeline_mode = #tpu.pipeline_mode<synchronous>, transform_indices = @transform_5, window_bounds = array<i64: 7, 128, 128>}, {pipeline_mode = #tpu.pipeline_mode<synchronous>, transform_indices = @transform_6, window_bounds = array<i64: 1, 128>}, {pipeline_mode = #tpu.pipeline_mode<synchronous>, transform_indices = @transform_7, window_bounds = array<i64: 5, 128, 128>}, {pipeline_mode = #tpu.pipeline_mode<synchronous>, transform_indices = @transform_8, window_bounds = array<i64: 1, 128>}, {pipeline_mode = #tpu.pipeline_mode<synchronous>, transform_indices = @transform_9, window_bounds = array<i64: 3, 128, 128>}, {pipeline_mode = #tpu.pipeline_mode<synchronous>, transform_indices = @transform_10, window_bounds = array<i64: 1, 128>}, {transform_indices = @transform_11, window_bounds = array<i64: 1, 256, 128>}, {transform_indices = @transform_12, window_bounds = array<i64: 1, 128, 128>}, {transform_indices = @transform_13, window_bounds = array<i64: 1, 64, 128>}, {transform_indices = @transform_14, window_bounds = array<i64: 1, 64, 128>}, {transform_indices = @transform_15, window_bounds = array<i64: 1, 64, 128>}]} {
    %c0 = arith.constant 0 : index
    %c0_0 = arith.constant 0 : index
    %c0_1 = arith.constant 0 : index
    %0 = vector.load %arg1[%c0, %c0_0, %c0_1] : memref<1x256x128xf32, #tpu.memory_space<vmem>>, vector<1x256x128xf32>
    %1 = vector.shape_cast %0 : vector<1x256x128xf32> to vector<256x128xf32>
    %2 = arith.truncf %1 : vector<256x128xf32> to vector<256x128xbf16>
    %c0_2 = arith.constant 0 : index
    %c0_3 = arith.constant 0 : index
    %c0_4 = arith.constant 0 : index
    %3 = vector.load %arg2[%c0_2, %c0_3, %c0_4] : memref<1x128x128xbf16, #tpu.memory_space<vmem>>, vector<1x128x128xbf16>
    %4 = vector.shape_cast %3 : vector<1x128x128xbf16> to vector<128x128xbf16>
    %cst = arith.constant dense<0.000000e+00> : vector<256x128xf32>
    %5 = tpu.matmul %2, %4, %cst {dimension_numbers = #tpu.dot_dimension_numbers<[1], [0], [0], [1], [0, 0, 1, 1], [], []>} : vector<256x128xbf16>, vector<128x128xbf16>, vector<256x128xf32> -> vector<256x128xf32>
    %c0_5 = arith.constant 0 : index
    %c0_6 = arith.constant 0 : index
    %6 = vector.load %arg3[%c0_5, %c0_6] : memref<1x128xf32, #tpu.memory_space<vmem>>, vector<1x128xf32>
    %7 = vector.broadcast %6 : vector<1x128xf32> to vector<256x128xf32>
    %8 = arith.addf %5, %7 : vector<256x128xf32>
    %cst_7 = arith.constant 0.000000e+00 : f32
    %9 = vector.broadcast %cst_7 : f32 to vector<256x128xf32>
    %10 = arith.cmpf oge, %8, %9 : vector<256x128xf32>
    %cst_8 = arith.constant 2.000000e-01 : f32
    %11 = vector.broadcast %cst_8 : f32 to vector<256x128xf32>
    %12 = arith.mulf %8, %11 : vector<256x128xf32>
    %13 = arith.select %10, %8, %12 : vector<256x128xi1>, vector<256x128xf32>
    %c0_9 = arith.constant 0 : index
    %c0_10 = arith.constant 0 : index
    %c0_11 = arith.constant 0 : index
    %14 = vector.load %arg12[%c0_9, %c0_10, %c0_11] : memref<1x256x128xf32, #tpu.memory_space<vmem>>, vector<1x256x128xf32>
    %15 = vector.shape_cast %14 : vector<1x256x128xf32> to vector<256x128xf32>
    %16 = vector.shape_cast %13 : vector<256x128xf32> to vector<1x256x128xf32>
    tpu.vector_store %arg12[%c0_9, %c0_10, %c0_11], %16 {strides = array<i32>} : memref<1x256x128xf32, #tpu.memory_space<vmem>>, vector<1x256x128xf32>,
    %cst_12 = arith.constant 0.000000e+00 : f32
    %17 = vector.broadcast %cst_12 : f32 to vector<3x128xf32>
    %c5 = arith.constant 5 : index
    %c0_13 = arith.constant 0 : index
    %18 = vector.load %arg18[%c5, %c0_13] : memref<272x128xf32, #tpu.memory_space<vmem>>, vector<3x128xf32>
    tpu.vector_store %arg18[%c5, %c0_13], %17 {strides = array<i32>} : memref<272x128xf32, #tpu.memory_space<vmem>>, vector<3x128xf32>,
    %c264 = arith.constant 264 : index
    %c0_14 = arith.constant 0 : index
    %19 = vector.load %arg18[%c264, %c0_14] : memref<272x128xf32, #tpu.memory_space<vmem>>, vector<3x128xf32>
    tpu.vector_store %arg18[%c264, %c0_14], %17 {strides = array<i32>} : memref<272x128xf32, #tpu.memory_space<vmem>>, vector<3x128xf32>,
    %c8 = arith.constant 8 : index
    %c0_15 = arith.constant 0 : index
    %20 = vector.load %arg18[%c8, %c0_15] : memref<272x128xf32, #tpu.memory_space<vmem>>, vector<256x128xf32>
    tpu.vector_store %arg18[%c8, %c0_15], %13 {strides = array<i32>} : memref<272x128xf32, #tpu.memory_space<vmem>>, vector<256x128xf32>,
    %c5_16 = arith.constant 5 : index
    %c0_17 = arith.constant 0 : index
    %21 = tpu.strided_load %arg18[%c5_16, %c0_17] {strides = array<i32: 2, 1>} : memref<272x128xf32, #tpu.memory_space<vmem>>, vector<128x128xf32>
    %22 = arith.truncf %21 : vector<128x128xf32> to vector<128x128xbf16>
    %c0_18 = arith.constant 0 : index
    %c0_19 = arith.constant 0 : index
    %c0_20 = arith.constant 0 : index
    %23 = vector.load %arg4[%c0_18, %c0_19, %c0_20] : memref<7x128x128xbf16, #tpu.memory_space<vmem>>, vector<1x128x128xbf16>
    %24 = vector.shape_cast %23 : vector<1x128x128xbf16> to vector<128x128xbf16>
    %cst_21 = arith.constant dense<0.000000e+00> : vector<128x128xf32>
    %25 = tpu.matmul %22, %24, %cst_21 {dimension_numbers = #tpu.dot_dimension_numbers<[1], [0], [0], [1], [0, 0, 1, 1], [], []>} : vector<128x128xbf16>, vector<128x128xbf16>, vector<128x128xf32> -> vector<128x128xf32>
    %c6 = arith.constant 6 : index
    %c0_22 = arith.constant 0 : index
    %26 = tpu.strided_load %arg18[%c6, %c0_22] {strides = array<i32: 2, 1>} : memref<272x128xf32, #tpu.memory_space<vmem>>, vector<128x128xf32>
    %27 = arith.truncf %26 : vector<128x128xf32> to vector<128x128xbf16>
    %c1 = arith.constant 1 : index
    %c0_23 = arith.constant 0 : index
    %c0_24 = arith.constant 0 : index
    %28 = vector.load %arg4[%c1, %c0_23, %c0_24] : memref<7x128x128xbf16, #tpu.memory_space<vmem>>, vector<1x128x128xbf16>
    %29 = vector.shape_cast %28 : vector<1x128x128xbf16> to vector<128x128xbf16>
    %cst_25 = arith.constant dense<0.000000e+00> : vector<128x128xf32>
    %30 = tpu.matmul %27, %29, %cst_25 {dimension_numbers = #tpu.dot_dimension_numbers<[1], [0], [0], [1], [0, 0, 1, 1], [], []>} : vector<128x128xbf16>, vector<128x128xbf16>, vector<128x128xf32> -> vector<128x128xf32>
    %31 = arith.addf %25, %30 : vector<128x128xf32>
    %c7 = arith.constant 7 : index
    %c0_26 = arith.constant 0 : index
    %32 = tpu.strided_load %arg18[%c7, %c0_26] {strides = array<i32: 2, 1>} : memref<272x128xf32, #tpu.memory_space<vmem>>, vector<128x128xf32>
    %33 = arith.truncf %32 : vector<128x128xf32> to vector<128x128xbf16>
    %c2 = arith.constant 2 : index
    %c0_27 = arith.constant 0 : index
    %c0_28 = arith.constant 0 : index
    %34 = vector.load %arg4[%c2, %c0_27, %c0_28] : memref<7x128x128xbf16, #tpu.memory_space<vmem>>, vector<1x128x128xbf16>
    %35 = vector.shape_cast %34 : vector<1x128x128xbf16> to vector<128x128xbf16>
    %cst_29 = arith.constant dense<0.000000e+00> : vector<128x128xf32>
    %36 = tpu.matmul %33, %35, %cst_29 {dimension_numbers = #tpu.dot_dimension_numbers<[1], [0], [0], [1], [0, 0, 1, 1], [], []>} : vector<128x128xbf16>, vector<128x128xbf16>, vector<128x128xf32> -> vector<128x128xf32>
    %37 = arith.addf %31, %36 : vector<128x128xf32>
    %c8_30 = arith.constant 8 : index
    %c0_31 = arith.constant 0 : index
    %38 = tpu.strided_load %arg18[%c8_30, %c0_31] {strides = array<i32: 2, 1>} : memref<272x128xf32, #tpu.memory_space<vmem>>, vector<128x128xf32>
    %39 = arith.truncf %38 : vector<128x128xf32> to vector<128x128xbf16>
    %c3 = arith.constant 3 : index
    %c0_32 = arith.constant 0 : index
    %c0_33 = arith.constant 0 : index
    %40 = vector.load %arg4[%c3, %c0_32, %c0_33] : memref<7x128x128xbf16, #tpu.memory_space<vmem>>, vector<1x128x128xbf16>
    %41 = vector.shape_cast %40 : vector<1x128x128xbf16> to vector<128x128xbf16>
    %cst_34 = arith.constant dense<0.000000e+00> : vector<128x128xf32>
    %42 = tpu.matmul %39, %41, %cst_34 {dimension_numbers = #tpu.dot_dimension_numbers<[1], [0], [0], [1], [0, 0, 1, 1], [], []>} : vector<128x128xbf16>, vector<128x128xbf16>, vector<128x128xf32> -> vector<128x128xf32>
    %43 = arith.addf %37, %42 : vector<128x128xf32>
    %c9 = arith.constant 9 : index
    %c0_35 = arith.constant 0 : index
    %44 = tpu.strided_load %arg18[%c9, %c0_35] {strides = array<i32: 2, 1>} : memref<272x128xf32, #tpu.memory_space<vmem>>, vector<128x128xf32>
    %45 = arith.truncf %44 : vector<128x128xf32> to vector<128x128xbf16>
    %c4 = arith.constant 4 : index
    %c0_36 = arith.constant 0 : index
    %c0_37 = arith.constant 0 : index
    %46 = vector.load %arg4[%c4, %c0_36, %c0_37] : memref<7x128x128xbf16, #tpu.memory_space<vmem>>, vector<1x128x128xbf16>
    %47 = vector.shape_cast %46 : vector<1x128x128xbf16> to vector<128x128xbf16>
    %cst_38 = arith.constant dense<0.000000e+00> : vector<128x128xf32>
    %48 = tpu.matmul %45, %47, %cst_38 {dimension_numbers = #tpu.dot_dimension_numbers<[1], [0], [0], [1], [0, 0, 1, 1], [], []>} : vector<128x128xbf16>, vector<128x128xbf16>, vector<128x128xf32> -> vector<128x128xf32>
    %49 = arith.addf %43, %48 : vector<128x128xf32>
    %c10 = arith.constant 10 : index
    %c0_39 = arith.constant 0 : index
    %50 = tpu.strided_load %arg18[%c10, %c0_39] {strides = array<i32: 2, 1>} : memref<272x128xf32, #tpu.memory_space<vmem>>, vector<128x128xf32>
    %51 = arith.truncf %50 : vector<128x128xf32> to vector<128x128xbf16>
    %c5_40 = arith.constant 5 : index
    %c0_41 = arith.constant 0 : index
    %c0_42 = arith.constant 0 : index
    %52 = vector.load %arg4[%c5_40, %c0_41, %c0_42] : memref<7x128x128xbf16, #tpu.memory_space<vmem>>, vector<1x128x128xbf16>
    %53 = vector.shape_cast %52 : vector<1x128x128xbf16> to vector<128x128xbf16>
    %cst_43 = arith.constant dense<0.000000e+00> : vector<128x128xf32>
    %54 = tpu.matmul %51, %53, %cst_43 {dimension_numbers = #tpu.dot_dimension_numbers<[1], [0], [0], [1], [0, 0, 1, 1], [], []>} : vector<128x128xbf16>, vector<128x128xbf16>, vector<128x128xf32> -> vector<128x128xf32>
    %55 = arith.addf %49, %54 : vector<128x128xf32>
    %c11 = arith.constant 11 : index
    %c0_44 = arith.constant 0 : index
    %56 = tpu.strided_load %arg18[%c11, %c0_44] {strides = array<i32: 2, 1>} : memref<272x128xf32, #tpu.memory_space<vmem>>, vector<128x128xf32>
    %57 = arith.truncf %56 : vector<128x128xf32> to vector<128x128xbf16>
    %c6_45 = arith.constant 6 : index
    %c0_46 = arith.constant 0 : index
    %c0_47 = arith.constant 0 : index
    %58 = vector.load %arg4[%c6_45, %c0_46, %c0_47] : memref<7x128x128xbf16, #tpu.memory_space<vmem>>, vector<1x128x128xbf16>
    %59 = vector.shape_cast %58 : vector<1x128x128xbf16> to vector<128x128xbf16>
    %cst_48 = arith.constant dense<0.000000e+00> : vector<128x128xf32>
    %60 = tpu.matmul %57, %59, %cst_48 {dimension_numbers = #tpu.dot_dimension_numbers<[1], [0], [0], [1], [0, 0, 1, 1], [], []>} : vector<128x128xbf16>, vector<128x128xbf16>, vector<128x128xf32> -> vector<128x128xf32>
    %61 = arith.addf %55, %60 : vector<128x128xf32>
    %c0_49 = arith.constant 0 : index
    %c0_50 = arith.constant 0 : index
    %62 = vector.load %arg5[%c0_49, %c0_50] : memref<1x128xf32, #tpu.memory_space<vmem>>, vector<1x128xf32>
    %63 = vector.broadcast %62 : vector<1x128xf32> to vector<128x128xf32>
    %64 = arith.addf %61, %63 : vector<128x128xf32>
    %cst_51 = arith.constant 0.000000e+00 : f32
    %65 = vector.broadcast %cst_51 : f32 to vector<128x128xf32>
    %66 = arith.cmpf oge, %64, %65 : vector<128x128xf32>
    %cst_52 = arith.constant 2.000000e-01 : f32
    %67 = vector.broadcast %cst_52 : f32 to vector<128x128xf32>
    %68 = arith.mulf %64, %67 : vector<128x128xf32>
    %69 = arith.select %66, %64, %68 : vector<128x128xi1>, vector<128x128xf32>
    %c0_53 = arith.constant 0 : index
    %c0_54 = arith.constant 0 : index
    %c0_55 = arith.constant 0 : index
    %70 = vector.load %arg13[%c0_53, %c0_54, %c0_55] : memref<1x128x128xf32, #tpu.memory_space<vmem>>, vector<1x128x128xf32>
    %71 = vector.shape_cast %70 : vector<1x128x128xf32> to vector<128x128xf32>
    %72 = vector.shape_cast %69 : vector<128x128xf32> to vector<1x128x128xf32>
    tpu.vector_store %arg13[%c0_53, %c0_54, %c0_55], %72 {strides = array<i32>} : memref<1x128x128xf32, #tpu.memory_space<vmem>>, vector<1x128x128xf32>,
    %cst_56 = arith.constant 0.000000e+00 : f32
    %73 = vector.broadcast %cst_56 : f32 to vector<3x128xf32>
    %c5_57 = arith.constant 5 : index
    %c0_58 = arith.constant 0 : index
    %74 = vector.load %arg17[%c5_57, %c0_58] : memref<272x128xf32, #tpu.memory_space<vmem>>, vector<3x128xf32>
    tpu.vector_store %arg17[%c5_57, %c0_58], %73 {strides = array<i32>} : memref<272x128xf32, #tpu.memory_space<vmem>>, vector<3x128xf32>,
    %c136 = arith.constant 136 : index
    %c0_59 = arith.constant 0 : index
    %75 = vector.load %arg17[%c136, %c0_59] : memref<272x128xf32, #tpu.memory_space<vmem>>, vector<3x128xf32>
    tpu.vector_store %arg17[%c136, %c0_59], %73 {strides = array<i32>} : memref<272x128xf32, #tpu.memory_space<vmem>>, vector<3x128xf32>,
    %c8_60 = arith.constant 8 : index
    %c0_61 = arith.constant 0 : index
    %76 = vector.load %arg17[%c8_60, %c0_61] : memref<272x128xf32, #tpu.memory_space<vmem>>, vector<128x128xf32>
    tpu.vector_store %arg17[%c8_60, %c0_61], %69 {strides = array<i32>} : memref<272x128xf32, #tpu.memory_space<vmem>>, vector<128x128xf32>,
    %c5_62 = arith.constant 5 : index
    %c0_63 = arith.constant 0 : index
    %77 = tpu.strided_load %arg17[%c5_62, %c0_63] {strides = array<i32: 2, 1>} : memref<272x128xf32, #tpu.memory_space<vmem>>, vector<64x128xf32>
    %78 = arith.truncf %77 : vector<64x128xf32> to vector<64x128xbf16>
    %c0_64 = arith.constant 0 : index
    %c0_65 = arith.constant 0 : index
    %c0_66 = arith.constant 0 : index
    %79 = vector.load %arg6[%c0_64, %c0_65, %c0_66] : memref<7x128x128xbf16, #tpu.memory_space<vmem>>, vector<1x128x128xbf16>
    %80 = vector.shape_cast %79 : vector<1x128x128xbf16> to vector<128x128xbf16>
    %cst_67 = arith.constant dense<0.000000e+00> : vector<64x128xf32>
    %81 = tpu.matmul %78, %80, %cst_67 {dimension_numbers = #tpu.dot_dimension_numbers<[1], [0], [0], [1], [0, 0, 1, 1], [], []>} : vector<64x128xbf16>, vector<128x128xbf16>, vector<64x128xf32> -> vector<64x128xf32>
    %c6_68 = arith.constant 6 : index
    %c0_69 = arith.constant 0 : index
    %82 = tpu.strided_load %arg17[%c6_68, %c0_69] {strides = array<i32: 2, 1>} : memref<272x128xf32, #tpu.memory_space<vmem>>, vector<64x128xf32>
    %83 = arith.truncf %82 : vector<64x128xf32> to vector<64x128xbf16>
    %c1_70 = arith.constant 1 : index
    %c0_71 = arith.constant 0 : index
    %c0_72 = arith.constant 0 : index
    %84 = vector.load %arg6[%c1_70, %c0_71, %c0_72] : memref<7x128x128xbf16, #tpu.memory_space<vmem>>, vector<1x128x128xbf16>
    %85 = vector.shape_cast %84 : vector<1x128x128xbf16> to vector<128x128xbf16>
    %cst_73 = arith.constant dense<0.000000e+00> : vector<64x128xf32>
    %86 = tpu.matmul %83, %85, %cst_73 {dimension_numbers = #tpu.dot_dimension_numbers<[1], [0], [0], [1], [0, 0, 1, 1], [], []>} : vector<64x128xbf16>, vector<128x128xbf16>, vector<64x128xf32> -> vector<64x128xf32>
    %87 = arith.addf %81, %86 : vector<64x128xf32>
    %c7_74 = arith.constant 7 : index
    %c0_75 = arith.constant 0 : index
    %88 = tpu.strided_load %arg17[%c7_74, %c0_75] {strides = array<i32: 2, 1>} : memref<272x128xf32, #tpu.memory_space<vmem>>, vector<64x128xf32>
    %89 = arith.truncf %88 : vector<64x128xf32> to vector<64x128xbf16>
    %c2_76 = arith.constant 2 : index
    %c0_77 = arith.constant 0 : index
    %c0_78 = arith.constant 0 : index
    %90 = vector.load %arg6[%c2_76, %c0_77, %c0_78] : memref<7x128x128xbf16, #tpu.memory_space<vmem>>, vector<1x128x128xbf16>
    %91 = vector.shape_cast %90 : vector<1x128x128xbf16> to vector<128x128xbf16>
    %cst_79 = arith.constant dense<0.000000e+00> : vector<64x128xf32>
    %92 = tpu.matmul %89, %91, %cst_79 {dimension_numbers = #tpu.dot_dimension_numbers<[1], [0], [0], [1], [0, 0, 1, 1], [], []>} : vector<64x128xbf16>, vector<128x128xbf16>, vector<64x128xf32> -> vector<64x128xf32>
    %93 = arith.addf %87, %92 : vector<64x128xf32>
    %c8_80 = arith.constant 8 : index
    %c0_81 = arith.constant 0 : index
    %94 = tpu.strided_load %arg17[%c8_80, %c0_81] {strides = array<i32: 2, 1>} : memref<272x128xf32, #tpu.memory_space<vmem>>, vector<64x128xf32>
    %95 = arith.truncf %94 : vector<64x128xf32> to vector<64x128xbf16>
    %c3_82 = arith.constant 3 : index
    %c0_83 = arith.constant 0 : index
    %c0_84 = arith.constant 0 : index
    %96 = vector.load %arg6[%c3_82, %c0_83, %c0_84] : memref<7x128x128xbf16, #tpu.memory_space<vmem>>, vector<1x128x128xbf16>
    %97 = vector.shape_cast %96 : vector<1x128x128xbf16> to vector<128x128xbf16>
    %cst_85 = arith.constant dense<0.000000e+00> : vector<64x128xf32>
    %98 = tpu.matmul %95, %97, %cst_85 {dimension_numbers = #tpu.dot_dimension_numbers<[1], [0], [0], [1], [0, 0, 1, 1], [], []>} : vector<64x128xbf16>, vector<128x128xbf16>, vector<64x128xf32> -> vector<64x128xf32>
    %99 = arith.addf %93, %98 : vector<64x128xf32>
    %c9_86 = arith.constant 9 : index
    %c0_87 = arith.constant 0 : index
    %100 = tpu.strided_load %arg17[%c9_86, %c0_87] {strides = array<i32: 2, 1>} : memref<272x128xf32, #tpu.memory_space<vmem>>, vector<64x128xf32>
    %101 = arith.truncf %100 : vector<64x128xf32> to vector<64x128xbf16>
    %c4_88 = arith.constant 4 : index
    %c0_89 = arith.constant 0 : index
    %c0_90 = arith.constant 0 : index
    %102 = vector.load %arg6[%c4_88, %c0_89, %c0_90] : memref<7x128x128xbf16, #tpu.memory_space<vmem>>, vector<1x128x128xbf16>
    %103 = vector.shape_cast %102 : vector<1x128x128xbf16> to vector<128x128xbf16>
    %cst_91 = arith.constant dense<0.000000e+00> : vector<64x128xf32>
    %104 = tpu.matmul %101, %103, %cst_91 {dimension_numbers = #tpu.dot_dimension_numbers<[1], [0], [0], [1], [0, 0, 1, 1], [], []>} : vector<64x128xbf16>, vector<128x128xbf16>, vector<64x128xf32> -> vector<64x128xf32>
    %105 = arith.addf %99, %104 : vector<64x128xf32>
    %c10_92 = arith.constant 10 : index
    %c0_93 = arith.constant 0 : index
    %106 = tpu.strided_load %arg17[%c10_92, %c0_93] {strides = array<i32: 2, 1>} : memref<272x128xf32, #tpu.memory_space<vmem>>, vector<64x128xf32>
    %107 = arith.truncf %106 : vector<64x128xf32> to vector<64x128xbf16>
    %c5_94 = arith.constant 5 : index
    %c0_95 = arith.constant 0 : index
    %c0_96 = arith.constant 0 : index
    %108 = vector.load %arg6[%c5_94, %c0_95, %c0_96] : memref<7x128x128xbf16, #tpu.memory_space<vmem>>, vector<1x128x128xbf16>
    %109 = vector.shape_cast %108 : vector<1x128x128xbf16> to vector<128x128xbf16>
    %cst_97 = arith.constant dense<0.000000e+00> : vector<64x128xf32>
    %110 = tpu.matmul %107, %109, %cst_97 {dimension_numbers = #tpu.dot_dimension_numbers<[1], [0], [0], [1], [0, 0, 1, 1], [], []>} : vector<64x128xbf16>, vector<128x128xbf16>, vector<64x128xf32> -> vector<64x128xf32>
    %111 = arith.addf %105, %110 : vector<64x128xf32>
    %c11_98 = arith.constant 11 : index
    %c0_99 = arith.constant 0 : index
    %112 = tpu.strided_load %arg17[%c11_98, %c0_99] {strides = array<i32: 2, 1>} : memref<272x128xf32, #tpu.memory_space<vmem>>, vector<64x128xf32>
    %113 = arith.truncf %112 : vector<64x128xf32> to vector<64x128xbf16>
    %c6_100 = arith.constant 6 : index
    %c0_101 = arith.constant 0 : index
    %c0_102 = arith.constant 0 : index
    %114 = vector.load %arg6[%c6_100, %c0_101, %c0_102] : memref<7x128x128xbf16, #tpu.memory_space<vmem>>, vector<1x128x128xbf16>
    %115 = vector.shape_cast %114 : vector<1x128x128xbf16> to vector<128x128xbf16>
    %cst_103 = arith.constant dense<0.000000e+00> : vector<64x128xf32>
    %116 = tpu.matmul %113, %115, %cst_103 {dimension_numbers = #tpu.dot_dimension_numbers<[1], [0], [0], [1], [0, 0, 1, 1], [], []>} : vector<64x128xbf16>, vector<128x128xbf16>, vector<64x128xf32> -> vector<64x128xf32>
    %117 = arith.addf %111, %116 : vector<64x128xf32>
    %c0_104 = arith.constant 0 : index
    %c0_105 = arith.constant 0 : index
    %118 = vector.load %arg7[%c0_104, %c0_105] : memref<1x128xf32, #tpu.memory_space<vmem>>, vector<1x128xf32>
    %119 = vector.broadcast %118 : vector<1x128xf32> to vector<64x128xf32>
    %120 = arith.addf %117, %119 : vector<64x128xf32>
    %cst_106 = arith.constant 0.000000e+00 : f32
    %121 = vector.broadcast %cst_106 : f32 to vector<64x128xf32>
    %122 = arith.cmpf oge, %120, %121 : vector<64x128xf32>
    %cst_107 = arith.constant 2.000000e-01 : f32
    %123 = vector.broadcast %cst_107 : f32 to vector<64x128xf32>
    %124 = arith.mulf %120, %123 : vector<64x128xf32>
    %125 = arith.select %122, %120, %124 : vector<64x128xi1>, vector<64x128xf32>
    %c0_108 = arith.constant 0 : index
    %c0_109 = arith.constant 0 : index
    %c0_110 = arith.constant 0 : index
    %126 = vector.load %arg14[%c0_108, %c0_109, %c0_110] : memref<1x64x128xf32, #tpu.memory_space<vmem>>, vector<1x64x128xf32>
    %127 = vector.shape_cast %126 : vector<1x64x128xf32> to vector<64x128xf32>
    %128 = vector.shape_cast %125 : vector<64x128xf32> to vector<1x64x128xf32>
    tpu.vector_store %arg14[%c0_108, %c0_109, %c0_110], %128 {strides = array<i32>} : memref<1x64x128xf32, #tpu.memory_space<vmem>>, vector<1x64x128xf32>,
    %cst_111 = arith.constant 0.000000e+00 : f32
    %129 = vector.broadcast %cst_111 : f32 to vector<2x128xf32>
    %c6_112 = arith.constant 6 : index
    %c0_113 = arith.constant 0 : index
    %130 = vector.load %arg18[%c6_112, %c0_113] : memref<272x128xf32, #tpu.memory_space<vmem>>, vector<2x128xf32>
    tpu.vector_store %arg18[%c6_112, %c0_113], %129 {strides = array<i32>} : memref<272x128xf32, #tpu.memory_space<vmem>>, vector<2x128xf32>,
    %c72 = arith.constant 72 : index
    %c0_114 = arith.constant 0 : index
    %131 = vector.load %arg18[%c72, %c0_114] : memref<272x128xf32, #tpu.memory_space<vmem>>, vector<2x128xf32>
    tpu.vector_store %arg18[%c72, %c0_114], %129 {strides = array<i32>} : memref<272x128xf32, #tpu.memory_space<vmem>>, vector<2x128xf32>,
    %c8_115 = arith.constant 8 : index
    %c0_116 = arith.constant 0 : index
    %132 = vector.load %arg18[%c8_115, %c0_116] : memref<272x128xf32, #tpu.memory_space<vmem>>, vector<64x128xf32>
    tpu.vector_store %arg18[%c8_115, %c0_116], %125 {strides = array<i32>} : memref<272x128xf32, #tpu.memory_space<vmem>>, vector<64x128xf32>,
    %c6_117 = arith.constant 6 : index
    %c0_118 = arith.constant 0 : index
    %133 = vector.load %arg18[%c6_117, %c0_118] : memref<272x128xf32, #tpu.memory_space<vmem>>, vector<64x128xf32>
    %134 = arith.truncf %133 : vector<64x128xf32> to vector<64x128xbf16>
    %c0_119 = arith.constant 0 : index
    %c0_120 = arith.constant 0 : index
    %c0_121 = arith.constant 0 : index
    %135 = vector.load %arg8[%c0_119, %c0_120, %c0_121] : memref<5x128x128xbf16, #tpu.memory_space<vmem>>, vector<1x128x128xbf16>
    %136 = vector.shape_cast %135 : vector<1x128x128xbf16> to vector<128x128xbf16>
    %cst_122 = arith.constant dense<0.000000e+00> : vector<64x128xf32>
    %137 = tpu.matmul %134, %136, %cst_122 {dimension_numbers = #tpu.dot_dimension_numbers<[1], [0], [0], [1], [0, 0, 1, 1], [], []>} : vector<64x128xbf16>, vector<128x128xbf16>, vector<64x128xf32> -> vector<64x128xf32>
    %c7_123 = arith.constant 7 : index
    %c0_124 = arith.constant 0 : index
    %138 = vector.load %arg18[%c7_123, %c0_124] : memref<272x128xf32, #tpu.memory_space<vmem>>, vector<64x128xf32>
    %139 = arith.truncf %138 : vector<64x128xf32> to vector<64x128xbf16>
    %c1_125 = arith.constant 1 : index
    %c0_126 = arith.constant 0 : index
    %c0_127 = arith.constant 0 : index
    %140 = vector.load %arg8[%c1_125, %c0_126, %c0_127] : memref<5x128x128xbf16, #tpu.memory_space<vmem>>, vector<1x128x128xbf16>
    %141 = vector.shape_cast %140 : vector<1x128x128xbf16> to vector<128x128xbf16>
    %cst_128 = arith.constant dense<0.000000e+00> : vector<64x128xf32>
    %142 = tpu.matmul %139, %141, %cst_128 {dimension_numbers = #tpu.dot_dimension_numbers<[1], [0], [0], [1], [0, 0, 1, 1], [], []>} : vector<64x128xbf16>, vector<128x128xbf16>, vector<64x128xf32> -> vector<64x128xf32>
    %143 = arith.addf %137, %142 : vector<64x128xf32>
    %c8_129 = arith.constant 8 : index
    %c0_130 = arith.constant 0 : index
    %144 = vector.load %arg18[%c8_129, %c0_130] : memref<272x128xf32, #tpu.memory_space<vmem>>, vector<64x128xf32>
    %145 = arith.truncf %144 : vector<64x128xf32> to vector<64x128xbf16>
    %c2_131 = arith.constant 2 : index
    %c0_132 = arith.constant 0 : index
    %c0_133 = arith.constant 0 : index
    %146 = vector.load %arg8[%c2_131, %c0_132, %c0_133] : memref<5x128x128xbf16, #tpu.memory_space<vmem>>, vector<1x128x128xbf16>
    %147 = vector.shape_cast %146 : vector<1x128x128xbf16> to vector<128x128xbf16>
    %cst_134 = arith.constant dense<0.000000e+00> : vector<64x128xf32>
    %148 = tpu.matmul %145, %147, %cst_134 {dimension_numbers = #tpu.dot_dimension_numbers<[1], [0], [0], [1], [0, 0, 1, 1], [], []>} : vector<64x128xbf16>, vector<128x128xbf16>, vector<64x128xf32> -> vector<64x128xf32>
    %149 = arith.addf %143, %148 : vector<64x128xf32>
    %c9_135 = arith.constant 9 : index
    %c0_136 = arith.constant 0 : index
    %150 = vector.load %arg18[%c9_135, %c0_136] : memref<272x128xf32, #tpu.memory_space<vmem>>, vector<64x128xf32>
    %151 = arith.truncf %150 : vector<64x128xf32> to vector<64x128xbf16>
    %c3_137 = arith.constant 3 : index
    %c0_138 = arith.constant 0 : index
    %c0_139 = arith.constant 0 : index
    %152 = vector.load %arg8[%c3_137, %c0_138, %c0_139] : memref<5x128x128xbf16, #tpu.memory_space<vmem>>, vector<1x128x128xbf16>
    %153 = vector.shape_cast %152 : vector<1x128x128xbf16> to vector<128x128xbf16>
    %cst_140 = arith.constant dense<0.000000e+00> : vector<64x128xf32>
    %154 = tpu.matmul %151, %153, %cst_140 {dimension_numbers = #tpu.dot_dimension_numbers<[1], [0], [0], [1], [0, 0, 1, 1], [], []>} : vector<64x128xbf16>, vector<128x128xbf16>, vector<64x128xf32> -> vector<64x128xf32>
    %155 = arith.addf %149, %154 : vector<64x128xf32>
    %c10_141 = arith.constant 10 : index
    %c0_142 = arith.constant 0 : index
    %156 = vector.load %arg18[%c10_141, %c0_142] : memref<272x128xf32, #tpu.memory_space<vmem>>, vector<64x128xf32>
    %157 = arith.truncf %156 : vector<64x128xf32> to vector<64x128xbf16>
    %c4_143 = arith.constant 4 : index
    %c0_144 = arith.constant 0 : index
    %c0_145 = arith.constant 0 : index
    %158 = vector.load %arg8[%c4_143, %c0_144, %c0_145] : memref<5x128x128xbf16, #tpu.memory_space<vmem>>, vector<1x128x128xbf16>
    %159 = vector.shape_cast %158 : vector<1x128x128xbf16> to vector<128x128xbf16>
    %cst_146 = arith.constant dense<0.000000e+00> : vector<64x128xf32>
    %160 = tpu.matmul %157, %159, %cst_146 {dimension_numbers = #tpu.dot_dimension_numbers<[1], [0], [0], [1], [0, 0, 1, 1], [], []>} : vector<64x128xbf16>, vector<128x128xbf16>, vector<64x128xf32> -> vector<64x128xf32>
    %161 = arith.addf %155, %160 : vector<64x128xf32>
    %c0_147 = arith.constant 0 : index
    %c0_148 = arith.constant 0 : index
    %162 = vector.load %arg9[%c0_147, %c0_148] : memref<1x128xf32, #tpu.memory_space<vmem>>, vector<1x128xf32>
    %163 = vector.broadcast %162 : vector<1x128xf32> to vector<64x128xf32>
    %164 = arith.addf %161, %163 : vector<64x128xf32>
    %cst_149 = arith.constant 0.000000e+00 : f32
    %165 = vector.broadcast %cst_149 : f32 to vector<64x128xf32>
    %166 = arith.cmpf oge, %164, %165 : vector<64x128xf32>
    %cst_150 = arith.constant 2.000000e-01 : f32
    %167 = vector.broadcast %cst_150 : f32 to vector<64x128xf32>
    %168 = arith.mulf %164, %167 : vector<64x128xf32>
    %169 = arith.select %166, %164, %168 : vector<64x128xi1>, vector<64x128xf32>
    %c0_151 = arith.constant 0 : index
    %c0_152 = arith.constant 0 : index
    %c0_153 = arith.constant 0 : index
    %170 = vector.load %arg15[%c0_151, %c0_152, %c0_153] : memref<1x64x128xf32, #tpu.memory_space<vmem>>, vector<1x64x128xf32>
    %171 = vector.shape_cast %170 : vector<1x64x128xf32> to vector<64x128xf32>
    %172 = vector.shape_cast %169 : vector<64x128xf32> to vector<1x64x128xf32>
    tpu.vector_store %arg15[%c0_151, %c0_152, %c0_153], %172 {strides = array<i32>} : memref<1x64x128xf32, #tpu.memory_space<vmem>>, vector<1x64x128xf32>,
    %cst_154 = arith.constant 0.000000e+00 : f32
    %173 = vector.broadcast %cst_154 : f32 to vector<1x128xf32>
    %c7_155 = arith.constant 7 : index
    %c0_156 = arith.constant 0 : index
    %174 = vector.load %arg17[%c7_155, %c0_156] : memref<272x128xf32, #tpu.memory_space<vmem>>, vector<1x128xf32>
    tpu.vector_store %arg17[%c7_155, %c0_156], %173 {strides = array<i32>} : memref<272x128xf32, #tpu.memory_space<vmem>>, vector<1x128xf32>,
    %c72_157 = arith.constant 72 : index
    %c0_158 = arith.constant 0 : index
    %175 = vector.load %arg17[%c72_157, %c0_158] : memref<272x128xf32, #tpu.memory_space<vmem>>, vector<1x128xf32>
    tpu.vector_store %arg17[%c72_157, %c0_158], %173 {strides = array<i32>} : memref<272x128xf32, #tpu.memory_space<vmem>>, vector<1x128xf32>,
    %c8_159 = arith.constant 8 : index
    %c0_160 = arith.constant 0 : index
    %176 = vector.load %arg17[%c8_159, %c0_160] : memref<272x128xf32, #tpu.memory_space<vmem>>, vector<64x128xf32>
    tpu.vector_store %arg17[%c8_159, %c0_160], %169 {strides = array<i32>} : memref<272x128xf32, #tpu.memory_space<vmem>>, vector<64x128xf32>,
    %c7_161 = arith.constant 7 : index
    %c0_162 = arith.constant 0 : index
    %177 = vector.load %arg17[%c7_161, %c0_162] : memref<272x128xf32, #tpu.memory_space<vmem>>, vector<64x128xf32>
    %178 = arith.truncf %177 : vector<64x128xf32> to vector<64x128xbf16>
    %c0_163 = arith.constant 0 : index
    %c0_164 = arith.constant 0 : index
    %c0_165 = arith.constant 0 : index
    %179 = vector.load %arg10[%c0_163, %c0_164, %c0_165] : memref<3x128x128xbf16, #tpu.memory_space<vmem>>, vector<1x128x128xbf16>
    %180 = vector.shape_cast %179 : vector<1x128x128xbf16> to vector<128x128xbf16>
    %cst_166 = arith.constant dense<0.000000e+00> : vector<64x128xf32>
    %181 = tpu.matmul %178, %180, %cst_166 {dimension_numbers = #tpu.dot_dimension_numbers<[1], [0], [0], [1], [0, 0, 1, 1], [], []>} : vector<64x128xbf16>, vector<128x128xbf16>, vector<64x128xf32> -> vector<64x128xf32>
    %c8_167 = arith.constant 8 : index
    %c0_168 = arith.constant 0 : index
    %182 = vector.load %arg17[%c8_167, %c0_168] : memref<272x128xf32, #tpu.memory_space<vmem>>, vector<64x128xf32>
    %183 = arith.truncf %182 : vector<64x128xf32> to vector<64x128xbf16>
    %c1_169 = arith.constant 1 : index
    %c0_170 = arith.constant 0 : index
    %c0_171 = arith.constant 0 : index
    %184 = vector.load %arg10[%c1_169, %c0_170, %c0_171] : memref<3x128x128xbf16, #tpu.memory_space<vmem>>, vector<1x128x128xbf16>
    %185 = vector.shape_cast %184 : vector<1x128x128xbf16> to vector<128x128xbf16>
    %cst_172 = arith.constant dense<0.000000e+00> : vector<64x128xf32>
    %186 = tpu.matmul %183, %185, %cst_172 {dimension_numbers = #tpu.dot_dimension_numbers<[1], [0], [0], [1], [0, 0, 1, 1], [], []>} : vector<64x128xbf16>, vector<128x128xbf16>, vector<64x128xf32> -> vector<64x128xf32>
    %187 = arith.addf %181, %186 : vector<64x128xf32>
    %c9_173 = arith.constant 9 : index
    %c0_174 = arith.constant 0 : index
    %188 = vector.load %arg17[%c9_173, %c0_174] : memref<272x128xf32, #tpu.memory_space<vmem>>, vector<64x128xf32>
    %189 = arith.truncf %188 : vector<64x128xf32> to vector<64x128xbf16>
    %c2_175 = arith.constant 2 : index
    %c0_176 = arith.constant 0 : index
    %c0_177 = arith.constant 0 : index
    %190 = vector.load %arg10[%c2_175, %c0_176, %c0_177] : memref<3x128x128xbf16, #tpu.memory_space<vmem>>, vector<1x128x128xbf16>
    %191 = vector.shape_cast %190 : vector<1x128x128xbf16> to vector<128x128xbf16>
    %cst_178 = arith.constant dense<0.000000e+00> : vector<64x128xf32>
    %192 = tpu.matmul %189, %191, %cst_178 {dimension_numbers = #tpu.dot_dimension_numbers<[1], [0], [0], [1], [0, 0, 1, 1], [], []>} : vector<64x128xbf16>, vector<128x128xbf16>, vector<64x128xf32> -> vector<64x128xf32>
    %193 = arith.addf %187, %192 : vector<64x128xf32>
    %c0_179 = arith.constant 0 : index
    %c0_180 = arith.constant 0 : index
    %194 = vector.load %arg11[%c0_179, %c0_180] : memref<1x128xf32, #tpu.memory_space<vmem>>, vector<1x128xf32>
    %195 = vector.broadcast %194 : vector<1x128xf32> to vector<64x128xf32>
    %196 = arith.addf %193, %195 : vector<64x128xf32>
    %c0_181 = arith.constant 0 : index
    %c0_182 = arith.constant 0 : index
    %c0_183 = arith.constant 0 : index
    %197 = vector.load %arg16[%c0_181, %c0_182, %c0_183] : memref<1x64x128xf32, #tpu.memory_space<vmem>>, vector<1x64x128xf32>
    %198 = vector.shape_cast %197 : vector<1x64x128xf32> to vector<64x128xf32>
    %199 = vector.shape_cast %196 : vector<64x128xf32> to vector<1x64x128xf32>
    tpu.vector_store %arg16[%c0_181, %c0_182, %c0_183], %199 {strides = array<i32>} : memref<1x64x128xf32, #tpu.memory_space<vmem>>, vector<1x64x128xf32>,
    return
  }
  func.func @transform_0(%arg0: i32) -> (i32, i32, i32) {
    %c0_i32 = arith.constant 0 : i32
    %c0_i32_0 = arith.constant 0 : i32
    %c0_i32_1 = arith.constant 0 : i32
    return %arg0, %c0_i32, %c0_i32_0 : i32, i32, i32
  }
  func.func @transform_1(%arg0: i32) -> (i32, i32, i32) {
    %c0_i32 = arith.constant 0 : i32
    %c0_i32_0 = arith.constant 0 : i32
    %c0_i32_1 = arith.constant 0 : i32
    %c0_i32_2 = arith.constant 0 : i32
    return %c0_i32, %c0_i32_0, %c0_i32_1 : i32, i32, i32
  }
  func.func @transform_2(%arg0: i32) -> (i32, i32) {
    %c0_i32 = arith.constant 0 : i32
    %c0_i32_0 = arith.constant 0 : i32
    %c0_i32_1 = arith.constant 0 : i32
    return %c0_i32, %c0_i32_0 : i32, i32
  }
  func.func @transform_3(%arg0: i32) -> (i32, i32, i32) {
    %c0_i32 = arith.constant 0 : i32
    %c0_i32_0 = arith.constant 0 : i32
    %c0_i32_1 = arith.constant 0 : i32
    %c0_i32_2 = arith.constant 0 : i32
    return %c0_i32, %c0_i32_0, %c0_i32_1 : i32, i32, i32
  }
  func.func @transform_4(%arg0: i32) -> (i32, i32) {
    %c0_i32 = arith.constant 0 : i32
    %c0_i32_0 = arith.constant 0 : i32
    %c0_i32_1 = arith.constant 0 : i32
    return %c0_i32, %c0_i32_0 : i32, i32
  }
  func.func @transform_5(%arg0: i32) -> (i32, i32, i32) {
    %c0_i32 = arith.constant 0 : i32
    %c0_i32_0 = arith.constant 0 : i32
    %c0_i32_1 = arith.constant 0 : i32
    %c0_i32_2 = arith.constant 0 : i32
    return %c0_i32, %c0_i32_0, %c0_i32_1 : i32, i32, i32
  }
  func.func @transform_6(%arg0: i32) -> (i32, i32) {
    %c0_i32 = arith.constant 0 : i32
    %c0_i32_0 = arith.constant 0 : i32
    %c0_i32_1 = arith.constant 0 : i32
    return %c0_i32, %c0_i32_0 : i32, i32
  }
  func.func @transform_7(%arg0: i32) -> (i32, i32, i32) {
    %c0_i32 = arith.constant 0 : i32
    %c0_i32_0 = arith.constant 0 : i32
    %c0_i32_1 = arith.constant 0 : i32
    %c0_i32_2 = arith.constant 0 : i32
    return %c0_i32, %c0_i32_0, %c0_i32_1 : i32, i32, i32
  }
  func.func @transform_8(%arg0: i32) -> (i32, i32) {
    %c0_i32 = arith.constant 0 : i32
    %c0_i32_0 = arith.constant 0 : i32
    %c0_i32_1 = arith.constant 0 : i32
    return %c0_i32, %c0_i32_0 : i32, i32
  }
  func.func @transform_9(%arg0: i32) -> (i32, i32, i32) {
    %c0_i32 = arith.constant 0 : i32
    %c0_i32_0 = arith.constant 0 : i32
    %c0_i32_1 = arith.constant 0 : i32
    %c0_i32_2 = arith.constant 0 : i32
    return %c0_i32, %c0_i32_0, %c0_i32_1 : i32, i32, i32
  }
  func.func @transform_10(%arg0: i32) -> (i32, i32) {
    %c0_i32 = arith.constant 0 : i32
    %c0_i32_0 = arith.constant 0 : i32
    %c0_i32_1 = arith.constant 0 : i32
    return %c0_i32, %c0_i32_0 : i32, i32
  }
  func.func @transform_11(%arg0: i32) -> (i32, i32, i32) {
    %c0_i32 = arith.constant 0 : i32
    %c0_i32_0 = arith.constant 0 : i32
    %c0_i32_1 = arith.constant 0 : i32
    return %arg0, %c0_i32, %c0_i32_0 : i32, i32, i32
  }
  func.func @transform_12(%arg0: i32) -> (i32, i32, i32) {
    %c0_i32 = arith.constant 0 : i32
    %c0_i32_0 = arith.constant 0 : i32
    %c0_i32_1 = arith.constant 0 : i32
    return %arg0, %c0_i32, %c0_i32_0 : i32, i32, i32
  }
  func.func @transform_13(%arg0: i32) -> (i32, i32, i32) {
    %c0_i32 = arith.constant 0 : i32
    %c0_i32_0 = arith.constant 0 : i32
    %c0_i32_1 = arith.constant 0 : i32
    return %arg0, %c0_i32, %c0_i32_0 : i32, i32, i32
  }
  func.func @transform_14(%arg0: i32) -> (i32, i32, i32) {
    %c0_i32 = arith.constant 0 : i32
    %c0_i32_0 = arith.constant 0 : i32
    %c0_i32_1 = arith.constant 0 : i32
    return %arg0, %c0_i32, %c0_i32_0 : i32, i32, i32
  }
  func.func @transform_15(%arg0: i32) -> (i32, i32, i32) {
    %c0_i32 = arith.constant 0 : i32
    %c0_i32_0 = arith.constant 0 : i32
    %c0_i32_1 = arith.constant 0 : i32
    return %arg0, %c0_i32, %c0_i32_0 : i32, i32, i32
  }
}

</mosaic_0001>

<bundles_post_ra>
// kernel: tpu_custom_call.1
= control target key start
LH: loop header
LB: loop body
LE: loop exit
PB: predicated region body
PF: predicated region fallthrough
CT: control target
= control target key end

     0   :  { %s6772_s0 = inlined_call_operand.hbm [shape: f32[2,256,128], index: 0, kind: input, shape index: {}]   ;;  %s6773_s1 = inlined_call_operand.hbm [shape: bf16[1,128,128], index: 1, kind: input, shape index: {}]   ;;  %s6774_s2 = inlined_call_operand.vmem [shape: f32[1,128], index: 2, kind: input, shape index: {}]   ;;  %s6775_s3 = inlined_call_operand.hbm [shape: bf16[7,128,128], index: 3, kind: input, shape index: {}]   ;;  %s6776_s4 = inlined_call_operand.vmem [shape: f32[1,128], index: 4, kind: input, shape index: {}]   ;;  %s6777_s5 = inlined_call_operand.hbm [shape: bf16[7,128,128], index: 5, kind: input, shape index: {}]   ;;  %s6778_s6 = inlined_call_operand.vmem [shape: f32[1,128], index: 6, kind: input, shape index: {}]   ;;  %s6779_s7 = inlined_call_operand.hbm [shape: bf16[5,128,128], index: 7, kind: input, shape index: {}]   ;;  %s6780_s8 = inlined_call_operand.vmem [shape: f32[1,128], index: 8, kind: input, shape index: {}]   ;;  %s6781_s9 = inlined_call_operand.hbm [shape: bf16[3,128,128], index: 9, kind: input, shape index: {}]   ;;  %s6782_s10 = inlined_call_operand.vmem [shape: f32[1,128], index: 10, kind: input, shape index: {}]   ;;  %s6783_s11 = inlined_call_operand.hbm [shape: f32[2,256,128], index: 11, kind: output, shape index: {0}]   ;;  %s6784_s12 = inlined_call_operand.hbm [shape: f32[2,128,128], index: 12, kind: output, shape index: {1}]   ;;  %s6785_s13 = inlined_call_operand.hbm [shape: f32[2,64,128], index: 13, kind: output, shape index: {2}]   ;;  %s6786_s14 = inlined_call_operand.hbm [shape: f32[2,64,128], index: 14, kind: output, shape index: {3}]   ;;  %s6787_s15 = inlined_call_operand.hbm [shape: f32[2,64,128], index: 15, kind: output, shape index: {4}]  }
   0x1   :  { %6793 = sst [smem:[#allocation31_spill]] %s6772_s0 }
   0x2   :  { %6794 = sst [smem:[#allocation32_spill]] %s6773_s1 }
   0x3   :  { %6795 = sst [smem:[#allocation33_spill]] %s6774_s2 }
   0x4   :  { %6796 = sst [smem:[#allocation34_spill]] %s6775_s3 }
   0x5   :  { %6797 = sst [smem:[#allocation35_spill]] %s6776_s4 }
   0x6   :  { %6798 = sst [smem:[#allocation36_spill]] %s6777_s5 }
   0x7   :  { %6799 = sst [smem:[#allocation37_spill]] %s6778_s6 }
   0x8   :  { %6800 = sst [smem:[#allocation38_spill]] %s6779_s7 }
   0x9   :  { %6801 = sst [smem:[#allocation39_spill]] %s6780_s8 }
   0xa   :  { %6802 = sst [smem:[#allocation40_spill]] %s6781_s9 }
   0xb   :  { %6803 = sst [smem:[#allocation41_spill]] %s6782_s10 }
   0xc   :  { %6804 = sst [smem:[#allocation42_spill]] %s6783_s11 }
   0xd   :  { %6805 = sst [smem:[#allocation43_spill]] %s6784_s12 }
   0xe   :  { %6806 = sst [smem:[#allocation44_spill]] %s6785_s13 }
   0xf   :  { %6807 = sst [smem:[#allocation45_spill]] %s6786_s14 }
  0x10   :  { %6808 = sst [smem:[#allocation46_spill]] %s6787_s15 }
  0x11   :  { %21 = vsyncpa [#allocation5], 0 }
  0x12   :  { %23 = vsyncpa [#allocation5 + $0x1], 0 }
  0x13   :  { %24 = vsyncpa [#allocation8], 0 }
  0x14   :  { %25 = vsyncpa [#allocation11], 0 }
  0x15   :  { %26 = vsyncpa [#allocation14], 0 }
  0x16   :  { %27 = vsyncpa [#allocation6], 0 }
  0x17   :  { %29 = vsyncpa [#allocation6 + $0x1], 0 }
  0x18   :  { %30 = vsyncpa [#allocation17], 0 }
  0x19   :  { %32 = vsyncpa [#allocation17 + $0x1], 0 }
  0x1a   :  { %33 = vsyncpa [#allocation20], 0 }
  0x1b   :  { %35 = vsyncpa [#allocation20 + $0x1], 0  ;;  %s6036_s18 = smov 0   ;;  %s6038_s19 = smov 0  }
  0x1c   :  { %s6040_s20 = smov 0   ;;  %s6042_s21 = smov 0  }
  0x1d LB: > { %6809 = sst [smem:[#allocation29_spill]] %s5938_s20  ;;  %s6060_s25 = sadd.s32 4294967295, %s5942_s21   ;;  %s5942_s21 = sphi %s6042_s21, %s6840_s21   ;;  %s5938_s20 = sphi %s6040_s20, %s6837_s20   ;;  %s5934_s19 = sphi %s6038_s19, %s6839_s19   ;;  %s5930_s18 = sphi %s6036_s18, %s6838_s18  }
  0x1e   : > { %s6810_s1 = sld [smem:[#allocation32_spill]]  ;;  %p4454_p0 = scmp.ge.s32.totalorder %s5942_s21, 1 }
  0x1f   : > { %p62_p1 = scmp.eq.s32.totalorder %s6060_s25, 0  ;;  %p412_p2 = scmp.lt.s32.totalorder %s5942_s21, 3 }
  0x20   : > { %s5944_s27 = smov [#allocation7]   ;;  %s6812_s5 = sld [smem:[#allocation36_spill]] }
  0x21   : > { %p6065_p3 = pnand %p4454_p0, %p412_p2  ;;  %s425_s28 = sshll.u32 %s5944_s27, 4  ;;  %s426_s28 = int_to_ptr.vmem [resolvable:$true] %s425_s28 }
  0x22   : > { %s6814_s3 = sld [smem:[#allocation34_spill]]  ;;  %s5946_s10 = smov 64  }
  0x23   : > { %p5467_p4 = pneg %p6065_p3  ;;  %s5947_s11 = smov 4  }
  0x24   : > { %s423_s24 = sshll.u32 %s6810_s1, 4  ;;  %s5945_s1 = smov [#allocation10]   ;;  %s424_s24 = int_to_ptr.hbm [resolvable:$true] %s423_s24 }
  0x25   : > { %p6077_p6 = pnand %p5467_p4, %p62_p1  ;;  %s459_s15 = sshll.u32 %s5945_s1, 4  ;;  %s460_s15 = int_to_ptr.vmem [resolvable:$true] %s459_s15 }
  0x26   : > { %s457_s16 = sshll.u32 %s6812_s5, 4  ;;  %s6815_s7 = sld [smem:[#allocation38_spill]]  ;;  %s458_s16 = int_to_ptr.hbm [resolvable:$true] %s457_s16 }
  0x27   : > { %5470 = dma.hbm_to_vmem [thread:$0]  (!%p6077_p6), %s424_s24, 1024, %s426_s28, [#allocation8], %s5946_s10, %s5946_s10, %s5947_s11  }
  0x28   : > { %s440_s27 = sshll.u32 %s6814_s3, 4  ;;  %s5948_s13 = smov [#allocation9]   ;;  %s441_s27 = int_to_ptr.hbm [resolvable:$true] %s440_s27 }
  0x29   : > { %5476 = dma.hbm_to_vmem [thread:$0]  (!%p6077_p6), %s458_s16, 7168, %s460_s15, [#allocation11], %s5946_s10, %s5946_s10, %s5947_s11  }
  0x2a   : > { %s442_s22 = sshll.u32 %s5948_s13, 4  ;;  %s5949_s1 = smov [#allocation12]   ;;  %s443_s22 = int_to_ptr.vmem [resolvable:$true] %s442_s22 }
  0x2b   : > { %5473 = dma.hbm_to_vmem [thread:$0]  (!%p6077_p6), %s441_s27, 7168, %s443_s22, [#allocation8], %s5946_s10, %s5946_s10, %s5947_s11  }
  0x2c   : > { %s474_s5 = sshll.u32 %s6815_s7, 4  ;;  %s476_s15 = sshll.u32 %s5949_s1, 4  ;;  %s475_s5 = int_to_ptr.hbm [resolvable:$true] %s474_s5  ;;  %s477_s15 = int_to_ptr.vmem [resolvable:$true] %s476_s15 }
  0x2d   : > { %s6816_s9 = sld [smem:[#allocation40_spill]]  ;;  %s5950_s13 = smov [#allocation13]  }
  0x2e   : > { %5479 = dma.hbm_to_vmem [thread:$0]  (!%p6077_p6), %s475_s5, 5120, %s477_s15, [#allocation11], %s5946_s10, %s5946_s10, %s5947_s11  }
  0x2f   : > { %s493_s23 = sshll.u32 %s5950_s13, 4  ;;  %s6791_s27 = sadd.s32 4294967294, %s5942_s21   ;;  %s494_s23 = int_to_ptr.vmem [resolvable:$true] %s493_s23 }
  0x30   : > { %s6102_s29 = sadd.s32 1, %s5942_s21   ;;  %s48_s30 = sadd.s32 1, %s5938_s20 }
  0x31   : > { %s45_s22 = ssub.s32 %s5942_s21, %s6102_s29  ;;  %p55_p7 = scmp.ne.s32.totalorder %s5938_s20, %s5934_s19 }
  0x32   : > { %p46_p8 = scmp.eq.s32.totalorder %s45_s22, 0  ;;  %p56_p9 = scmp.eq.s32.totalorder %s5942_s21, 0 }
  0x33   : > { %s491_s16 = sshll.u32 %s6816_s9, 4  ;;  %p61_p10 = scmp.ne.s32.totalorder %s5934_s19, %s5930_s18  ;;  %s492_s16 = int_to_ptr.hbm [resolvable:$true] %s491_s16 }
  0x34   : > { %5482 = dma.hbm_to_vmem [thread:$0]  (!%p6077_p6), %s492_s16, 3072, %s494_s23, [#allocation14], %s5946_s10, %s5946_s10, %s5947_s11  }
  0x35   : > { %p295_p11 = scmp.eq.s32.totalorder %s6060_s25, 1  ;;  %p6116_p12 = por %p56_p9, %p55_p7 }
  0x36   : > { %s6114_s5 = scalar_select %p46_p8, %s5938_s20, %s48_s30  }
  0x37   : > { %p6122_p13 = por %p62_p1, %p61_p10  ;;  %p6126_p0 = por %p295_p11, %p55_p7 }
  0x38   : > { %6817 = sst [smem:[#allocation30_spill]] %s6114_s5  ;;  %p301_p2 = scmp.eq.s32.totalorder %s6791_s27, 1 }
  0x39   : > { %p5508_p4 = scmp.lt.s32.totalorder %s5942_s21, 2  ;;  %s510_s17 = sand.u32 1, %s5938_s20  }
  0x3a   : > { %p6134_p6 = por %p301_p2, %p61_p10  ;;  %s4461_s24 = sshll.u32 %s510_s17, 8 }
  0x3b   : > { %s5229_s28 = sshll.u32 %s5942_s21, 8  ;;  %s6822_s0 = sld [smem:[#allocation31_spill]] }
  0x3c   : > { %s514_s22 = scalar_lea.vmem [#allocation4], %s4461_s24  ;;  %p6144_p7 = pnand %p5508_p4, %p6116_p12 }
  0x3d   : > { %s522_s3 = sshll.u32 %s514_s22, 4  ;;  %s511_s7 = scalar_lea.sflag [#allocation5], %s510_s17  ;;  %s523_s3 = int_to_ptr.vmem [resolvable:$true] %s522_s3 }
  0x3e   : > { %p5718_p9 = pneg %p6144_p7 }
  0x41   : > { %s519_s23 = scalar_lea.hbm %s6822_s0, %s5229_s28  ;;  %s5721_s16 = scalar_lea.hbm %s6822_s0, 512 }
  0x42   : > { %s520_s30 = sshll.u32 %s519_s23, 4  ;;  %s521_s30 = int_to_ptr.hbm [resolvable:$true] %s520_s30 }
  0x43   : > { %s5714_s9 = sshra.s32 %s521_s30, 4  ;;  %s5715_s9 = int_to_ptr.hbm [resolvable:$true] %s5714_s9 }
  0x44   : > { %s5716_s5 = scalar_lea.hbm %s5715_s9, 256  ;;  %p5722_p12 = scmp.lt.s32.totalorder %s5715_s9, %s6822_s0 }
  0x45   : > { %p5717_p8 = scmp.ne.s32.totalorder %s5715_s9, %s5716_s5  ;;  %p5723_p2 = scmp.lt.s32.totalorder %s5721_s16, %s5716_s5 }
  0x47   : > { %p5719_p10 = pnand %p5718_p9, %p5717_p8  ;;  %p5724_p4 = por %p5723_p2, %p5722_p12 }
  0x49   : > { %p5720_p11 = pneg %p5719_p10 }
  0x4b   : > { %p5725_p5 = pnand %p5724_p4, %p5720_p11 }
  0x4d   : > { %5728 = shalt.err (!%p5725_p5)
}
  0x4e   : > { %s5951_s17 = smov 128   ;;  %s5952_s23 = smov 8  }
  0x4f   : > { %5486 = dma.hbm_to_vmem [thread:$0]  (!%p6144_p7), %s521_s30, 4096, %s523_s3, %s511_s7, %s5951_s17, %s5951_s17, %s5952_s23  }
  0x50   : > { %534 = sbr.rel (%p6065_p3) target bundleno = 1422 (0x58e), region = 64  ;;  %s6161_s22 = sand.u32 (!%p6065_p3), 1, %s5934_s19  }
  0x51   : > { %s4465_s9 = sshll.u32 (!%p6065_p3), %s6161_s22, 8  ;;  %s537_s5 = scalar_lea.sflag (!%p6065_p3), [#allocation5], %s6161_s22 }
  0x52   : > { %s6167_s28 = scalar_lea.vmem (!%p6065_p3), [#allocation4], %s4465_s9 }
  0x55   : > { %5901 = dma.done.wait (%p6122_p13), %s537_s5, 4096  }
  0x56   : > { %5903 = vsyncadd (%p6122_p13), %s537_s5, 4294963200 }
  0x57   : > { %5905 = dma.done.wait (%p62_p1), [#allocation8], 8192  }
  0x58   : > { %5907 = vsyncadd (%p62_p1), [#allocation8], 4294959104 }
  0x59   : > { %5909 = dma.done.wait (%p62_p1), [#allocation11], 12288  }
  0x5a   : > { %5911 = vsyncadd (%p62_p1), [#allocation11], 4294955008 }
  0x5b   : > { %5913 = dma.done.wait (%p62_p1), [#allocation14], 3072  }
  0x5c   : > { %5915 = vsyncadd (%p62_p1), [#allocation14], 4294964224  ;;  %v5237_v0 = vld [vmem:[#allocation7 + $0x38] sm:$0xff]  ;;  %v5236_v1 = vld [vmem:[#allocation7 + $0x30] sm:$0xff]  ;;  %v5953_v38 = vmov 0.0   ;;  %s6824_s2 = sld [smem:[#allocation33_spill]] }
  0x5d   : > { %749 = vmatpush.bf16.msra.mxu0 %v5237_v0  ;;  %v5235_v2 = vld [vmem:[#allocation7 + $0x28] sm:$0xff]  ;;  %v5234_v3 = vld [vmem:[#allocation7 + $0x20] sm:$0xff]  ;;  %v5233_v4 = vld [vmem:[#allocation7 + $0x18] sm:$0xff]  ;;  %966 = vst [vmem:[#allocation3 + $0x5] sm:$0x7] %v5953_v38  ;;  %s6215_s26 = scalar_lea.vmem [#allocation15], %s4465_s9 }
  0x5e   : > { %v5232_v5 = vld [vmem:[#allocation7 + $0x10] sm:$0xff]  ;;  %v5231_v6 = vld [vmem:[#allocation7 + $0x8] sm:$0xff]  ;;  %v5230_v7 = vld [vmem:[#allocation7] sm:$0xff]  ;;  %967 = vst [vmem:[#allocation3 + $0x108] sm:$0x7] %v5953_v38  ;;  %s6825_s4 = sld [smem:[#allocation35_spill]] }
  0x5f   : > { %v633_v8 = vld [vmem:[%s6167_s28] sm:$0xff]  ;;  %v634_v9 = vld [vmem:[%s6167_s28 + $0x8] sm:$0xff]  ;;  %v635_v11 = vld [vmem:[%s6167_s28 + $0x10] sm:$0xff]  ;;  %2241 = vst [vmem:[#allocation2 + $0x5] sm:$0x7] %v5953_v38  ;;  %s4472_s30 = sshll.u32 %s6161_s22, 7 }
  0x60   : > { %v665_v10 = vpack.c.bf16 %v634_v9, %v633_v8  ;;  %v636_v12 = vld [vmem:[%s6167_s28 + $0x18] sm:$0xff]  ;;  %v637_v14 = vld [vmem:[%s6167_s28 + $0x20] sm:$0xff]  ;;  %v638_v15 = vld [vmem:[%s6167_s28 + $0x28] sm:$0xff]  ;;  %2242 = vst [vmem:[#allocation2 + $0x88] sm:$0x7] %v5953_v38  ;;  %s6402_s24 = scalar_lea.vmem [#allocation16], %s4472_s30 }
  0x61   : > { %750 = vmatpush.bf16.msra.mxu0 %v5236_v1  ;;  %v666_v13 = vpack.c.bf16 %v636_v12, %v635_v11  ;;  %v667_v16 = vpack.c.bf16 %v638_v15, %v637_v14  ;;  %v639_v17 = vld [vmem:[%s6167_s28 + $0x30] sm:$0xff]  ;;  %v640_v18 = vld [vmem:[%s6167_s28 + $0x38] sm:$0xff]  ;;  %v641_v20 = vld [vmem:[%s6167_s28 + $0x40] sm:$0xff]  ;;  %s6826_s6 = sld [smem:[#allocation37_spill]]  ;;  %s6545_s1 = sshll.u32 %s6161_s22, 6 }
  0x62   : > { %v668_v19 = vpack.c.bf16 %v640_v18, %v639_v17  ;;  %v642_v21 = vld [vmem:[%s6167_s28 + $0x48] sm:$0xff]  ;;  %v643_v23 = vld [vmem:[%s6167_s28 + $0x50] sm:$0xff]  ;;  %v644_v24 = vld [vmem:[%s6167_s28 + $0x58] sm:$0xff]  ;;  %s6551_s17 = scalar_lea.vmem [#allocation18], %s6545_s1  ;;  %s6827_s8 = sld [smem:[#allocation39_spill]] }
  0x63   : > { %v669_v22 = vpack.c.bf16 %v642_v21, %v641_v20  ;;  %v670_v25 = vpack.c.bf16 %v644_v24, %v643_v23  ;;  %v645_v26 = vld [vmem:[%s6167_s28 + $0x60] sm:$0xff]  ;;  %v646_v27 = vld [vmem:[%s6167_s28 + $0x68] sm:$0xff]  ;;  %v5253_v29 = vld [vmem:[#allocation9 + $0x78] sm:$0xff]  ;;  %s6602_s5 = scalar_lea.vmem [#allocation19], %s6545_s1  ;;  %s6828_s12 = sld [smem:[#allocation43_spill]] }
  0x64   : > { %v671_v28 = vpack.c.bf16 %v646_v27, %v645_v26  ;;  %v5245_v30 = vld [vmem:[#allocation9 + $0x38] sm:$0xff]  ;;  %1161 = vmatpush.bf16.msra.mxu1 %v5253_v29  ;;  %v647_v32 = vld [vmem:[%s6167_s28 + $0x70] sm:$0xff]  ;;  %v5251_v39 = vld [vmem:[#allocation9 + $0x68] sm:$0xff]  ;;  %s6630_s10 = sshll.u32 %s6060_s25, 6  ;;  %s4107_s30 = sand.u32 1, %s6060_s25  }
  0x65   : > { %751 = vmatpush.bf16.msra.mxu0 %v5235_v2  ;;  %v5261_v31 = vld [vmem:[#allocation9 + $0xb8] sm:$0xff]  ;;  %1258 = vmatpush.bf16.msra.mxu2 %v5245_v30  ;;  %v5252_v34 = vld [vmem:[#allocation9 + $0x70] sm:$0xff]  ;;  %v5243_v40 = vld [vmem:[#allocation9 + $0x28] sm:$0xff]  ;;  %s4152_s16 = sshll.u32 %s6402_s24, 4  ;;  %s6829_s14 = sld [smem:[#allocation45_spill]]  ;;  %s4153_s16 = int_to_ptr.vmem [resolvable:$true] %s4152_s16 }
  0x66   : > { %v648_v33 = vld [vmem:[%s6167_s28 + $0x78] sm:$0xff]  ;;  %1412 = vmatpush.bf16.msra.mxu3 %v5261_v31  ;;  %v5244_v35 = vld [vmem:[#allocation9 + $0x30] sm:$0xff]  ;;  %v5259_v41 = vld [vmem:[#allocation9 + $0xa8] sm:$0xff] }
  0x67   : > { %v5260_v36 = vld [vmem:[#allocation9 + $0xb0] sm:$0xff]  ;;  %v672_v37 = vpack.c.bf16 %v648_v33, %v647_v32  ;;  %v5250_v42 = vld [vmem:[#allocation9 + $0x60] sm:$0xff]  ;;  %v5249_v45 = vld [vmem:[#allocation9 + $0x58] sm:$0xff] }
  0x68   : > { %1162 = vmatpush.bf16.msra.mxu1 %v5252_v34  ;;  %v5242_v43 = vld [vmem:[#allocation9 + $0x20] sm:$0xff]  ;;  %v5241_v46 = vld [vmem:[#allocation9 + $0x18] sm:$0xff]  ;;  %v650_v49 = vld [vmem:[%s6167_s28 + $0x88] sm:$0xff] }
  0x69   : > { %752 = vmatpush.bf16.msra.mxu0 %v5234_v3  ;;  %1259 = vmatpush.bf16.msra.mxu2 %v5244_v35  ;;  %v5258_v44 = vld [vmem:[#allocation9 + $0xa0] sm:$0xff]  ;;  %v5257_v47 = vld [vmem:[#allocation9 + $0x98] sm:$0xff]  ;;  %v5248_v50 = vld [vmem:[#allocation9 + $0x50] sm:$0xff] }
  0x6a   : > { %1413 = vmatpush.bf16.msra.mxu3 %v5260_v36  ;;  %v649_v48 = vld [vmem:[%s6167_s28 + $0x80] sm:$0xff]  ;;  %v5240_v51 = vld [vmem:[#allocation9 + $0x10] sm:$0xff]  ;;  %v5247_v56 = vld [vmem:[#allocation9 + $0x48] sm:$0xff] }
  0x6b   : > { %v5256_v52 = vld [vmem:[#allocation9 + $0x90] sm:$0xff]  ;;  %v6210_v53 = vld [vmem:[%s6824_s2] ss:$0 sm:$0xff]  ;;  %v673_v54 = vpack.c.bf16 %v650_v49, %v649_v48  ;;  %v5239_v57 = vld [vmem:[#allocation9 + $0x8] sm:$0xff]  ;;  %s4185_s0 = scalar_lea.hbm %s6829_s14, %s6630_s10  ;;  %s6638_s2 = scalar_lea.sflag [#allocation17], %s4107_s30 }
  0x6c   : > { %1163 = vmatpush.bf16.msra.mxu1 %v5251_v39  ;;  %v5255_v58 = vld [vmem:[#allocation9 + $0x88] sm:$0xff]  ;;  %v5246_v61 = vld [vmem:[#allocation9 + $0x40] sm:$0xff]  ;;  %v5293_v1 = vld [vmem:[#allocation9 + $0x1b8] sm:$0xff] }
  0x6d   : > { %753 = vmatpush.bf16.msra.mxu0 %v5233_v4  ;;  %1260 = vmatpush.bf16.msra.mxu2 %v5243_v40  ;;  %v5238_v62 = vld [vmem:[#allocation9] sm:$0xff]  ;;  %v654_v20 = vld [vmem:[%s6167_s28 + $0xa8] sm:$0xff]  ;;  %v5292_v32 = vld [vmem:[#allocation9 + $0x1b0] sm:$0xff] }
  0x6e   : > { %1414 = vmatpush.bf16.msra.mxu3 %v5259_v41  ;;  %v5254_v63 = vld [vmem:[#allocation9 + $0x80] sm:$0xff]  ;;  %v656_v39 = vld [vmem:[%s6167_s28 + $0xb8] sm:$0xff] }
  0x6f   : > { %v657_v49 = vld [vmem:[%s6167_s28 + $0xc0] sm:$0xff] }
  0x70   : > { %1164 = vmatpush.bf16.msra.mxu1 %v5250_v42 }
  0x71   : > { %754 = vmatpush.bf16.msra.mxu0 %v5232_v5  ;;  %1261 = vmatpush.bf16.msra.mxu2 %v5242_v43  ;;  %v651_v5 = vld [vmem:[%s6167_s28 + $0x90] sm:$0xff] }
  0x72   : > { %1415 = vmatpush.bf16.msra.mxu3 %v5258_v44 }
  0x74   : > { %1165 = vmatpush.bf16.msra.mxu1 %v5249_v45 }
  0x75   : > { %755 = vmatpush.bf16.msra.mxu0 %v5231_v6  ;;  %1262 = vmatpush.bf16.msra.mxu2 %v5241_v46  ;;  %v652_v6 = vld [vmem:[%s6167_s28 + $0x98] sm:$0xff] }
  0x76   : > { %1416 = vmatpush.bf16.msra.mxu3 %v5257_v47  ;;  %v674_v8 = vpack.c.bf16 %v652_v6, %v651_v5 }
  0x78   : > { %1166 = vmatpush.bf16.msra.mxu1 %v5248_v50  ;;  %v658_v50 = vld [vmem:[%s6167_s28 + $0xc8] sm:$0xff] }
  0x79   : > { %756 = vmatpush.bf16.msra.mxu0 %v5230_v7  ;;  %1263 = vmatpush.bf16.msra.mxu2 %v5240_v51 }
  0x7a   : > { %1417 = vmatpush.bf16.msra.mxu3 %v5256_v52  ;;  %v677_v52 = vpack.c.bf16 %v658_v50, %v657_v49  ;;  %v664_v49 = vld [vmem:[%s6167_s28 + $0xf8] sm:$0xff] }
  0x7c   : > { %757 = vmatmul.bf16.vlgmr.msra.gmra.mxu0 %v665_v10  ;;  %1167 = vmatpush.bf16.msra.mxu1 %v5247_v56 }
  0x7d   : > { %1264 = vmatpush.bf16.msra.mxu2 %v5239_v57  ;;  %2092 = vmatpush.bf16.msrb.mxu0 %v5293_v1 }
  0x7e   : > { %1418 = vmatpush.bf16.msra.mxu3 %v5255_v58 }
  0x80   : > { %1168 = vmatpush.bf16.msra.mxu1 %v5246_v61 }
  0x81   : > { %1265 = vmatpush.bf16.msra.mxu2 %v5238_v62  ;;  %2093 = vmatpush.bf16.msrb.mxu0 %v5292_v32 }
  0x82   : > { %1419 = vmatpush.bf16.msra.mxu3 %v5254_v63 }
  0x8c   : > { %762 = vmatmul.bf16.gmra.mxu0 %v666_v13 }
  0x9c   : > { %767 = vmatmul.bf16.gmra.mxu0 %v667_v16 }
  0xac   : > { %772 = vmatmul.bf16.gmra.mxu0 %v668_v19  ;;  %v653_v19 = vld [vmem:[%s6167_s28 + $0xa0] sm:$0xff] }
  0xbc   : > { %777 = vmatmul.bf16.gmra.mxu0 %v669_v22  ;;  %v675_v22 = vpack.c.bf16 %v654_v20, %v653_v19 }
  0xcc   : > { %782 = vmatmul.bf16.gmra.mxu0 %v670_v25 }
  0xdc   : > { %787 = vmatmul.bf16.gmra.mxu0 %v671_v28 }
  0xec   : > { %792 = vmatmul.bf16.gmra.mxu0 %v672_v37  ;;  %v655_v37 = vld [vmem:[%s6167_s28 + $0xb0] sm:$0xff] }
  0xed   : > { %v676_v41 = vpack.c.bf16 %v656_v39, %v655_v37 }
  0xf9   : > { %v758_v55 = vpop.f32.mrf.mxu0 }
  0xfa   : > { %v759_v59 = vadd.f32 %v6210_v53, %v758_v55 }
  0xfc   : > { %vm838_vm0 = vcmp.ge.f32.partialorder %v759_v59, 0.0  ;;  %v870_v60 = vmul.f32 0.2, %v759_v59  ;;  %797 = vmatmul.bf16.gmra.mxu0 %v673_v54 }
  0xfe   : > { %v902_v0 = vsel %vm838_vm0, %v759_v59, %v870_v60 }
  0xff   : > { %934 = vst [vmem:[%s6215_s26] sm:$0xff] %v902_v0 }
 0x100   : > { %968 = vst [vmem:[#allocation3 + $0x8] sm:$0xff] %v902_v0 }
 0x101   : > { %v760_v2 = vpop.f32.mrf.mxu0 }
 0x102   : > { %v761_v3 = vadd.f32 %v6210_v53, %v760_v2  ;;  %v5291_v2 = vld [vmem:[#allocation9 + $0x1a8] sm:$0xff] }
 0x103   : > { %2094 = vmatpush.bf16.msrb.mxu0 %v5291_v2 }
 0x104   : > { %vm839_vm1 = vcmp.ge.f32.partialorder %v761_v3, 0.0  ;;  %v871_v4 = vmul.f32 0.2, %v761_v3 }
 0x106   : > { %v903_v7 = vsel %vm839_vm1, %v761_v3, %v871_v4 }
 0x107   : > { %935 = vst [vmem:[%s6215_s26 + $0x8] sm:$0xff] %v903_v7 }
 0x108   : > { %969 = vst [vmem:[#allocation3 + $0x10] sm:$0xff] %v903_v7  ;;  %v659_v7 = vld [vmem:[%s6167_s28 + $0xd0] sm:$0xff] }
 0x109   : > { %v763_v9 = vpop.f32.mrf.mxu0 }
 0x10a   : > { %v764_v10 = vadd.f32 %v6210_v53, %v763_v9 }
 0x10c   : > { %vm840_vm2 = vcmp.ge.f32.partialorder %v764_v10, 0.0  ;;  %v872_v11 = vmul.f32 0.2, %v764_v10  ;;  %802 = vmatmul.bf16.gmra.mxu0 %v674_v8  ;;  %v660_v8 = vld [vmem:[%s6167_s28 + $0xd8] sm:$0xff] }
 0x10e   : > { %v904_v12 = vsel %vm840_vm2, %v764_v10, %v872_v11  ;;  %v678_v10 = vpack.c.bf16 %v660_v8, %v659_v7 }
 0x10f   : > { %936 = vst [vmem:[%s6215_s26 + $0x10] sm:$0xff] %v904_v12  ;;  %v1057_v13 = vld [vmem:[#allocation3 + $0x6] ss:$2 sm:$0xff]  ;;  %v1001_v14 = vld [vmem:[#allocation3 + $0x5] ss:$2 sm:$0xff] }
 0x110   : > { %970 = vst [vmem:[#allocation3 + $0x18] sm:$0xff] %v904_v12  ;;  %v1308_v15 = vld [vmem:[#allocation3 + $0x7] ss:$2 sm:$0xff] }
 0x111   : > { %v765_v16 = vpop.f32.mrf.mxu0  ;;  %3140 = vst [vmem:[#allocation3 + $0x6] sm:$0x3] %v5953_v38  ;;  %v5290_v12 = vld [vmem:[#allocation9 + $0x1a0] sm:$0xff] }
 0x112   : > { %v766_v17 = vadd.f32 %v6210_v53, %v765_v16  ;;  %2095 = vmatpush.bf16.msrb.mxu0 %v5290_v12 }
 0x114   : > { %vm841_vm3 = vcmp.ge.f32.partialorder %v766_v17, 0.0  ;;  %v873_v18 = vmul.f32 0.2, %v766_v17 }
 0x116   : > { %v905_v21 = vsel %vm841_vm3, %v766_v17, %v873_v18 }
 0x117   : > { %937 = vst [vmem:[%s6215_s26 + $0x18] sm:$0xff] %v905_v21  ;;  %v1988_v2 = vld [vmem:[#allocation3 + $0xb] ss:$2 sm:$0xff] }
 0x118   : > { %971 = vst [vmem:[#allocation3 + $0x20] sm:$0xff] %v905_v21 }
 0x119   : > { %v768_v23 = vpop.f32.mrf.mxu0 }
 0x11a   : > { %v769_v24 = vadd.f32 %v6210_v53, %v768_v23  ;;  %v5288_v23 = vld [vmem:[#allocation9 + $0x190] sm:$0xff] }
 0x11c   : > { %vm842_vm4 = vcmp.ge.f32.partialorder %v769_v24, 0.0  ;;  %v874_v25 = vmul.f32 0.2, %v769_v24  ;;  %807 = vmatmul.bf16.gmra.mxu0 %v675_v22 }
 0x11e   : > { %v906_v26 = vsel %vm842_vm4, %v769_v24, %v874_v25 }
 0x11f   : > { %938 = vst [vmem:[%s6215_s26 + $0x20] sm:$0xff] %v906_v26  ;;  %v1059_v27 = vld [vmem:[#allocation3 + $0x16] ss:$2 sm:$0xff]  ;;  %v1003_v28 = vld [vmem:[#allocation3 + $0x15] ss:$2 sm:$0xff] }
 0x120   : > { %972 = vst [vmem:[#allocation3 + $0x28] sm:$0xff] %v906_v26  ;;  %v1088_v29 = vpack.c.bf16 %v1059_v27, %v1057_v13  ;;  %v1032_v30 = vpack.c.bf16 %v1003_v28, %v1001_v14  ;;  %v1310_v31 = vld [vmem:[#allocation3 + $0x17] ss:$2 sm:$0xff] }
 0x121   : > { %v770_v33 = vpop.f32.mrf.mxu0  ;;  %v1339_v34 = vpack.c.bf16 %v1310_v31, %v1308_v15  ;;  %v5289_v15 = vld [vmem:[#allocation9 + $0x198] sm:$0xff]  ;;  %v661_v28 = vld [vmem:[%s6167_s28 + $0xe0] sm:$0xff] }
 0x122   : > { %v771_v35 = vadd.f32 %v6210_v53, %v770_v33  ;;  %1169 = vmatmul.bf16.vlgmr.msra.gmra.mxu1 %v1088_v29  ;;  %1266 = vmatmul.bf16.vlgmr.msra.gmra.mxu2 %v1032_v30  ;;  %v662_v29 = vld [vmem:[%s6167_s28 + $0xe8] sm:$0xff] }
 0x123   : > { %1420 = vmatmul.bf16.vlgmr.msra.gmra.mxu3 %v1339_v34  ;;  %2096 = vmatpush.bf16.msrb.mxu0 %v5289_v15  ;;  %v5287_v30 = vld [vmem:[#allocation9 + $0x188] sm:$0xff]  ;;  %v679_v32 = vpack.c.bf16 %v662_v29, %v661_v28  ;;  %v5286_v34 = vld [vmem:[#allocation9 + $0x180] sm:$0xff] }
 0x124   : > { %vm843_vm5 = vcmp.ge.f32.partialorder %v771_v35, 0.0  ;;  %v875_v36 = vmul.f32 0.2, %v771_v35 }
 0x126   : > { %v907_v40 = vsel %vm843_vm5, %v771_v35, %v875_v36 }
 0x127   : > { %939 = vst [vmem:[%s6215_s26 + $0x28] sm:$0xff] %v907_v40  ;;  %2097 = vmatpush.bf16.msrb.mxu0 %v5288_v23  ;;  %v5284_v23 = vld [vmem:[#allocation9 + $0x170] sm:$0xff] }
 0x128   : > { %973 = vst [vmem:[#allocation3 + $0x30] sm:$0xff] %v907_v40 }
 0x129   : > { %v773_v42 = vpop.f32.mrf.mxu0 }
 0x12a   : > { %v774_v43 = vadd.f32 %v6210_v53, %v773_v42 }
 0x12b   : > { %2098 = vmatpush.bf16.msrb.mxu0 %v5287_v30 }
 0x12c   : > { %vm844_vm6 = vcmp.ge.f32.partialorder %v774_v43, 0.0  ;;  %v876_v44 = vmul.f32 0.2, %v774_v43  ;;  %812 = vmatmul.bf16.gmra.mxu0 %v676_v41 }
 0x12e   : > { %v908_v45 = vsel %vm844_vm6, %v774_v43, %v876_v44 }
 0x12f   : > { %940 = vst [vmem:[%s6215_s26 + $0x30] sm:$0xff] %v908_v45  ;;  %v1061_v58 = vld [vmem:[#allocation3 + $0x26] ss:$2 sm:$0xff]  ;;  %v1005_v59 = vld [vmem:[#allocation3 + $0x25] ss:$2 sm:$0xff]  ;;  %2099 = vmatpush.bf16.msrb.mxu0 %v5286_v34 }
 0x130   : > { %974 = vst [vmem:[#allocation3 + $0x38] sm:$0xff] %v908_v45  ;;  %v1312_v0 = vld [vmem:[#allocation3 + $0x27] ss:$2 sm:$0xff] }
 0x131   : > { %v775_v46 = vpop.f32.mrf.mxu0 }
 0x132   : > { %v776_v47 = vadd.f32 %v6210_v53, %v775_v46 }
 0x134   : > { %vm845_vm7 = vcmp.ge.f32.partialorder %v776_v47, 0.0  ;;  %v877_v48 = vmul.f32 0.2, %v776_v47 }
 0x136   : > { %v909_v51 = vsel %vm845_vm7, %v776_v47, %v877_v48  ;;  %v663_v48 = vld [vmem:[%s6167_s28 + $0xf0] sm:$0xff]  ;;  %s5415_s28 = sshll.u32 %s6060_s25, 7 }
 0x137   : > { %941 = vst [vmem:[%s6215_s26 + $0x38] sm:$0xff] %v909_v51  ;;  %v1992_v28 = vld [vmem:[#allocation3 + $0x2b] ss:$2 sm:$0xff]  ;;  %s4151_s27 = scalar_lea.hbm %s6828_s12, %s5415_s28 }
 0x138   : > { %975 = vst [vmem:[#allocation3 + $0x40] sm:$0xff] %v909_v51  ;;  %v680_v51 = vpack.c.bf16 %v664_v49, %v663_v48  ;;  %s4154_s13 = sshll.u32 %s4151_s27, 4  ;;  %s4155_s13 = int_to_ptr.hbm [resolvable:$true] %s4154_s13 }
 0x139   : > { %v778_v54 = vpop.f32.mrf.mxu0 }
 0x13a   : > { %v779_v55 = vadd.f32 %v6210_v53, %v778_v54 }
 0x13c   : > { %vm846_vm8 = vcmp.ge.f32.partialorder %v779_v55, 0.0  ;;  %v878_v56 = vmul.f32 0.2, %v779_v55  ;;  %817 = vmatmul.bf16.gmra.mxu0 %v677_v52 }
 0x13e   : > { %v910_v57 = vsel %vm846_vm8, %v779_v55, %v878_v56 }
 0x13f   : > { %942 = vst [vmem:[%s6215_s26 + $0x40] sm:$0xff] %v910_v57  ;;  %v1063_v60 = vld [vmem:[#allocation3 + $0x36] ss:$2 sm:$0xff]  ;;  %v1007_v61 = vld [vmem:[#allocation3 + $0x35] ss:$2 sm:$0xff] }
 0x140   : > { %976 = vst [vmem:[#allocation3 + $0x48] sm:$0xff] %v910_v57  ;;  %v1089_v62 = vpack.c.bf16 %v1063_v60, %v1061_v58  ;;  %v1033_v63 = vpack.c.bf16 %v1007_v61, %v1005_v59  ;;  %v1314_v1 = vld [vmem:[#allocation3 + $0x37] ss:$2 sm:$0xff] }
 0x141   : > { %v780_v3 = vpop.f32.mrf.mxu0  ;;  %v1340_v4 = vpack.c.bf16 %v1314_v1, %v1312_v0  ;;  %v1990_v61 = vld [vmem:[#allocation3 + $0x1b] ss:$2 sm:$0xff] }
 0x142   : > { %v781_v5 = vadd.f32 %v6210_v53, %v780_v3  ;;  %1174 = vmatmul.bf16.gmra.mxu1 %v1089_v62  ;;  %1271 = vmatmul.bf16.gmra.mxu2 %v1033_v63  ;;  %v5277_v62 = vld [vmem:[#allocation9 + $0x138] sm:$0xff] }
 0x143   : > { %1425 = vmatmul.bf16.gmra.mxu3 %v1340_v4  ;;  %v5285_v63 = vld [vmem:[#allocation9 + $0x178] sm:$0xff]  ;;  %v2019_v4 = vpack.c.bf16 %v1990_v61, %v1988_v2  ;;  %1752 = vmatpush.bf16.msrb.mxu2 %v5277_v62 }
 0x144   : > { %vm847_vm9 = vcmp.ge.f32.partialorder %v781_v5, 0.0  ;;  %v879_v6 = vmul.f32 0.2, %v781_v5  ;;  %v5269_v0 = vld [vmem:[#allocation9 + $0xf8] sm:$0xff]  ;;  %1922 = vmatpush.bf16.msrb.mxu3 %v5285_v63 }
 0x145   : > { %1582 = vmatpush.bf16.msrb.mxu1 %v5269_v0 }
 0x146   : > { %v911_v9 = vsel %vm847_vm9, %v781_v5, %v879_v6 }
 0x147   : > { %943 = vst [vmem:[%s6215_s26 + $0x48] sm:$0xff] %v911_v9  ;;  %v6249_v18 = vld [vmem:[#allocation3 + $0x3b] ss:$2 sm:$0xff]  ;;  %v6251_v19 = vld [vmem:[#allocation3 + $0x3a] ss:$2 sm:$0xff] }
 0x148   : > { %977 = vst [vmem:[#allocation3 + $0x50] sm:$0xff] %v911_v9  ;;  %v2020_v30 = vpack.c.bf16 %v6249_v18, %v1992_v28  ;;  %1923 = vmatpush.bf16.msrb.mxu3 %v5284_v23  ;;  %v5283_v18 = vld [vmem:[#allocation9 + $0x168] sm:$0xff] }
 0x149   : > { %v783_v11 = vpop.f32.mrf.mxu0 }
 0x14a   : > { %v784_v13 = vadd.f32 %v6210_v53, %v783_v11 }
 0x14c   : > { %vm848_vm10 = vcmp.ge.f32.partialorder %v784_v13, 0.0  ;;  %v880_v14 = vmul.f32 0.2, %v784_v13  ;;  %822 = vmatmul.bf16.gmra.mxu0 %v678_v10  ;;  %1924 = vmatpush.bf16.msrb.mxu3 %v5283_v18 }
 0x14e   : > { %v912_v16 = vsel %vm848_vm10, %v784_v13, %v880_v14 }
 0x14f   : > { %944 = vst [vmem:[%s6215_s26 + $0x50] sm:$0xff] %v912_v16  ;;  %v1065_v17 = vld [vmem:[#allocation3 + $0x46] ss:$2 sm:$0xff]  ;;  %v1009_v20 = vld [vmem:[#allocation3 + $0x45] ss:$2 sm:$0xff] }
 0x150   : > { %978 = vst [vmem:[#allocation3 + $0x58] sm:$0xff] %v912_v16  ;;  %v1316_v21 = vld [vmem:[#allocation3 + $0x47] ss:$2 sm:$0xff]  ;;  %v6253_v24 = vld [vmem:[#allocation3 + $0x48] ss:$2 sm:$0xff] }
 0x151   : > { %v785_v22 = vpop.f32.mrf.mxu0  ;;  %v6255_v25 = vld [vmem:[#allocation3 + $0x49] ss:$2 sm:$0xff] }
 0x152   : > { %v786_v26 = vadd.f32 %v6210_v53, %v785_v22  ;;  %3141 = vst [vmem:[#allocation3 + $0x48] sm:$0x3] %v5953_v38  ;;  %v5276_v22 = vld [vmem:[#allocation9 + $0x130] sm:$0xff] }
 0x153   : > { %1753 = vmatpush.bf16.msrb.mxu2 %v5276_v22 }
 0x154   : > { %vm849_vm11 = vcmp.ge.f32.partialorder %v786_v26, 0.0  ;;  %v881_v27 = vmul.f32 0.2, %v786_v26 }
 0x156   : > { %v913_v31 = vsel %vm849_vm11, %v786_v26, %v881_v27  ;;  %v5268_v26 = vld [vmem:[#allocation9 + $0xf0] sm:$0xff] }
 0x157   : > { %945 = vst [vmem:[%s6215_s26 + $0x58] sm:$0xff] %v913_v31  ;;  %1583 = vmatpush.bf16.msrb.mxu1 %v5268_v26 }
 0x158   : > { %979 = vst [vmem:[#allocation3 + $0x60] sm:$0xff] %v913_v31 }
 0x159   : > { %v788_v33 = vpop.f32.mrf.mxu0 }
 0x15a   : > { %v789_v35 = vadd.f32 %v6210_v53, %v788_v33 }
 0x15c   : > { %vm850_vm12 = vcmp.ge.f32.partialorder %v789_v35, 0.0  ;;  %v882_v36 = vmul.f32 0.2, %v789_v35  ;;  %827 = vmatmul.bf16.gmra.mxu0 %v679_v32 }
 0x15e   : > { %v914_v37 = vsel %vm850_vm12, %v789_v35, %v882_v36 }
 0x15f   : > { %946 = vst [vmem:[%s6215_s26 + $0x60] sm:$0xff] %v914_v37  ;;  %v1067_v39 = vld [vmem:[#allocation3 + $0x56] ss:$2 sm:$0xff]  ;;  %v1011_v40 = vld [vmem:[#allocation3 + $0x55] ss:$2 sm:$0xff] }
 0x160   : > { %980 = vst [vmem:[#allocation3 + $0x68] sm:$0xff] %v914_v37  ;;  %v1090_v41 = vpack.c.bf16 %v1067_v39, %v1065_v17  ;;  %v1034_v42 = vpack.c.bf16 %v1011_v40, %v1009_v20  ;;  %v1318_v43 = vld [vmem:[#allocation3 + $0x57] ss:$2 sm:$0xff] }
 0x161   : > { %v790_v44 = vpop.f32.mrf.mxu0  ;;  %v1341_v45 = vpack.c.bf16 %v1318_v43, %v1316_v21  ;;  %v5275_v39 = vld [vmem:[#allocation9 + $0x128] sm:$0xff] }
 0x162   : > { %v791_v46 = vadd.f32 %v6210_v53, %v790_v44  ;;  %1179 = vmatmul.bf16.gmra.mxu1 %v1090_v41  ;;  %1276 = vmatmul.bf16.gmra.mxu2 %v1034_v42  ;;  %v5267_v40 = vld [vmem:[#allocation9 + $0xe8] sm:$0xff] }
 0x163   : > { %1430 = vmatmul.bf16.gmra.mxu3 %v1341_v45  ;;  %v1996_v42 = vld [vmem:[#allocation3 + $0x4b] ss:$2 sm:$0xff]  ;;  %1754 = vmatpush.bf16.msrb.mxu2 %v5275_v39 }
 0x164   : > { %vm851_vm13 = vcmp.ge.f32.partialorder %v791_v46, 0.0  ;;  %v883_v47 = vmul.f32 0.2, %v791_v46  ;;  %1584 = vmatpush.bf16.msrb.mxu1 %v5267_v40 }
 0x166   : > { %v915_v50 = vsel %vm851_vm13, %v791_v46, %v883_v47 }
 0x167   : > { %947 = vst [vmem:[%s6215_s26 + $0x68] sm:$0xff] %v915_v50  ;;  %v1998_v37 = vld [vmem:[#allocation3 + $0x5b] ss:$2 sm:$0xff] }
 0x168   : > { %981 = vst [vmem:[#allocation3 + $0x70] sm:$0xff] %v915_v50  ;;  %v2021_v44 = vpack.c.bf16 %v1998_v37, %v1996_v42 }
 0x169   : > { %v793_v52 = vpop.f32.mrf.mxu0 }
 0x16a   : > { %v794_v54 = vadd.f32 %v6210_v53, %v793_v52 }
 0x16c   : > { %vm852_vm14 = vcmp.ge.f32.partialorder %v794_v54, 0.0  ;;  %v884_v55 = vmul.f32 0.2, %v794_v54  ;;  %832 = vmatmul.bf16.gmra.mxu0 %v680_v51 }
 0x16e   : > { %v916_v56 = vsel %vm852_vm14, %v794_v54, %v884_v55 }
 0x16f   : > { %948 = vst [vmem:[%s6215_s26 + $0x70] sm:$0xff] %v916_v56  ;;  %v1069_v7 = vld [vmem:[#allocation3 + $0x66] ss:$2 sm:$0xff]  ;;  %v1013_v8 = vld [vmem:[#allocation3 + $0x65] ss:$2 sm:$0xff] }
 0x170   : > { %982 = vst [vmem:[#allocation3 + $0x78] sm:$0xff] %v916_v56  ;;  %v1320_v13 = vld [vmem:[#allocation3 + $0x67] ss:$2 sm:$0xff] }
 0x171   : > { %v795_v57 = vpop.f32.mrf.mxu0 }
 0x172   : > { %v796_v58 = vadd.f32 %v6210_v53, %v795_v57 }
 0x174   : > { %vm853_vm15 = vcmp.ge.f32.partialorder %v796_v58, 0.0  ;;  %v885_v59 = vmul.f32 0.2, %v796_v58 }
 0x176   : > { %v917_v60 = vsel %vm853_vm15, %v796_v58, %v885_v59 }
 0x177   : > { %949 = vst [vmem:[%s6215_s26 + $0x78] sm:$0xff] %v917_v60 }
 0x178   : > { %983 = vst [vmem:[#allocation3 + $0x80] sm:$0xff] %v917_v60 }
 0x179   : > { %v798_v1 = vpop.f32.mrf.mxu0 }
 0x17a   : > { %v799_v3 = vadd.f32 %v6210_v53, %v798_v1 }
 0x17c   : > { %vm854_vm0 = vcmp.ge.f32.partialorder %v799_v3, 0.0  ;;  %v886_v5 = vmul.f32 0.2, %v799_v3  ;;  %2100 = vmatmul.bf16.vlgmr.msrb.gmra.mxu0 %v2019_v4  ;;  %v5282_v4 = vld [vmem:[#allocation9 + $0x160] sm:$0xff] }
 0x17d   : > { %1925 = vmatpush.bf16.msrb.mxu3 %v5282_v4  ;;  %v5279_v4 = vld [vmem:[#allocation9 + $0x148] sm:$0xff] }
 0x17e   : > { %v918_v6 = vsel %vm854_vm0, %v799_v3, %v886_v5  ;;  %v5274_v3 = vld [vmem:[#allocation9 + $0x120] sm:$0xff] }
 0x17f   : > { %950 = vst [vmem:[%s6215_s26 + $0x80] sm:$0xff] %v918_v6  ;;  %v1071_v9 = vld [vmem:[#allocation3 + $0x76] ss:$2 sm:$0xff]  ;;  %v1015_v10 = vld [vmem:[#allocation3 + $0x75] ss:$2 sm:$0xff]  ;;  %1755 = vmatpush.bf16.msrb.mxu2 %v5274_v3 }
 0x180   : > { %984 = vst [vmem:[#allocation3 + $0x88] sm:$0xff] %v918_v6  ;;  %v1091_v11 = vpack.c.bf16 %v1071_v9, %v1069_v7  ;;  %v1035_v12 = vpack.c.bf16 %v1015_v10, %v1013_v8  ;;  %v1322_v14 = vld [vmem:[#allocation3 + $0x77] ss:$2 sm:$0xff] }
 0x181   : > { %v800_v15 = vpop.f32.mrf.mxu0  ;;  %v1342_v16 = vpack.c.bf16 %v1322_v14, %v1320_v13  ;;  %v5266_v5 = vld [vmem:[#allocation9 + $0xe0] sm:$0xff]  ;;  %v5271_v3 = vld [vmem:[#allocation9 + $0x108] sm:$0xff] }
 0x182   : > { %v801_v17 = vadd.f32 %v6210_v53, %v800_v15  ;;  %1184 = vmatmul.bf16.gmra.mxu1 %v1091_v11  ;;  %1281 = vmatmul.bf16.gmra.mxu2 %v1035_v12  ;;  %v2000_v7 = vld [vmem:[#allocation3 + $0x6b] ss:$2 sm:$0xff] }
 0x183   : > { %1435 = vmatmul.bf16.gmra.mxu3 %v1342_v16  ;;  %1585 = vmatpush.bf16.msrb.mxu1 %v5266_v5  ;;  %v5263_v5 = vld [vmem:[#allocation9 + $0xc8] sm:$0xff] }
 0x184   : > { %vm855_vm1 = vcmp.ge.f32.partialorder %v801_v17, 0.0  ;;  %v887_v20 = vmul.f32 0.2, %v801_v17 }
 0x186   : > { %v919_v21 = vsel %vm855_vm1, %v801_v17, %v887_v20  ;;  %v5273_v17 = vld [vmem:[#allocation9 + $0x118] sm:$0xff] }
 0x187   : > { %951 = vst [vmem:[%s6215_s26 + $0x88] sm:$0xff] %v919_v21  ;;  %v2002_v1 = vld [vmem:[#allocation3 + $0x7b] ss:$2 sm:$0xff]  ;;  %1756 = vmatpush.bf16.msrb.mxu2 %v5273_v17 }
 0x188   : > { %985 = vst [vmem:[#allocation3 + $0x90] sm:$0xff] %v919_v21  ;;  %v2022_v9 = vpack.c.bf16 %v2002_v1, %v2000_v7  ;;  %v5281_v20 = vld [vmem:[#allocation9 + $0x158] sm:$0xff] }
 0x189   : > { %v803_v27 = vpop.f32.mrf.mxu0  ;;  %v5265_v21 = vld [vmem:[#allocation9 + $0xd8] sm:$0xff]  ;;  %1926 = vmatpush.bf16.msrb.mxu3 %v5281_v20 }
 0x18a   : > { %v804_v29 = vadd.f32 %v6210_v53, %v803_v27  ;;  %1586 = vmatpush.bf16.msrb.mxu1 %v5265_v21 }
 0x18c   : > { %vm856_vm2 = vcmp.ge.f32.partialorder %v804_v29, 0.0  ;;  %v888_v31 = vmul.f32 0.2, %v804_v29  ;;  %2105 = vmatmul.bf16.gmra.mxu0 %v2020_v30 }
 0x18e   : > { %v920_v32 = vsel %vm856_vm2, %v804_v29, %v888_v31 }
 0x18f   : > { %952 = vst [vmem:[%s6215_s26 + $0x90] sm:$0xff] %v920_v32  ;;  %v1073_v47 = vld [vmem:[#allocation3 + $0x86] ss:$2 sm:$0xff]  ;;  %v1017_v48 = vld [vmem:[#allocation3 + $0x85] ss:$2 sm:$0xff] }
 0x190   : > { %986 = vst [vmem:[#allocation3 + $0x98] sm:$0xff] %v920_v32  ;;  %v1324_v54 = vld [vmem:[#allocation3 + $0x87] ss:$2 sm:$0xff] }
 0x191   : > { %v805_v33 = vpop.f32.mrf.mxu0 }
 0x192   : > { %v806_v34 = vadd.f32 %v6210_v53, %v805_v33 }
 0x194   : > { %vm857_vm3 = vcmp.ge.f32.partialorder %v806_v34, 0.0  ;;  %v889_v35 = vmul.f32 0.2, %v806_v34 }
 0x196   : > { %v921_v36 = vsel %vm857_vm3, %v806_v34, %v889_v35 }
 0x197   : > { %953 = vst [vmem:[%s6215_s26 + $0x98] sm:$0xff] %v921_v36  ;;  %v2004_v23 = vld [vmem:[#allocation3 + $0x8b] ss:$2 sm:$0xff] }
 0x198   : > { %987 = vst [vmem:[#allocation3 + $0xa0] sm:$0xff] %v921_v36 }
 0x199   : > { %v808_v41 = vpop.f32.mrf.mxu0 }
 0x19a   : > { %v809_v43 = vadd.f32 %v6210_v53, %v808_v41 }
 0x19c   : > { %vm858_vm4 = vcmp.ge.f32.partialorder %v809_v43, 0.0  ;;  %v890_v45 = vmul.f32 0.2, %v809_v43  ;;  %2110 = vmatmul.bf16.gmra.mxu0 %v2021_v44 }
 0x19e   : > { %v922_v46 = vsel %vm858_vm4, %v809_v43, %v890_v45 }
 0x19f   : > { %954 = vst [vmem:[%s6215_s26 + $0xa0] sm:$0xff] %v922_v46  ;;  %v1075_v49 = vld [vmem:[#allocation3 + $0x96] ss:$2 sm:$0xff]  ;;  %v1019_v50 = vld [vmem:[#allocation3 + $0x95] ss:$2 sm:$0xff]  ;;  %v1170_v60 = vpop.f32.mrf.mxu1 }
 0x1a0   : > { %988 = vst [vmem:[#allocation3 + $0xa8] sm:$0xff] %v922_v46  ;;  %v1092_v51 = vpack.c.bf16 %v1075_v49, %v1073_v47  ;;  %v1036_v52 = vpack.c.bf16 %v1019_v50, %v1017_v48  ;;  %v1326_v55 = vld [vmem:[#allocation3 + $0x97] ss:$2 sm:$0xff] }
 0x1a1   : > { %v810_v56 = vpop.f32.mrf.mxu0  ;;  %v1343_v57 = vpack.c.bf16 %v1326_v55, %v1324_v54  ;;  %v5280_v54 = vld [vmem:[#allocation9 + $0x150] sm:$0xff] }
 0x1a2   : > { %v811_v58 = vadd.f32 %v6210_v53, %v810_v56  ;;  %1189 = vmatmul.bf16.gmra.mxu1 %v1092_v51  ;;  %1286 = vmatmul.bf16.gmra.mxu2 %v1036_v52  ;;  %v5272_v52 = vld [vmem:[#allocation9 + $0x110] sm:$0xff] }
 0x1a3   : > { %1440 = vmatmul.bf16.gmra.mxu3 %v1343_v57  ;;  %v5264_v55 = vld [vmem:[#allocation9 + $0xd0] sm:$0xff]  ;;  %1757 = vmatpush.bf16.msrb.mxu2 %v5272_v52 }
 0x1a4   : > { %vm859_vm5 = vcmp.ge.f32.partialorder %v811_v58, 0.0  ;;  %v891_v59 = vmul.f32 0.2, %v811_v58  ;;  %1927 = vmatpush.bf16.msrb.mxu3 %v5280_v54  ;;  %1587 = vmatpush.bf16.msrb.mxu1 %v5264_v55 }
 0x1a5   : > { %v1267_v61 = vpop.f32.mrf.mxu2 }
 0x1a6   : > { %v923_v62 = vsel %vm859_vm5, %v811_v58, %v891_v59  ;;  %v1268_v63 = vadd.f32 %v1267_v61, %v1170_v60  ;;  %v1421_v0 = vpop.f32.mrf.mxu3 }
 0x1a7   : > { %955 = vst [vmem:[%s6215_s26 + $0xa8] sm:$0xff] %v923_v62  ;;  %v2006_v16 = vld [vmem:[#allocation3 + $0x9b] ss:$2 sm:$0xff]  ;;  %v6292_v29 = vpop.f32.mrf.mxu1  ;;  %1758 = vmatpush.bf16.msrb.mxu2 %v5271_v3 }
 0x1a8   : > { %989 = vst [vmem:[#allocation3 + $0xb0] sm:$0xff] %v923_v62  ;;  %v6285_v2 = vadd.f32 %v1421_v0, %v1268_v63  ;;  %v2023_v27 = vpack.c.bf16 %v2006_v16, %v2004_v23  ;;  %1928 = vmatpush.bf16.msrb.mxu3 %v5279_v4  ;;  %1588 = vmatpush.bf16.msrb.mxu1 %v5263_v5 }
 0x1a9   : > { %v813_v6 = vpop.f32.mrf.mxu0 }
 0x1aa   : > { %v814_v8 = vadd.f32 %v6210_v53, %v813_v6 }
 0x1ac   : > { %vm860_vm6 = vcmp.ge.f32.partialorder %v814_v8, 0.0  ;;  %v892_v10 = vmul.f32 0.2, %v814_v8  ;;  %2115 = vmatmul.bf16.gmra.mxu0 %v2022_v9 }
 0x1ad   : > { %v6294_v30 = vpop.f32.mrf.mxu2 }
 0x1ae   : > { %v924_v11 = vsel %vm860_vm6, %v814_v8, %v892_v10  ;;  %v6296_v34 = vpop.f32.mrf.mxu3 }
 0x1af   : > { %956 = vst [vmem:[%s6215_s26 + $0xb0] sm:$0xff] %v924_v11  ;;  %v1077_v32 = vld [vmem:[#allocation3 + $0xa6] ss:$2 sm:$0xff]  ;;  %v1021_v33 = vld [vmem:[#allocation3 + $0xa5] ss:$2 sm:$0xff] }
 0x1b0   : > { %990 = vst [vmem:[#allocation3 + $0xb8] sm:$0xff] %v924_v11  ;;  %v1328_v18 = vld [vmem:[#allocation3 + $0xa7] ss:$2 sm:$0xff] }
 0x1b1   : > { %v815_v12 = vpop.f32.mrf.mxu0 }
 0x1b2   : > { %v816_v13 = vadd.f32 %v6210_v53, %v815_v12 }
 0x1b4   : > { %vm861_vm7 = vcmp.ge.f32.partialorder %v816_v13, 0.0  ;;  %v893_v14 = vmul.f32 0.2, %v816_v13 }
 0x1b6   : > { %v925_v15 = vsel %vm861_vm7, %v816_v13, %v893_v14 }
 0x1b7   : > { %957 = vst [vmem:[%s6215_s26 + $0xb8] sm:$0xff] %v925_v15  ;;  %v2008_v57 = vld [vmem:[#allocation3 + $0xab] ss:$2 sm:$0xff] }
 0x1b8   : > { %991 = vst [vmem:[#allocation3 + $0xc0] sm:$0xff] %v925_v15 }
 0x1b9   : > { %v818_v22 = vpop.f32.mrf.mxu0 }
 0x1ba   : > { %v819_v26 = vadd.f32 %v6210_v53, %v818_v22 }
 0x1bc   : > { %vm862_vm8 = vcmp.ge.f32.partialorder %v819_v26, 0.0  ;;  %v894_v28 = vmul.f32 0.2, %v819_v26  ;;  %2120 = vmatmul.bf16.gmra.mxu0 %v2023_v27 }
 0x1be   : > { %v926_v31 = vsel %vm862_vm8, %v819_v26, %v894_v28  ;;  %v5270_v28 = vld [vmem:[#allocation9 + $0x100] sm:$0xff] }
 0x1bf   : > { %958 = vst [vmem:[%s6215_s26 + $0xc0] sm:$0xff] %v926_v31  ;;  %v1079_v35 = vld [vmem:[#allocation3 + $0xb6] ss:$2 sm:$0xff]  ;;  %v1023_v36 = vld [vmem:[#allocation3 + $0xb5] ss:$2 sm:$0xff]  ;;  %v1175_v45 = vpop.f32.mrf.mxu1  ;;  %1759 = vmatpush.bf16.msrb.mxu2 %v5270_v28 }
 0x1c0   : > { %992 = vst [vmem:[#allocation3 + $0xc8] sm:$0xff] %v926_v31  ;;  %v1093_v37 = vpack.c.bf16 %v1079_v35, %v1077_v32  ;;  %v1037_v39 = vpack.c.bf16 %v1023_v36, %v1021_v33  ;;  %v1330_v40 = vld [vmem:[#allocation3 + $0xb7] ss:$2 sm:$0xff]  ;;  %v1484_v28 = vld [vmem:[#allocation3 + $0x38] ss:$2 sm:$0xff] }
 0x1c1   : > { %v820_v41 = vpop.f32.mrf.mxu0  ;;  %v1344_v42 = vpack.c.bf16 %v1330_v40, %v1328_v18  ;;  %v5278_v31 = vld [vmem:[#allocation9 + $0x140] sm:$0xff] }
 0x1c2   : > { %v821_v43 = vadd.f32 %v6210_v53, %v820_v41  ;;  %1194 = vmatmul.bf16.gmra.mxu1 %v1093_v37  ;;  %1291 = vmatmul.bf16.gmra.mxu2 %v1037_v39 }
 0x1c3   : > { %1445 = vmatmul.bf16.gmra.mxu3 %v1344_v42 }
 0x1c4   : > { %vm863_vm9 = vcmp.ge.f32.partialorder %v821_v43, 0.0  ;;  %v895_v44 = vmul.f32 0.2, %v821_v43  ;;  %1929 = vmatpush.bf16.msrb.mxu3 %v5278_v31  ;;  %v1654_v31 = vld [vmem:[#allocation3 + $0x39] ss:$2 sm:$0xff] }
 0x1c5   : > { %v1272_v46 = vpop.f32.mrf.mxu2 }
 0x1c6   : > { %v927_v47 = vsel %vm863_vm9, %v821_v43, %v895_v44  ;;  %v1273_v48 = vadd.f32 %v1272_v46, %v1175_v45  ;;  %v1426_v49 = vpop.f32.mrf.mxu3  ;;  %v5262_v43 = vld [vmem:[#allocation9 + $0xc0] sm:$0xff] }
 0x1c7   : > { %959 = vst [vmem:[%s6215_s26 + $0xc8] sm:$0xff] %v927_v47  ;;  %v2010_v50 = vld [vmem:[#allocation3 + $0xbb] ss:$2 sm:$0xff]  ;;  %v6308_v9 = vpop.f32.mrf.mxu1  ;;  %1589 = vmatpush.bf16.msrb.mxu1 %v5262_v43 }
 0x1c8   : > { %993 = vst [vmem:[#allocation3 + $0xd0] sm:$0xff] %v927_v47  ;;  %v6301_v51 = vadd.f32 %v1426_v49, %v1273_v48  ;;  %v2024_v59 = vpack.c.bf16 %v2010_v50, %v2008_v57 }
 0x1c9   : > { %v823_v56 = vpop.f32.mrf.mxu0 }
 0x1ca   : > { %v824_v58 = vadd.f32 %v6210_v53, %v823_v56 }
 0x1cc   : > { %vm864_vm10 = vcmp.ge.f32.partialorder %v824_v58, 0.0  ;;  %v896_v60 = vmul.f32 0.2, %v824_v58  ;;  %2125 = vmatmul.bf16.gmra.mxu0 %v2024_v59 }
 0x1cd   : > { %v6310_v10 = vpop.f32.mrf.mxu2 }
 0x1ce   : > { %v928_v61 = vsel %vm864_vm10, %v824_v58, %v896_v60  ;;  %v6312_v14 = vpop.f32.mrf.mxu3 }
 0x1cf   : > { %960 = vst [vmem:[%s6215_s26 + $0xd0] sm:$0xff] %v928_v61  ;;  %v1081_v12 = vld [vmem:[#allocation3 + $0xc6] ss:$2 sm:$0xff]  ;;  %v1025_v13 = vld [vmem:[#allocation3 + $0xc5] ss:$2 sm:$0xff] }
 0x1d0   : > { %994 = vst [vmem:[#allocation3 + $0xd8] sm:$0xff] %v928_v61  ;;  %v1332_v21 = vld [vmem:[#allocation3 + $0xc7] ss:$2 sm:$0xff] }
 0x1d1   : > { %v825_v62 = vpop.f32.mrf.mxu0 }
 0x1d2   : > { %v826_v63 = vadd.f32 %v6210_v53, %v825_v62 }
 0x1d4   : > { %vm865_vm11 = vcmp.ge.f32.partialorder %v826_v63, 0.0  ;;  %v897_v0 = vmul.f32 0.2, %v826_v63 }
 0x1d6   : > { %v929_v1 = vsel %vm865_vm11, %v826_v63, %v897_v0 }
 0x1d7   : > { %961 = vst [vmem:[%s6215_s26 + $0xd8] sm:$0xff] %v929_v1  ;;  %v2012_v18 = vld [vmem:[#allocation3 + $0xcb] ss:$2 sm:$0xff] }
 0x1d8   : > { %995 = vst [vmem:[#allocation3 + $0xe0] sm:$0xff] %v929_v1 }
 0x1d9   : > { %v828_v6 = vpop.f32.mrf.mxu0 }
 0x1da   : > { %v829_v7 = vadd.f32 %v6210_v53, %v828_v6 }
 0x1dc   : > { %vm866_vm12 = vcmp.ge.f32.partialorder %v829_v7, 0.0  ;;  %v898_v8 = vmul.f32 0.2, %v829_v7 }
 0x1de   : > { %v930_v11 = vsel %vm866_vm12, %v829_v7, %v898_v8 }
 0x1df   : > { %962 = vst [vmem:[%s6215_s26 + $0xe0] sm:$0xff] %v930_v11  ;;  %v1083_v15 = vld [vmem:[#allocation3 + $0xd6] ss:$2 sm:$0xff]  ;;  %v1027_v16 = vld [vmem:[#allocation3 + $0xd5] ss:$2 sm:$0xff]  ;;  %v1180_v33 = vpop.f32.mrf.mxu1 }
 0x1e0   : > { %996 = vst [vmem:[#allocation3 + $0xe8] sm:$0xff] %v930_v11  ;;  %v1094_v17 = vpack.c.bf16 %v1083_v15, %v1081_v12  ;;  %v1038_v20 = vpack.c.bf16 %v1027_v16, %v1025_v13  ;;  %v1334_v22 = vld [vmem:[#allocation3 + $0xd7] ss:$2 sm:$0xff]  ;;  %v1480_v12 = vld [vmem:[#allocation3 + $0x18] ss:$2 sm:$0xff] }
 0x1e1   : > { %v830_v23 = vpop.f32.mrf.mxu0  ;;  %v1345_v26 = vpack.c.bf16 %v1334_v22, %v1332_v21  ;;  %v1650_v13 = vld [vmem:[#allocation3 + $0x19] ss:$2 sm:$0xff]  ;;  %v1820_v15 = vld [vmem:[#allocation3 + $0x1a] ss:$2 sm:$0xff]  ;;  %v1818_v22 = vld [vmem:[#allocation3 + $0xa] ss:$2 sm:$0xff] }
 0x1e2   : > { %v831_v27 = vadd.f32 %v6210_v53, %v830_v23  ;;  %1199 = vmatmul.bf16.gmra.mxu1 %v1094_v17  ;;  %1296 = vmatmul.bf16.gmra.mxu2 %v1038_v20  ;;  %v1478_v16 = vld [vmem:[#allocation3 + $0x8] ss:$2 sm:$0xff]  ;;  %v1648_v17 = vld [vmem:[#allocation3 + $0x9] ss:$2 sm:$0xff]  ;;  %v1849_v23 = vpack.c.bf16 %v1820_v15, %v1818_v22 }
 0x1e3   : > { %1450 = vmatmul.bf16.gmra.mxu3 %v1345_v26  ;;  %v1509_v20 = vpack.c.bf16 %v1480_v12, %v1478_v16  ;;  %v1679_v21 = vpack.c.bf16 %v1650_v13, %v1648_v17  ;;  %v1666_v12 = vld [vmem:[#allocation3 + $0x99] ss:$2 sm:$0xff]  ;;  %v1836_v13 = vld [vmem:[#allocation3 + $0x9a] ss:$2 sm:$0xff]  ;;  %v1664_v16 = vld [vmem:[#allocation3 + $0x89] ss:$2 sm:$0xff] }
 0x1e4   : > { %vm867_vm13 = vcmp.ge.f32.partialorder %v831_v27, 0.0  ;;  %v899_v32 = vmul.f32 0.2, %v831_v27  ;;  %v1494_v15 = vld [vmem:[#allocation3 + $0x88] ss:$2 sm:$0xff] }
 0x1e5   : > { %v1277_v35 = vpop.f32.mrf.mxu2 }
 0x1e6   : > { %v931_v36 = vsel %vm867_vm13, %v831_v27, %v899_v32  ;;  %v1278_v37 = vadd.f32 %v1277_v35, %v1180_v33  ;;  %v1431_v39 = vpop.f32.mrf.mxu3  ;;  %v1482_v33 = vld [vmem:[#allocation3 + $0x28] ss:$2 sm:$0xff]  ;;  %v1652_v35 = vld [vmem:[#allocation3 + $0x29] ss:$2 sm:$0xff] }
 0x1e7   : > { %963 = vst [vmem:[%s6215_s26 + $0xe8] sm:$0xff] %v931_v36  ;;  %v2014_v40 = vld [vmem:[#allocation3 + $0xdb] ss:$2 sm:$0xff]  ;;  %v6323_v54 = vpop.f32.mrf.mxu1 }
 0x1e8   : > { %997 = vst [vmem:[#allocation3 + $0xf0] sm:$0xff] %v931_v36  ;;  %v6317_v41 = vadd.f32 %v1431_v39, %v1278_v37  ;;  %v2025_v42 = vpack.c.bf16 %v2014_v40, %v2012_v18  ;;  %v1510_v36 = vpack.c.bf16 %v1484_v28, %v1482_v33  ;;  %v1680_v37 = vpack.c.bf16 %v1654_v31, %v1652_v35  ;;  %v1822_v39 = vld [vmem:[#allocation3 + $0x2a] ss:$2 sm:$0xff]  ;;  %v1670_v35 = vld [vmem:[#allocation3 + $0xb9] ss:$2 sm:$0xff] }
 0x1e9   : > { %v833_v44 = vpop.f32.mrf.mxu0  ;;  %v1850_v18 = vpack.c.bf16 %v6251_v19, %v1822_v39  ;;  %v1500_v33 = vld [vmem:[#allocation3 + $0xb8] ss:$2 sm:$0xff]  ;;  %v1498_v39 = vld [vmem:[#allocation3 + $0xa8] ss:$2 sm:$0xff] }
 0x1ea   : > { %v834_v45 = vadd.f32 %v6210_v53, %v833_v44  ;;  %2130 = vmatmul.bf16.gmra.mxu0 %v2025_v42 }
 0x1ec   : > { %vm868_vm14 = vcmp.ge.f32.partialorder %v834_v45, 0.0  ;;  %v900_v46 = vmul.f32 0.2, %v834_v45 }
 0x1ed   : > { %v6325_v55 = vpop.f32.mrf.mxu2 }
 0x1ee   : > { %v932_v47 = vsel %vm868_vm14, %v834_v45, %v900_v46  ;;  %v6327_v59 = vpop.f32.mrf.mxu3  ;;  %v1488_v46 = vld [vmem:[#allocation3 + $0x58] ss:$2 sm:$0xff] }
 0x1ef   : > { %964 = vst [vmem:[%s6215_s26 + $0xf0] sm:$0xff] %v932_v47  ;;  %v1085_v56 = vld [vmem:[#allocation3 + $0xe6] ss:$2 sm:$0xff]  ;;  %v1029_v57 = vld [vmem:[#allocation3 + $0xe5] ss:$2 sm:$0xff] }
 0x1f0   : > { %998 = vst [vmem:[#allocation3 + $0xf8] sm:$0xff] %v932_v47  ;;  %v1336_v58 = vld [vmem:[#allocation3 + $0xe7] ss:$2 sm:$0xff] }
 0x1f1   : > { %v835_v48 = vpop.f32.mrf.mxu0  ;;  %v1658_v47 = vld [vmem:[#allocation3 + $0x59] ss:$2 sm:$0xff] }
 0x1f2   : > { %v836_v49 = vadd.f32 %v6210_v53, %v835_v48  ;;  %v1828_v48 = vld [vmem:[#allocation3 + $0x5a] ss:$2 sm:$0xff] }
 0x1f4   : > { %vm869_vm15 = vcmp.ge.f32.partialorder %v836_v49, 0.0  ;;  %v901_v50 = vmul.f32 0.2, %v836_v49 }
 0x1f6   : > { %v933_v52 = vsel %vm869_vm15, %v836_v49, %v901_v50  ;;  %v1511_v49 = vpack.c.bf16 %v1488_v46, %v6253_v24  ;;  %v1681_v50 = vpack.c.bf16 %v1658_v47, %v6255_v25  ;;  %v5308_v46 = vld [vmem:[#allocation10 + $0x70] sm:$0xff] }
 0x1f7   : > { %965 = vst [vmem:[%s6215_s26 + $0xf8] sm:$0xff] %v933_v52  ;;  %v2016_v1 = vld [vmem:[#allocation3 + $0xeb] ss:$2 sm:$0xff] }
 0x1f8   : > { %999 = vst [vmem:[#allocation3 + $0x100] sm:$0xff] %v933_v52  ;;  %v1826_v52 = vld [vmem:[#allocation3 + $0x4a] ss:$2 sm:$0xff] }
 0x1ff   : > { %v1087_v60 = vld [vmem:[#allocation3 + $0xf6] ss:$2 sm:$0xff]  ;;  %v1031_v61 = vld [vmem:[#allocation3 + $0xf5] ss:$2 sm:$0xff]  ;;  %v1185_v5 = vpop.f32.mrf.mxu1 }
 0x200   : > { %v1338_v62 = vld [vmem:[#allocation3 + $0xf7] ss:$2 sm:$0xff]  ;;  %v1095_v63 = vpack.c.bf16 %v1087_v60, %v1085_v56  ;;  %v1039_v0 = vpack.c.bf16 %v1031_v61, %v1029_v57  ;;  %v1851_v56 = vpack.c.bf16 %v1828_v48, %v1826_v52  ;;  %v1832_v61 = vld [vmem:[#allocation3 + $0x7a] ss:$2 sm:$0xff] }
 0x201   : > { %v1346_v53 = vpack.c.bf16 %v1338_v62, %v1336_v58  ;;  %v2018_v3 = vld [vmem:[#allocation3 + $0xfb] ss:$2 sm:$0xff]  ;;  %v1492_v58 = vld [vmem:[#allocation3 + $0x78] ss:$2 sm:$0xff] }
 0x202   : > { %v2026_v4 = vpack.c.bf16 %v2018_v3, %v2016_v1  ;;  %1204 = vmatmul.bf16.gmra.mxu1 %v1095_v63  ;;  %1301 = vmatmul.bf16.gmra.mxu2 %v1039_v0  ;;  %v1662_v60 = vld [vmem:[#allocation3 + $0x79] ss:$2 sm:$0xff]  ;;  %v1490_v63 = vld [vmem:[#allocation3 + $0x68] ss:$2 sm:$0xff]  ;;  %v1660_v0 = vld [vmem:[#allocation3 + $0x69] ss:$2 sm:$0xff] }
 0x203   : > { %1455 = vmatmul.bf16.gmra.mxu3 %v1346_v53  ;;  %v1512_v53 = vpack.c.bf16 %v1492_v58, %v1490_v63  ;;  %v1682_v24 = vpack.c.bf16 %v1662_v60, %v1660_v0  ;;  %v1830_v1 = vld [vmem:[#allocation3 + $0x6a] ss:$2 sm:$0xff]  ;;  %v1844_v63 = vld [vmem:[#allocation3 + $0xda] ss:$2 sm:$0xff] }
 0x204   : > { %2135 = vmatmul.bf16.gmra.mxu0 %v2026_v4  ;;  %v1852_v25 = vpack.c.bf16 %v1832_v61, %v1830_v1  ;;  %v5317_v58 = vld [vmem:[#allocation10 + $0xb8] sm:$0xff]  ;;  %v1504_v60 = vld [vmem:[#allocation3 + $0xd8] ss:$2 sm:$0xff]  ;;  %v1674_v61 = vld [vmem:[#allocation3 + $0xd9] ss:$2 sm:$0xff] }
 0x205   : > { %v1282_v6 = vpop.f32.mrf.mxu2  ;;  %2571 = vmatpush.bf16.msra.mxu3 %v5317_v58  ;;  %v1502_v0 = vld [vmem:[#allocation3 + $0xc8] ss:$2 sm:$0xff] }
 0x206   : > { %v1283_v7 = vadd.f32 %v1282_v6, %v1185_v5  ;;  %v1436_v8 = vpop.f32.mrf.mxu3 }
 0x207   : > { %v6331_v26 = vpop.f32.mrf.mxu1 }
 0x208   : > { %v6329_v11 = vadd.f32 %v1436_v8, %v1283_v7  ;;  %v1496_v8 = vld [vmem:[#allocation3 + $0x98] ss:$2 sm:$0xff] }
 0x209   : > { %v1513_v17 = vpack.c.bf16 %v1496_v8, %v1494_v15  ;;  %v1508_v8 = vld [vmem:[#allocation3 + $0xf8] ss:$2 sm:$0xff] }
 0x20a   : > { %v1848_v15 = vld [vmem:[#allocation3 + $0xfa] ss:$2 sm:$0xff] }
 0x20d   : > { %v6333_v27 = vpop.f32.mrf.mxu2 }
 0x20e   : > { %v6335_v32 = vpop.f32.mrf.mxu3 }
 0x212   : > { %1590 = vmatmul.bf16.vlgmr.msrb.gmra.mxu1 %v1509_v20  ;;  %1760 = vmatmul.bf16.vlgmr.msrb.gmra.mxu2 %v1679_v21  ;;  %v1683_v20 = vpack.c.bf16 %v1666_v12, %v1664_v16  ;;  %v1834_v21 = vld [vmem:[#allocation3 + $0x8a] ss:$2 sm:$0xff]  ;;  %v1678_v12 = vld [vmem:[#allocation3 + $0xf9] ss:$2 sm:$0xff]  ;;  %v2101_v16 = vpop.f32.mrf.mxu0 }
 0x213   : > { %1930 = vmatmul.bf16.vlgmr.msrb.gmra.mxu3 %v1849_v23  ;;  %v1853_v22 = vpack.c.bf16 %v1836_v13, %v1834_v21  ;;  %v5309_v23 = vld [vmem:[#allocation10 + $0x78] sm:$0xff] }
 0x214   : > { %2380 = vmatpush.bf16.msra.mxu1 %v5309_v23  ;;  %v1676_v21 = vld [vmem:[#allocation3 + $0xe9] ss:$2 sm:$0xff] }
 0x215   : > { %v1686_v23 = vpack.c.bf16 %v1678_v12, %v1676_v21  ;;  %v1270_v12 = vadd.f32 %v6294_v30, %v6292_v29 }
 0x217   : > { %v1462_v29 = vadd.f32 %v6296_v34, %v1270_v12 }
 0x218   : > { %2381 = vmatpush.bf16.msra.mxu1 %v5308_v46 }
 0x21a   : > { %v6368_v46 = vpop.f32.mrf.mxu0 }
 0x21f   : > { %v1190_v40 = vpop.f32.mrf.mxu1 }
 0x222   : > { %1595 = vmatmul.bf16.gmra.mxu1 %v1510_v36  ;;  %1765 = vmatmul.bf16.gmra.mxu2 %v1680_v37  ;;  %v1840_v36 = vld [vmem:[#allocation3 + $0xba] ss:$2 sm:$0xff] }
 0x223   : > { %1935 = vmatmul.bf16.gmra.mxu3 %v1850_v18  ;;  %v1668_v18 = vld [vmem:[#allocation3 + $0xa9] ss:$2 sm:$0xff] }
 0x225   : > { %v1287_v42 = vpop.f32.mrf.mxu2 }
 0x226   : > { %v1288_v43 = vadd.f32 %v1287_v42, %v1190_v40  ;;  %v1441_v44 = vpop.f32.mrf.mxu3  ;;  %v1514_v40 = vpack.c.bf16 %v1500_v33, %v1498_v39  ;;  %v1684_v42 = vpack.c.bf16 %v1670_v35, %v1668_v18  ;;  %v1846_v33 = vld [vmem:[#allocation3 + $0xea] ss:$2 sm:$0xff]  ;;  %v5316_v39 = vld [vmem:[#allocation10 + $0xb0] sm:$0xff] }
 0x227   : > { %v6342_v19 = vpop.f32.mrf.mxu1  ;;  %v1856_v35 = vpack.c.bf16 %v1848_v15, %v1846_v33  ;;  %2572 = vmatpush.bf16.msra.mxu3 %v5316_v39  ;;  %v5312_v33 = vld [vmem:[#allocation10 + $0x90] sm:$0xff] }
 0x228   : > { %v6338_v45 = vadd.f32 %v1441_v44, %v1288_v43  ;;  %v1838_v43 = vld [vmem:[#allocation3 + $0xaa] ss:$2 sm:$0xff] }
 0x229   : > { %v1854_v44 = vpack.c.bf16 %v1840_v36, %v1838_v43  ;;  %v5300_v36 = vld [vmem:[#allocation10 + $0x30] sm:$0xff] }
 0x22d   : > { %v6344_v57 = vpop.f32.mrf.mxu2 }
 0x22e   : > { %v6346_v62 = vpop.f32.mrf.mxu3 }
 0x232   : > { %1600 = vmatmul.bf16.gmra.mxu1 %v1511_v49  ;;  %1770 = vmatmul.bf16.gmra.mxu2 %v1681_v50 }
 0x233   : > { %1940 = vmatmul.bf16.gmra.mxu3 %v1851_v56  ;;  %v5301_v56 = vld [vmem:[#allocation10 + $0x38] sm:$0xff] }
 0x234   : > { %2457 = vmatpush.bf16.msra.mxu2 %v5301_v56 }
 0x238   : > { %2458 = vmatpush.bf16.msra.mxu2 %v5300_v36 }
 0x23f   : > { %v1195_v3 = vpop.f32.mrf.mxu1 }
 0x242   : > { %1605 = vmatmul.bf16.gmra.mxu1 %v1512_v53  ;;  %1775 = vmatmul.bf16.gmra.mxu2 %v1682_v24  ;;  %v1672_v53 = vld [vmem:[#allocation3 + $0xc9] ss:$2 sm:$0xff]  ;;  %v1515_v24 = vpack.c.bf16 %v1504_v60, %v1502_v0  ;;  %v6377_v0 = vld [vmem:[#allocation10 + $0x1b0] sm:$0xff] }
 0x243   : > { %1945 = vmatmul.bf16.gmra.mxu3 %v1852_v25  ;;  %v1685_v1 = vpack.c.bf16 %v1674_v61, %v1672_v53  ;;  %v1842_v25 = vld [vmem:[#allocation3 + $0xca] ss:$2 sm:$0xff]  ;;  %v6379_v53 = vpop.f32.mrf.mxu0 }
 0x244   : > { %v5298_v61 = vld [vmem:[#allocation10 + $0x20] sm:$0xff] }
 0x245   : > { %v1292_v4 = vpop.f32.mrf.mxu2 }
 0x246   : > { %v1293_v5 = vadd.f32 %v1292_v4, %v1195_v3  ;;  %v1446_v6 = vpop.f32.mrf.mxu3  ;;  %v5307_v3 = vld [vmem:[#allocation10 + $0x68] sm:$0xff]  ;;  %v1855_v4 = vpack.c.bf16 %v1844_v63, %v1842_v25  ;;  %v5314_v63 = vld [vmem:[#allocation10 + $0xa0] sm:$0xff]  ;;  %v5297_v25 = vld [vmem:[#allocation10 + $0x18] sm:$0xff] }
 0x247   : > { %v6350_v28 = vpop.f32.mrf.mxu1  ;;  %2382 = vmatpush.bf16.msra.mxu1 %v5307_v3  ;;  %v5313_v3 = vld [vmem:[#allocation10 + $0x98] sm:$0xff] }
 0x248   : > { %v6348_v7 = vadd.f32 %v1446_v6, %v1293_v5 }
 0x24d   : > { %v6352_v31 = vpop.f32.mrf.mxu2 }
 0x24e   : > { %v6354_v37 = vpop.f32.mrf.mxu3 }
 0x252   : > { %1610 = vmatmul.bf16.gmra.mxu1 %v1513_v17  ;;  %1780 = vmatmul.bf16.gmra.mxu2 %v1683_v20  ;;  %v1506_v20 = vld [vmem:[#allocation3 + $0xe8] ss:$2 sm:$0xff] }
 0x253   : > { %1950 = vmatmul.bf16.gmra.mxu3 %v1853_v22  ;;  %v1516_v22 = vpack.c.bf16 %v1508_v8, %v1506_v20  ;;  %v6383_v8 = vld [vmem:[#allocation10 + $0x1a8] sm:$0xff]  ;;  %v6390_v20 = vld [vmem:[%s6825_s4] ss:$0 sm:$0xff]  ;;  %s5758_s4 = sshra.s32 %s4155_s13, 4  ;;  %s5759_s4 = int_to_ptr.hbm [resolvable:$true] %s5758_s4 }
 0x254   : > { %p5765_p13 = scmp.lt.s32.totalorder %s5759_s4, %s6828_s12 }
 0x25f   : > { %v1200_v47 = vpop.f32.mrf.mxu1 }
 0x262   : > { %1615 = vmatmul.bf16.gmra.mxu1 %v1514_v40  ;;  %1785 = vmatmul.bf16.gmra.mxu2 %v1684_v42 }
 0x263   : > { %1955 = vmatmul.bf16.gmra.mxu3 %v1854_v44 }
 0x265   : > { %v1297_v48 = vpop.f32.mrf.mxu2 }
 0x266   : > { %v1298_v49 = vadd.f32 %v1297_v48, %v1200_v47  ;;  %v1451_v50 = vpop.f32.mrf.mxu3  ;;  %v5306_v47 = vld [vmem:[#allocation10 + $0x60] sm:$0xff]  ;;  %v5299_v48 = vld [vmem:[#allocation10 + $0x28] sm:$0xff] }
 0x267   : > { %v6358_v5 = vpop.f32.mrf.mxu1  ;;  %2383 = vmatpush.bf16.msra.mxu1 %v5306_v47  ;;  %2459 = vmatpush.bf16.msra.mxu2 %v5299_v48  ;;  %v2108_v47 = vpop.f32.mrf.mxu0 }
 0x268   : > { %v6356_v52 = vadd.f32 %v1451_v50, %v1298_v49  ;;  %v5315_v49 = vld [vmem:[#allocation10 + $0xa8] sm:$0xff]  ;;  %v6370_v50 = vld [vmem:[#allocation10 + $0x1b8] sm:$0xff] }
 0x269   : > { %2573 = vmatpush.bf16.msra.mxu3 %v5315_v49  ;;  %3059 = vmatpush.bf16.msra.mxu0 %v6370_v50  ;;  %v6399_v49 = vld [vmem:[#allocation10 + $0x198] sm:$0xff] }
 0x26b   : > { %2460 = vmatpush.bf16.msra.mxu2 %v5298_v61 }
 0x26d   : > { %v6360_v6 = vpop.f32.mrf.mxu2  ;;  %2574 = vmatpush.bf16.msra.mxu3 %v5314_v63  ;;  %3060 = vmatpush.bf16.msra.mxu0 %v6377_v0 }
 0x26e   : > { %v6362_v13 = vpop.f32.mrf.mxu3 }
 0x26f   : > { %2461 = vmatpush.bf16.msra.mxu2 %v5297_v25  ;;  %v5294_v25 = vld [vmem:[#allocation10] sm:$0xff] }
 0x271   : > { %2575 = vmatpush.bf16.msra.mxu3 %v5313_v3  ;;  %3061 = vmatpush.bf16.msra.mxu0 %v6383_v8  ;;  %v5310_v3 = vld [vmem:[#allocation10 + $0x80] sm:$0xff] }
 0x272   : > { %1620 = vmatmul.bf16.gmra.mxu1 %v1515_v24  ;;  %1790 = vmatmul.bf16.gmra.mxu2 %v1685_v1  ;;  %v5305_v1 = vld [vmem:[#allocation10 + $0x58] sm:$0xff] }
 0x273   : > { %1960 = vmatmul.bf16.gmra.mxu3 %v1855_v4  ;;  %2384 = vmatpush.bf16.msra.mxu1 %v5305_v1  ;;  %v5302_v1 = vld [vmem:[#allocation10 + $0x40] sm:$0xff] }
 0x275   : > { %2576 = vmatpush.bf16.msra.mxu3 %v5312_v33 }
 0x27f   : > { %v1205_v17 = vpop.f32.mrf.mxu1 }
 0x282   : > { %1625 = vmatmul.bf16.gmra.mxu1 %v1516_v22  ;;  %1795 = vmatmul.bf16.gmra.mxu2 %v1686_v23  ;;  %v5304_v22 = vld [vmem:[#allocation10 + $0x50] sm:$0xff] }
 0x283   : > { %1965 = vmatmul.bf16.gmra.mxu3 %v1856_v35  ;;  %v5296_v23 = vld [vmem:[#allocation10 + $0x10] sm:$0xff]  ;;  %v6393_v35 = vld [vmem:[#allocation10 + $0x1a0] sm:$0xff]  ;;  %2385 = vmatpush.bf16.msra.mxu1 %v5304_v22  ;;  %v1275_v22 = vadd.f32 %v6310_v10, %v6308_v9 }
 0x284   : > { %2462 = vmatpush.bf16.msra.mxu2 %v5296_v23  ;;  %3062 = vmatpush.bf16.msra.mxu0 %v6393_v35 }
 0x285   : > { %v1302_v18 = vpop.f32.mrf.mxu2 }
 0x286   : > { %v1303_v40 = vadd.f32 %v1302_v18, %v1205_v17  ;;  %v1456_v42 = vpop.f32.mrf.mxu3  ;;  %v5303_v18 = vld [vmem:[#allocation10 + $0x48] sm:$0xff] }
 0x287   : > { %v6364_v43 = vpop.f32.mrf.mxu1  ;;  %2386 = vmatpush.bf16.msra.mxu1 %v5303_v18  ;;  %v6416_v18 = vld [vmem:[#allocation10 + $0x180] sm:$0xff] }
 0x288   : > { %v6366_v44 = vadd.f32 %v1456_v42, %v1303_v40  ;;  %v5295_v40 = vld [vmem:[#allocation10 + $0x8] sm:$0xff]  ;;  %3063 = vmatpush.bf16.msra.mxu0 %v6399_v49 }
 0x289   : > { %v5311_v42 = vld [vmem:[#allocation10 + $0x88] sm:$0xff]  ;;  %2463 = vmatpush.bf16.msra.mxu2 %v5295_v40 }
 0x28a   : > { %2577 = vmatpush.bf16.msra.mxu3 %v5311_v42 }
 0x28b   : > { %2387 = vmatpush.bf16.msra.mxu1 %v5302_v1 }
 0x28d   : > { %v6372_v56 = vpop.f32.mrf.mxu2  ;;  %2464 = vmatpush.bf16.msra.mxu2 %v5294_v25 }
 0x28e   : > { %v6374_v58 = vpop.f32.mrf.mxu3  ;;  %2578 = vmatpush.bf16.msra.mxu3 %v5310_v3 }
 0x28f   : > { %v1591_v60 = vpop.f32.mrf.mxu1 }
 0x290   : > { %v1631_v24 = vadd.f32 %v1591_v60, %v6285_v2 }
 0x295   : > { %v1761_v4 = vpop.f32.mrf.mxu2 }
 0x296   : > { %v1801_v15 = vadd.f32 %v1761_v4, %v1631_v24  ;;  %v1931_v17 = vpop.f32.mrf.mxu3  ;;  %v6405_v4 = vld [vmem:[#allocation10 + $0x190] sm:$0xff] }
 0x297   : > { %v1593_v2 = vpop.f32.mrf.mxu1  ;;  %3064 = vmatpush.bf16.msra.mxu0 %v6405_v4 }
 0x298   : > { %v1971_v21 = vadd.f32 %v1931_v17, %v1801_v15  ;;  %v1632_v39 = vadd.f32 %v1593_v2, %v1462_v29  ;;  %v6411_v2 = vld [vmem:[#allocation10 + $0x188] sm:$0xff]  ;;  %v2111_v29 = vpop.f32.mrf.mxu0 }
 0x29a   : > { %v2141_v30 = vadd.f32 %v2101_v16, %v1971_v21 }
 0x29b   : > { %3065 = vmatpush.bf16.msra.mxu0 %v6411_v2 }
 0x29c   : > { %v2161_v36 = vadd.f32 %v6390_v20, %v2141_v30 }
 0x29d   : > { %v1763_v48 = vpop.f32.mrf.mxu2 }
 0x29e   : > { %vm2177_vm0 = vcmp.ge.f32.partialorder %v2161_v36, 0.0  ;;  %v2193_v60 = vmul.f32 0.2, %v2161_v36  ;;  %v1802_v34 = vadd.f32 %v1763_v48, %v1632_v39  ;;  %v1933_v16 = vpop.f32.mrf.mxu3 }
 0x29f   : > { %v1596_v61 = vpop.f32.mrf.mxu1  ;;  %3066 = vmatpush.bf16.msra.mxu0 %v6416_v18 }
 0x2a0   : > { %v2209_v63 = vsel %vm2177_vm0, %v2161_v36, %v2193_v60  ;;  %v1972_v24 = vadd.f32 %v1933_v16, %v1802_v34  ;;  %v1633_v17 = vadd.f32 %v1596_v61, %v6301_v51  ;;  %v1464_v51 = vadd.f32 %v6312_v14, %v1275_v22 }
 0x2a1   : > { %2225 = vst [vmem:[%s6402_s24] sm:$0xff] %v2209_v63 }
 0x2a2   : > { %2243 = vst [vmem:[#allocation2 + $0x8] sm:$0xff] %v2209_v63  ;;  %v2142_v12 = vadd.f32 %v6368_v46, %v1972_v24  ;;  %v2113_v24 = vpop.f32.mrf.mxu0 }
 0x2a4   : > { %v2162_v15 = vadd.f32 %v6390_v20, %v2142_v12 }
 0x2a5   : > { %v1766_v21 = vpop.f32.mrf.mxu2 }
 0x2a6   : > { %vm2178_vm1 = vcmp.ge.f32.partialorder %v2162_v15, 0.0  ;;  %v2194_v23 = vmul.f32 0.2, %v2162_v15  ;;  %v1803_v33 = vadd.f32 %v1766_v21, %v1633_v17  ;;  %v1936_v46 = vpop.f32.mrf.mxu3 }
 0x2a7   : > { %v1598_v30 = vpop.f32.mrf.mxu1 }
 0x2a8   : > { %v2210_v36 = vsel %vm2178_vm1, %v2162_v15, %v2194_v23  ;;  %v1973_v39 = vadd.f32 %v1936_v46, %v1803_v33  ;;  %v1634_v10 = vadd.f32 %v1598_v30, %v1464_v51  ;;  %v1280_v15 = vadd.f32 %v6325_v55, %v6323_v54 }
 0x2a9   : > { %2226 = vst [vmem:[%s6402_s24 + $0x8] sm:$0xff] %v2210_v36 }
 0x2aa   : > { %2244 = vst [vmem:[#allocation2 + $0x10] sm:$0xff] %v2210_v36  ;;  %v2143_v40 = vadd.f32 %v6379_v53, %v1973_v39  ;;  %v2116_v36 = vpop.f32.mrf.mxu0 }
 0x2ac   : > { %v2163_v9 = vadd.f32 %v6390_v20, %v2143_v40 }
 0x2ad   : > { %v1768_v42 = vpop.f32.mrf.mxu2 }
 0x2ae   : > { %vm2179_vm2 = vcmp.ge.f32.partialorder %v2163_v9, 0.0  ;;  %v2195_v48 = vmul.f32 0.2, %v2163_v9  ;;  %v1804_v60 = vadd.f32 %v1768_v42, %v1634_v10  ;;  %v1938_v34 = vpop.f32.mrf.mxu3 }
 0x2af   : > { %v1601_v16 = vpop.f32.mrf.mxu1 }
 0x2b0   : > { %v2211_v61 = vsel %vm2179_vm2, %v2163_v9, %v2195_v48  ;;  %v1974_v63 = vadd.f32 %v1938_v34, %v1804_v60  ;;  %v1635_v3 = vadd.f32 %v1601_v16, %v6317_v41 }
 0x2b1   : > { %2227 = vst [vmem:[%s6402_s24 + $0x10] sm:$0xff] %v2211_v61  ;;  %v2260_v1 = vld [vmem:[#allocation2 + $0x5] ss:$2 sm:$0xff]  ;;  %v2296_v48 = vld [vmem:[#allocation2 + $0x6] ss:$2 sm:$0xff] }
 0x2b2   : > { %2245 = vst [vmem:[#allocation2 + $0x18] sm:$0xff] %v2211_v61  ;;  %v2144_v14 = vadd.f32 %v2108_v47, %v1974_v63  ;;  %v2487_v53 = vld [vmem:[#allocation2 + $0x7] ss:$2 sm:$0xff]  ;;  %v1466_v47 = vadd.f32 %v6327_v59, %v1280_v15  ;;  %v1285_v15 = vadd.f32 %v6333_v27, %v6331_v26 }
 0x2b3   : > { %3747 = vst [vmem:[#allocation2 + $0x7] sm:$0x1] %v5953_v38 }
 0x2b4   : > { %v2164_v25 = vadd.f32 %v6390_v20, %v2144_v14 }
 0x2b5   : > { %v1771_v12 = vpop.f32.mrf.mxu2 }
 0x2b6   : > { %vm2180_vm3 = vcmp.ge.f32.partialorder %v2164_v25, 0.0  ;;  %v2196_v17 = vmul.f32 0.2, %v2164_v25  ;;  %v1805_v21 = vadd.f32 %v1771_v12, %v1635_v3  ;;  %v1941_v22 = vpop.f32.mrf.mxu3  ;;  %v2118_v3 = vpop.f32.mrf.mxu0 }
 0x2b7   : > { %v1603_v23 = vpop.f32.mrf.mxu1 }
 0x2b8   : > { %v2212_v33 = vsel %vm2180_vm3, %v2164_v25, %v2196_v17  ;;  %v1975_v46 = vadd.f32 %v1941_v22, %v1805_v21  ;;  %v1636_v39 = vadd.f32 %v1603_v23, %v1466_v47 }
 0x2b9   : > { %2228 = vst [vmem:[%s6402_s24 + $0x18] sm:$0xff] %v2212_v33  ;;  %v2975_v23 = vld [vmem:[#allocation2 + $0xb] ss:$2 sm:$0xff] }
 0x2ba   : > { %2246 = vst [vmem:[#allocation2 + $0x20] sm:$0xff] %v2212_v33  ;;  %v2145_v30 = vadd.f32 %v2111_v29, %v1975_v46 }
 0x2bc   : > { %v2165_v41 = vadd.f32 %v6390_v20, %v2145_v30 }
 0x2bd   : > { %v1773_v51 = vpop.f32.mrf.mxu2 }
 0x2be   : > { %vm2181_vm4 = vcmp.ge.f32.partialorder %v2165_v41, 0.0  ;;  %v2197_v54 = vmul.f32 0.2, %v2165_v41  ;;  %v1806_v55 = vadd.f32 %v1773_v51, %v1636_v39  ;;  %v1943_v40 = vpop.f32.mrf.mxu3 }
 0x2bf   : > { %v1606_v9 = vpop.f32.mrf.mxu1 }
 0x2c0   : > { %v2213_v10 = vsel %vm2181_vm4, %v2165_v41, %v2197_v54  ;;  %v1976_v42 = vadd.f32 %v1943_v40, %v1806_v55  ;;  %v1637_v25 = vadd.f32 %v1606_v9, %v6329_v11  ;;  %v1468_v11 = vadd.f32 %v6335_v32, %v1285_v15  ;;  %v2121_v54 = vpop.f32.mrf.mxu0 }
 0x2c1   : > { %2229 = vst [vmem:[%s6402_s24 + $0x20] sm:$0xff] %v2213_v10  ;;  %v2298_v60 = vld [vmem:[#allocation2 + $0x16] ss:$2 sm:$0xff]  ;;  %v2262_v34 = vld [vmem:[#allocation2 + $0x15] ss:$2 sm:$0xff] }
 0x2c2   : > { %2247 = vst [vmem:[#allocation2 + $0x28] sm:$0xff] %v2213_v10  ;;  %v2146_v59 = vadd.f32 %v2113_v24, %v1976_v42  ;;  %v2311_v16 = vpack.c.bf16 %v2298_v60, %v2296_v48  ;;  %v2275_v29 = vpack.c.bf16 %v2262_v34, %v2260_v1  ;;  %v2489_v61 = vld [vmem:[#allocation2 + $0x17] ss:$2 sm:$0xff]  ;;  %v1290_v48 = vadd.f32 %v6344_v57, %v6342_v19 }
 0x2c3   : > { %v2502_v63 = vpack.c.bf16 %v2489_v61, %v2487_v53 }
 0x2c4   : > { %v2166_v14 = vadd.f32 %v6390_v20, %v2146_v59  ;;  %2388 = vmatmul.bf16.vlgmr.msra.gmra.mxu1 %v2311_v16  ;;  %2465 = vmatmul.bf16.vlgmr.msra.gmra.mxu2 %v2275_v29 }
 0x2c5   : > { %2579 = vmatmul.bf16.vlgmr.msra.gmra.mxu3 %v2502_v63  ;;  %v1776_v12 = vpop.f32.mrf.mxu2 }
 0x2c6   : > { %vm2182_vm5 = vcmp.ge.f32.partialorder %v2166_v14, 0.0  ;;  %v2198_v17 = vmul.f32 0.2, %v2166_v14  ;;  %v1807_v24 = vadd.f32 %v1776_v12, %v1637_v25  ;;  %v1946_v21 = vpop.f32.mrf.mxu3 }
 0x2c7   : > { %v1608_v1 = vpop.f32.mrf.mxu1 }
 0x2c8   : > { %v2214_v22 = vsel %vm2182_vm5, %v2166_v14, %v2198_v17  ;;  %v1977_v53 = vadd.f32 %v1946_v21, %v1807_v24  ;;  %v1638_v41 = vadd.f32 %v1608_v1, %v1468_v11  ;;  %v2123_v63 = vpop.f32.mrf.mxu0  ;;  %v1470_v14 = vadd.f32 %v6346_v62, %v1290_v48 }
 0x2c9   : > { %2230 = vst [vmem:[%s6402_s24 + $0x28] sm:$0xff] %v2214_v22  ;;  %v2977_v33 = vld [vmem:[#allocation2 + $0x1b] ss:$2 sm:$0xff] }
 0x2ca   : > { %2248 = vst [vmem:[#allocation2 + $0x30] sm:$0xff] %v2214_v22  ;;  %v2147_v46 = vadd.f32 %v2116_v36, %v1977_v53  ;;  %v2990_v47 = vpack.c.bf16 %v2977_v33, %v2975_v23 }
 0x2cc   : > { %v2167_v30 = vadd.f32 %v6390_v20, %v2147_v46  ;;  %3067 = vmatmul.bf16.vlgmr.msra.gmra.mxu0 %v2990_v47 }
 0x2cd   : > { %v1778_v26 = vpop.f32.mrf.mxu2 }
 0x2ce   : > { %vm2183_vm6 = vcmp.ge.f32.partialorder %v2167_v30, 0.0  ;;  %v2199_v27 = vmul.f32 0.2, %v2167_v30  ;;  %v1808_v39 = vadd.f32 %v1778_v26, %v1638_v41  ;;  %v1948_v51 = vpop.f32.mrf.mxu3  ;;  %v5324_v41 = vld [vmem:[#allocation10 + $0xf0] sm:$0xff] }
 0x2cf   : > { %v1611_v55 = vpop.f32.mrf.mxu1 }
 0x2d0   : > { %v2215_v40 = vsel %vm2183_vm6, %v2167_v30, %v2199_v27  ;;  %v1978_v9 = vadd.f32 %v1948_v51, %v1808_v39  ;;  %v1639_v10 = vadd.f32 %v1611_v55, %v6338_v45  ;;  %v2126_v26 = vpop.f32.mrf.mxu0  ;;  %v1295_v55 = vadd.f32 %v6352_v31, %v6350_v28 }
 0x2d1   : > { %2231 = vst [vmem:[%s6402_s24 + $0x30] sm:$0xff] %v2215_v40  ;;  %v2300_v22 = vld [vmem:[#allocation2 + $0x26] ss:$2 sm:$0xff]  ;;  %v2264_v53 = vld [vmem:[#allocation2 + $0x25] ss:$2 sm:$0xff] }
 0x2d2   : > { %2249 = vst [vmem:[#allocation2 + $0x38] sm:$0xff] %v2215_v40  ;;  %v2148_v32 = vadd.f32 %v2118_v3, %v1978_v9  ;;  %v5325_v3 = vld [vmem:[#allocation10 + $0xf8] sm:$0xff]  ;;  %v2491_v47 = vld [vmem:[#allocation2 + $0x27] ss:$2 sm:$0xff] }
 0x2d3   : > { %2693 = vmatpush.bf16.msrb.mxu1 %v5325_v3 }
 0x2d4   : > { %v2168_v36 = vadd.f32 %v6390_v20, %v2148_v32 }
 0x2d5   : > { %v1781_v42 = vpop.f32.mrf.mxu2 }
 0x2d6   : > { %vm2184_vm7 = vcmp.ge.f32.partialorder %v2168_v36, 0.0  ;;  %v2200_v60 = vmul.f32 0.2, %v2168_v36  ;;  %v1809_v34 = vadd.f32 %v1781_v42, %v1639_v10  ;;  %v1951_v59 = vpop.f32.mrf.mxu3 }
 0x2d7   : > { %v1613_v16 = vpop.f32.mrf.mxu1  ;;  %2694 = vmatpush.bf16.msrb.mxu1 %v5324_v41 }
 0x2d8   : > { %v2216_v29 = vsel %vm2184_vm7, %v2168_v36, %v2200_v60  ;;  %v1979_v61 = vadd.f32 %v1951_v59, %v1809_v34  ;;  %v1640_v12 = vadd.f32 %v1613_v16, %v1470_v14  ;;  %v5323_v16 = vld [vmem:[#allocation10 + $0xe8] sm:$0xff]  ;;  %v2128_v31 = vpop.f32.mrf.mxu0 }
 0x2d9   : > { %2232 = vst [vmem:[%s6402_s24 + $0x38] sm:$0xff] %v2216_v29  ;;  %v2979_v48 = vld [vmem:[#allocation2 + $0x2b] ss:$2 sm:$0xff] }
 0x2da   : > { %2250 = vst [vmem:[#allocation2 + $0x40] sm:$0xff] %v2216_v29  ;;  %v2149_v25 = vadd.f32 %v2121_v54, %v1979_v61 }
 0x2db   : > { %2695 = vmatpush.bf16.msrb.mxu1 %v5323_v16 }
 0x2dc   : > { %v2169_v45 = vadd.f32 %v6390_v20, %v2149_v25 }
 0x2dd   : > { %v1783_v19 = vpop.f32.mrf.mxu2 }
 0x2de   : > { %vm2185_vm8 = vcmp.ge.f32.partialorder %v2169_v45, 0.0  ;;  %v2201_v57 = vmul.f32 0.2, %v2169_v45  ;;  %v1810_v15 = vadd.f32 %v1783_v19, %v1640_v12  ;;  %v1953_v17 = vpop.f32.mrf.mxu3  ;;  %v5333_v19 = vld [vmem:[#allocation10 + $0x138] sm:$0xff] }
 0x2df   : > { %v1616_v24 = vpop.f32.mrf.mxu1  ;;  %2815 = vmatpush.bf16.msrb.mxu2 %v5333_v19  ;;  %v5319_v19 = vld [vmem:[#allocation10 + $0xc8] sm:$0xff] }
 0x2e0   : > { %v2217_v21 = vsel %vm2185_vm8, %v2169_v45, %v2201_v57  ;;  %v1980_v1 = vadd.f32 %v1953_v17, %v1810_v15  ;;  %v1641_v51 = vadd.f32 %v1616_v24, %v6348_v7  ;;  %v1472_v7 = vadd.f32 %v6354_v37, %v1295_v55  ;;  %v5322_v57 = vld [vmem:[#allocation10 + $0xe0] sm:$0xff]  ;;  %v5341_v24 = vld [vmem:[#allocation10 + $0x178] sm:$0xff]  ;;  %v5320_v55 = vld [vmem:[#allocation10 + $0xd0] sm:$0xff] }
 0x2e1   : > { %2233 = vst [vmem:[%s6402_s24 + $0x40] sm:$0xff] %v2217_v21  ;;  %v2302_v62 = vld [vmem:[#allocation2 + $0x36] ss:$2 sm:$0xff]  ;;  %v2266_v23 = vld [vmem:[#allocation2 + $0x35] ss:$2 sm:$0xff]  ;;  %2696 = vmatpush.bf16.msrb.mxu1 %v5322_v57  ;;  %2937 = vmatpush.bf16.msrb.mxu3 %v5341_v24  ;;  %v1305_v57 = vadd.f32 %v6372_v56, %v6364_v43  ;;  %v5327_v43 = vld [vmem:[#allocation10 + $0x108] sm:$0xff] }
 0x2e2   : > { %2251 = vst [vmem:[#allocation2 + $0x48] sm:$0xff] %v2217_v21  ;;  %v2150_v33 = vadd.f32 %v2123_v63, %v1980_v1  ;;  %v2312_v11 = vpack.c.bf16 %v2302_v62, %v2300_v22  ;;  %v2276_v46 = vpack.c.bf16 %v2266_v23, %v2264_v53  ;;  %v2493_v30 = vld [vmem:[#allocation2 + $0x37] ss:$2 sm:$0xff]  ;;  %v2131_v53 = vpop.f32.mrf.mxu0  ;;  %v1300_v23 = vadd.f32 %v6360_v6, %v6358_v5  ;;  %v5335_v56 = vld [vmem:[#allocation10 + $0x148] sm:$0xff] }
 0x2e3   : > { %v2503_v27 = vpack.c.bf16 %v2493_v30, %v2491_v47 }
 0x2e4   : > { %v2170_v39 = vadd.f32 %v6390_v20, %v2150_v33  ;;  %2393 = vmatmul.bf16.gmra.mxu1 %v2312_v11  ;;  %2470 = vmatmul.bf16.gmra.mxu2 %v2276_v46 }
 0x2e5   : > { %2584 = vmatmul.bf16.gmra.mxu3 %v2503_v27  ;;  %v1786_v54 = vpop.f32.mrf.mxu2  ;;  %v1474_v27 = vadd.f32 %v6362_v13, %v1300_v23  ;;  %v5330_v13 = vld [vmem:[#allocation10 + $0x120] sm:$0xff] }
 0x2e6   : > { %vm2186_vm9 = vcmp.ge.f32.partialorder %v2170_v39, 0.0  ;;  %v2202_v40 = vmul.f32 0.2, %v2170_v39  ;;  %v1811_v9 = vadd.f32 %v1786_v54, %v1641_v51  ;;  %v1956_v32 = vpop.f32.mrf.mxu3  ;;  %v5331_v51 = vld [vmem:[#allocation10 + $0x128] sm:$0xff] }
 0x2e7   : > { %v1618_v36 = vpop.f32.mrf.mxu1  ;;  %v5339_v54 = vld [vmem:[#allocation10 + $0x168] sm:$0xff] }
 0x2e8   : > { %v2218_v10 = vsel %vm2186_vm9, %v2170_v39, %v2202_v40  ;;  %v1981_v42 = vadd.f32 %v1956_v32, %v1811_v9  ;;  %v1642_v28 = vadd.f32 %v1618_v36, %v1472_v7  ;;  %v5321_v39 = vld [vmem:[#allocation10 + $0xd8] sm:$0xff] }
 0x2e9   : > { %2234 = vst [vmem:[%s6402_s24 + $0x48] sm:$0xff] %v2218_v10  ;;  %v2981_v60 = vld [vmem:[#allocation2 + $0x3b] ss:$2 sm:$0xff]  ;;  %v6457_v15 = vld [vmem:[#allocation2 + $0x3a] ss:$2 sm:$0xff]  ;;  %2697 = vmatpush.bf16.msrb.mxu1 %v5321_v39 }
 0x2ea   : > { %2252 = vst [vmem:[#allocation2 + $0x50] sm:$0xff] %v2218_v10  ;;  %v2151_v34 = vadd.f32 %v2126_v26, %v1981_v42  ;;  %v2991_v59 = vpack.c.bf16 %v2981_v60, %v2979_v48  ;;  %v5332_v26 = vld [vmem:[#allocation10 + $0x130] sm:$0xff]  ;;  %v5338_v10 = vld [vmem:[#allocation10 + $0x160] sm:$0xff]  ;;  %v2133_v42 = vpop.f32.mrf.mxu0 }
 0x2eb   : > { %2816 = vmatpush.bf16.msrb.mxu2 %v5332_v26 }
 0x2ec   : > { %v2171_v29 = vadd.f32 %v6390_v20, %v2151_v34  ;;  %3072 = vmatmul.bf16.gmra.mxu0 %v2991_v59 }
 0x2ed   : > { %v1788_v61 = vpop.f32.mrf.mxu2  ;;  %2698 = vmatpush.bf16.msrb.mxu1 %v5320_v55 }
 0x2ee   : > { %vm2187_vm10 = vcmp.ge.f32.partialorder %v2171_v29, 0.0  ;;  %v2203_v63 = vmul.f32 0.2, %v2171_v29  ;;  %v1812_v14 = vadd.f32 %v1788_v61, %v1642_v28  ;;  %v1958_v25 = vpop.f32.mrf.mxu3 }
 0x2ef   : > { %v1621_v3 = vpop.f32.mrf.mxu1  ;;  %2817 = vmatpush.bf16.msrb.mxu2 %v5331_v51 }
 0x2f0   : > { %v2219_v45 = vsel %vm2187_vm10, %v2171_v29, %v2203_v63  ;;  %v1982_v12 = vadd.f32 %v1958_v25, %v1812_v14  ;;  %v1643_v22 = vadd.f32 %v1621_v3, %v6356_v52  ;;  %v5340_v52 = vld [vmem:[#allocation10 + $0x170] sm:$0xff] }
 0x2f1   : > { %2235 = vst [vmem:[%s6402_s24 + $0x50] sm:$0xff] %v2219_v45  ;;  %v6459_v17 = vld [vmem:[#allocation2 + $0x46] ss:$2 sm:$0xff]  ;;  %2938 = vmatpush.bf16.msrb.mxu3 %v5340_v52  ;;  %v2268_v34 = vld [vmem:[#allocation2 + $0x45] ss:$2 sm:$0xff]  ;;  %2699 = vmatpush.bf16.msrb.mxu1 %v5319_v19 }
 0x2f2   : > { %2253 = vst [vmem:[#allocation2 + $0x58] sm:$0xff] %v2219_v45  ;;  %v2152_v37 = vadd.f32 %v2128_v31, %v1982_v12  ;;  %v6461_v21 = vld [vmem:[#allocation2 + $0x48] ss:$2 sm:$0xff]  ;;  %v2495_v61 = vld [vmem:[#allocation2 + $0x47] ss:$2 sm:$0xff]  ;;  %v5329_v45 = vld [vmem:[#allocation10 + $0x118] sm:$0xff] }
 0x2f3   : > { %3748 = vst [vmem:[#allocation2 + $0x48] sm:$0x1] %v5953_v38  ;;  %2818 = vmatpush.bf16.msrb.mxu2 %v5330_v13  ;;  %v5337_v12 = vld [vmem:[#allocation10 + $0x158] sm:$0xff] }
 0x2f4   : > { %v2172_v1 = vadd.f32 %v6390_v20, %v2152_v37 }
 0x2f5   : > { %v1791_v62 = vpop.f32.mrf.mxu2  ;;  %2939 = vmatpush.bf16.msrb.mxu3 %v5339_v54 }
 0x2f6   : > { %vm2188_vm11 = vcmp.ge.f32.partialorder %v2172_v1, 0.0  ;;  %v2204_v33 = vmul.f32 0.2, %v2172_v1  ;;  %v1813_v11 = vadd.f32 %v1791_v62, %v1643_v22  ;;  %v1961_v46 = vpop.f32.mrf.mxu3  ;;  %v5328_v22 = vld [vmem:[#allocation10 + $0x110] sm:$0xff]  ;;  %v5318_v62 = vld [vmem:[#allocation10 + $0xc0] sm:$0xff] }
 0x2f7   : > { %v1623_v47 = vpop.f32.mrf.mxu1  ;;  %2819 = vmatpush.bf16.msrb.mxu2 %v5329_v45  ;;  %2700 = vmatpush.bf16.msrb.mxu1 %v5318_v62 }
 0x2f8   : > { %v2220_v30 = vsel %vm2188_vm11, %v2172_v1, %v2204_v33  ;;  %v1983_v41 = vadd.f32 %v1961_v46, %v1813_v11  ;;  %v1644_v6 = vadd.f32 %v1623_v47, %v1474_v27  ;;  %v1476_v46 = vadd.f32 %v6374_v58, %v1305_v57  ;;  %v5326_v58 = vld [vmem:[#allocation10 + $0x100] sm:$0xff] }
 0x2f9   : > { %2236 = vst [vmem:[%s6402_s24 + $0x58] sm:$0xff] %v2220_v30  ;;  %2940 = vmatpush.bf16.msrb.mxu3 %v5338_v10  ;;  %v2861_v57 = vld [vmem:[#allocation2 + $0x4a] ss:$2 sm:$0xff] }
 0x2fa   : > { %2254 = vst [vmem:[#allocation2 + $0x60] sm:$0xff] %v2220_v30  ;;  %v2153_v38 = vadd.f32 %v2131_v53, %v1983_v41  ;;  %v5336_v53 = vld [vmem:[#allocation10 + $0x150] sm:$0xff] }
 0x2fb   : > { %2820 = vmatpush.bf16.msrb.mxu2 %v5328_v22  ;;  %5419 = vmatpush.bf16.msra.mxu1 %v6370_v50 }
 0x2fc   : > { %v2173_v5 = vadd.f32 %v6390_v20, %v2153_v38  ;;  %v5334_v38 = vld [vmem:[#allocation10 + $0x140] sm:$0xff] }
 0x2fd   : > { %v1793_v40 = vpop.f32.mrf.mxu2  ;;  %2941 = vmatpush.bf16.msrb.mxu3 %v5337_v12  ;;  %v2739_v12 = vld [vmem:[#allocation2 + $0x49] ss:$2 sm:$0xff] }
 0x2fe   : > { %vm2189_vm12 = vcmp.ge.f32.partialorder %v2173_v5, 0.0  ;;  %v2205_v9 = vmul.f32 0.2, %v2173_v5  ;;  %v1814_v32 = vadd.f32 %v1793_v40, %v1644_v6  ;;  %v1963_v36 = vpop.f32.mrf.mxu3 }
 0x2ff   : > { %v1626_v48 = vpop.f32.mrf.mxu1  ;;  %2821 = vmatpush.bf16.msrb.mxu2 %v5327_v43  ;;  %5420 = vmatpush.bf16.msra.mxu1 %v6377_v0 }
 0x300   : > { %v2221_v60 = vsel %vm2189_vm12, %v2173_v5, %v2205_v9  ;;  %v1984_v7 = vadd.f32 %v1963_v36, %v1814_v32  ;;  %v1645_v3 = vadd.f32 %v1626_v48, %v6366_v44  ;;  %v2136_v44 = vpop.f32.mrf.mxu0  ;;  %v2855_v48 = vld [vmem:[#allocation2 + $0x1a] ss:$2 sm:$0xff] }
 0x301   : > { %2237 = vst [vmem:[%s6402_s24 + $0x60] sm:$0xff] %v2221_v60  ;;  %v2306_v59 = vld [vmem:[#allocation2 + $0x56] ss:$2 sm:$0xff]  ;;  %v2270_v16 = vld [vmem:[#allocation2 + $0x55] ss:$2 sm:$0xff]  ;;  %2942 = vmatpush.bf16.msrb.mxu3 %v5336_v53 }
 0x302   : > { %2255 = vst [vmem:[#allocation2 + $0x68] sm:$0xff] %v2221_v60  ;;  %v2154_v29 = vadd.f32 %v2133_v42, %v1984_v7  ;;  %v2313_v28 = vpack.c.bf16 %v2306_v59, %v6459_v17  ;;  %v2277_v31 = vpack.c.bf16 %v2270_v16, %v2268_v34  ;;  %v2497_v63 = vld [vmem:[#allocation2 + $0x57] ss:$2 sm:$0xff]  ;;  %v2609_v60 = vld [vmem:[#allocation2 + $0x8] ss:$2 sm:$0xff] }
 0x303   : > { %v2504_v14 = vpack.c.bf16 %v2497_v63, %v2495_v61  ;;  %2822 = vmatpush.bf16.msrb.mxu2 %v5326_v58  ;;  %5421 = vmatpush.bf16.msra.mxu1 %v6383_v8  ;;  %v2731_v7 = vld [vmem:[#allocation2 + $0x9] ss:$2 sm:$0xff]  ;;  %v2853_v59 = vld [vmem:[#allocation2 + $0xa] ss:$2 sm:$0xff] }
 0x304   : > { %v2174_v25 = vadd.f32 %v6390_v20, %v2154_v29  ;;  %2398 = vmatmul.bf16.gmra.mxu1 %v2313_v28  ;;  %2475 = vmatmul.bf16.gmra.mxu2 %v2277_v31  ;;  %v2868_v16 = vpack.c.bf16 %v2855_v48, %v2853_v59  ;;  %v2615_v29 = vld [vmem:[#allocation2 + $0x38] ss:$2 sm:$0xff]  ;;  %v2737_v28 = vld [vmem:[#allocation2 + $0x39] ss:$2 sm:$0xff]  ;;  %v2613_v31 = vld [vmem:[#allocation2 + $0x28] ss:$2 sm:$0xff] }
 0x305   : > { %2589 = vmatmul.bf16.gmra.mxu3 %v2504_v14  ;;  %v1796_v37 = vpop.f32.mrf.mxu2  ;;  %v2735_v61 = vld [vmem:[#allocation2 + $0x29] ss:$2 sm:$0xff]  ;;  %v2625_v63 = vpack.c.bf16 %v2615_v29, %v2613_v31  ;;  %v2857_v14 = vld [vmem:[#allocation2 + $0x2a] ss:$2 sm:$0xff]  ;;  %v5362_v29 = vld [vmem:[#allocation12 + $0x60] sm:$0xff] }
 0x306   : > { %vm2190_vm13 = vcmp.ge.f32.partialorder %v2174_v25, 0.0  ;;  %v2206_v17 = vmul.f32 0.2, %v2174_v25  ;;  %v1815_v24 = vadd.f32 %v1796_v37, %v1645_v3  ;;  %v1966_v1 = vpop.f32.mrf.mxu3  ;;  %2943 = vmatpush.bf16.msrb.mxu3 %v5335_v56  ;;  %v2741_v3 = vld [vmem:[#allocation2 + $0x59] ss:$2 sm:$0xff]  ;;  %v5363_v48 = vld [vmem:[#allocation12 + $0x68] sm:$0xff] }
 0x307   : > { %v1628_v11 = vpop.f32.mrf.mxu1  ;;  %5422 = vmatpush.bf16.msra.mxu1 %v6393_v35  ;;  %v2611_v35 = vld [vmem:[#allocation2 + $0x18] ss:$2 sm:$0xff]  ;;  %v2748_v19 = vpack.c.bf16 %v2741_v3, %v2739_v12  ;;  %v5380_v31 = vld [vmem:[#allocation12 + $0xf0] sm:$0xff] }
 0x308   : > { %v2222_v23 = vsel %vm2190_vm13, %v2174_v25, %v2206_v17  ;;  %v1985_v33 = vadd.f32 %v1966_v1, %v1815_v24  ;;  %v1646_v41 = vadd.f32 %v1628_v11, %v1476_v46  ;;  %v2138_v5 = vpop.f32.mrf.mxu0  ;;  %v2624_v34 = vpack.c.bf16 %v2611_v35, %v2609_v60  ;;  %v2619_v25 = vld [vmem:[#allocation2 + $0x58] ss:$2 sm:$0xff]  ;;  %v5356_v35 = vld [vmem:[#allocation12 + $0x30] sm:$0xff]  ;;  %v5355_v60 = vld [vmem:[#allocation12 + $0x28] sm:$0xff] }
 0x309   : > { %2238 = vst [vmem:[%s6402_s24 + $0x68] sm:$0xff] %v2222_v23  ;;  %v2863_v45 = vld [vmem:[#allocation2 + $0x5a] ss:$2 sm:$0xff]  ;;  %v2626_v37 = vpack.c.bf16 %v2619_v25, %v6461_v21 }
 0x30a   : > { %2256 = vst [vmem:[#allocation2 + $0x70] sm:$0xff] %v2222_v23  ;;  %v2155_v47 = vadd.f32 %v2136_v44, %v1985_v33  ;;  %2944 = vmatpush.bf16.msrb.mxu3 %v5334_v38  ;;  %v2870_v17 = vpack.c.bf16 %v2863_v45, %v2861_v57  ;;  %v5367_v25 = vld [vmem:[#allocation12 + $0x88] sm:$0xff]  ;;  %v5352_v57 = vld [vmem:[#allocation12 + $0x10] sm:$0xff] }
 0x30b   : > { %5423 = vmatpush.bf16.msra.mxu1 %v6399_v49  ;;  %v2733_v49 = vld [vmem:[#allocation2 + $0x19] ss:$2 sm:$0xff] }
 0x30c   : > { %v2175_v30 = vadd.f32 %v6390_v20, %v2155_v47 }
 0x30d   : > { %v1798_v26 = vpop.f32.mrf.mxu2 }
 0x30e   : > { %vm2191_vm14 = vcmp.ge.f32.partialorder %v2175_v30, 0.0  ;;  %v2207_v52 = vmul.f32 0.2, %v2175_v30  ;;  %v1816_v27 = vadd.f32 %v1798_v26, %v1646_v41  ;;  %v1968_v39 = vpop.f32.mrf.mxu3  ;;  %v2983_v41 = vld [vmem:[#allocation2 + $0x4b] ss:$2 sm:$0xff] }
 0x30f   : > { %5424 = vmatpush.bf16.msra.mxu1 %v6405_v4  ;;  %v2746_v4 = vpack.c.bf16 %v2733_v49, %v2731_v7  ;;  %v5370_v49 = vld [vmem:[#allocation12 + $0xa0] sm:$0xff]  ;;  %v5381_v7 = vld [vmem:[#allocation12 + $0xf8] sm:$0xff] }
 0x310   : > { %v2223_v51 = vsel %vm2191_vm14, %v2175_v30, %v2207_v52  ;;  %v1986_v54 = vadd.f32 %v1968_v39, %v1816_v27  ;;  %v2985_v30 = vld [vmem:[#allocation2 + $0x5b] ss:$2 sm:$0xff]  ;;  %3552 = vmatpush.bf16.msrb.mxu0 %v5381_v7 }
 0x311   : > { %2239 = vst [vmem:[%s6402_s24 + $0x70] sm:$0xff] %v2223_v51  ;;  %v2308_v0 = vld [vmem:[#allocation2 + $0x66] ss:$2 sm:$0xff]  ;;  %v2272_v9 = vld [vmem:[#allocation2 + $0x65] ss:$2 sm:$0xff]  ;;  %v2992_v26 = vpack.c.bf16 %v2985_v30, %v2983_v41 }
 0x312   : > { %2257 = vst [vmem:[#allocation2 + $0x78] sm:$0xff] %v2223_v51  ;;  %v2156_v6 = vadd.f32 %v2138_v5, %v1986_v54  ;;  %v2499_v32 = vld [vmem:[#allocation2 + $0x67] ss:$2 sm:$0xff]  ;;  %v2621_v53 = vld [vmem:[#allocation2 + $0x68] ss:$2 sm:$0xff] }
 0x313   : > { %5425 = vmatpush.bf16.msra.mxu1 %v6411_v2  ;;  %v2747_v2 = vpack.c.bf16 %v2737_v28, %v2735_v61  ;;  %v5354_v28 = vld [vmem:[#allocation12 + $0x20] sm:$0xff]  ;;  %v5368_v61 = vld [vmem:[#allocation12 + $0x90] sm:$0xff] }
 0x314   : > { %v2176_v50 = vadd.f32 %v6390_v20, %v2156_v6  ;;  %3553 = vmatpush.bf16.msrb.mxu0 %v5380_v31  ;;  %v5350_v30 = vld [vmem:[#allocation12] sm:$0xff]  ;;  %v5376_v41 = vld [vmem:[#allocation12 + $0xd0] sm:$0xff] }
 0x316   : > { %vm2192_vm15 = vcmp.ge.f32.partialorder %v2176_v50, 0.0  ;;  %v2208_v55 = vmul.f32 0.2, %v2176_v50 }
 0x317   : > { %5426 = vmatpush.bf16.msra.mxu1 %v6416_v18  ;;  %v2869_v18 = vpack.c.bf16 %v6457_v15, %v2857_v14  ;;  %v2743_v15 = vld [vmem:[#allocation2 + $0x69] ss:$2 sm:$0xff] }
 0x318   : > { %v2224_v40 = vsel %vm2192_vm15, %v2176_v50, %v2208_v55  ;;  %v5379_v14 = vld [vmem:[#allocation12 + $0xe8] sm:$0xff] }
 0x319   : > { %2240 = vst [vmem:[%s6402_s24 + $0x78] sm:$0xff] %v2224_v40  ;;  %v2865_v23 = vld [vmem:[#allocation2 + $0x6a] ss:$2 sm:$0xff]  ;;  %v2987_v5 = vld [vmem:[#allocation2 + $0x6b] ss:$2 sm:$0xff]  ;;  %3554 = vmatpush.bf16.msrb.mxu0 %v5379_v14  ;;  %s5764_s24 = scalar_lea.hbm %s6828_s12, 256 }
 0x31a   : > { %2258 = vst [vmem:[#allocation2 + $0x80] sm:$0xff] %v2224_v40 }
 0x321   : > { %v2310_v36 = vld [vmem:[#allocation2 + $0x76] ss:$2 sm:$0xff]  ;;  %v2274_v13 = vld [vmem:[#allocation2 + $0x75] ss:$2 sm:$0xff] }
 0x322   : > { %v2501_v10 = vld [vmem:[#allocation2 + $0x77] ss:$2 sm:$0xff]  ;;  %v2314_v20 = vpack.c.bf16 %v2310_v36, %v2308_v0  ;;  %v2278_v42 = vpack.c.bf16 %v2274_v13, %v2272_v9  ;;  %v2623_v24 = vld [vmem:[#allocation2 + $0x78] ss:$2 sm:$0xff] }
 0x323   : > { %v2505_v8 = vpack.c.bf16 %v2501_v10, %v2499_v32  ;;  %v2745_v1 = vld [vmem:[#allocation2 + $0x79] ss:$2 sm:$0xff]  ;;  %v2867_v22 = vld [vmem:[#allocation2 + $0x7a] ss:$2 sm:$0xff]  ;;  %v2627_v44 = vpack.c.bf16 %v2623_v24, %v2621_v53  ;;  %v5372_v10 = vld [vmem:[#allocation12 + $0xb0] sm:$0xff] }
 0x324   : > { %2403 = vmatmul.bf16.gmra.mxu1 %v2314_v20  ;;  %2480 = vmatmul.bf16.gmra.mxu2 %v2278_v42  ;;  %v2749_v62 = vpack.c.bf16 %v2745_v1, %v2743_v15  ;;  %v2871_v46 = vpack.c.bf16 %v2867_v22, %v2865_v23  ;;  %v2989_v51 = vld [vmem:[#allocation2 + $0x7b] ss:$2 sm:$0xff] }
 0x325   : > { %2594 = vmatmul.bf16.gmra.mxu3 %v2505_v8  ;;  %v2993_v6 = vpack.c.bf16 %v2989_v51, %v2987_v5  ;;  %v5373_v32 = vld [vmem:[#allocation12 + $0xb8] sm:$0xff]  ;;  %v5371_v20 = vld [vmem:[#allocation12 + $0xa8] sm:$0xff]  ;;  %v5364_v8 = vld [vmem:[#allocation12 + $0x70] sm:$0xff] }
 0x326   : > { %3438 = vmatpush.bf16.msra.mxu3 %v5373_v32  ;;  %v5365_v36 = vld [vmem:[#allocation12 + $0x78] sm:$0xff]  ;;  %v5366_v24 = vld [vmem:[#allocation12 + $0x80] sm:$0xff]  ;;  %v5359_v1 = vld [vmem:[#allocation12 + $0x48] sm:$0xff] }
 0x327   : > { %v5357_v13 = vld [vmem:[#allocation12 + $0x38] sm:$0xff]  ;;  %v5351_v22 = vld [vmem:[#allocation12 + $0x8] sm:$0xff]  ;;  %v5374_v32 = vld [vmem:[#allocation12 + $0xc0] sm:$0xff] }
 0x328   : > { %3332 = vmatpush.bf16.msra.mxu2 %v5357_v13  ;;  %v5377_v53 = vld [vmem:[#allocation12 + $0xd8] sm:$0xff]  ;;  %v5375_v5 = vld [vmem:[#allocation12 + $0xc8] sm:$0xff] }
 0x32a   : > { %3439 = vmatpush.bf16.msra.mxu3 %v5372_v10 }
 0x32c   : > { %3333 = vmatpush.bf16.msra.mxu2 %v5356_v35 }
 0x32e   : > { %3440 = vmatpush.bf16.msra.mxu3 %v5371_v20 }
 0x330   : > { %3334 = vmatpush.bf16.msra.mxu2 %v5355_v60 }
 0x332   : > { %3441 = vmatpush.bf16.msra.mxu3 %v5370_v49 }
 0x334   : > { %2701 = vmatmul.bf16.vlgmr.msrb.gmra.mxu1 %v2624_v34  ;;  %2823 = vmatmul.bf16.vlgmr.msrb.gmra.mxu2 %v2746_v4  ;;  %v5369_v4 = vld [vmem:[#allocation12 + $0x98] sm:$0xff] }
 0x335   : > { %2945 = vmatmul.bf16.vlgmr.msrb.gmra.mxu3 %v2868_v16  ;;  %3255 = vmatpush.bf16.msrb.mxu1 %v5365_v36 }
 0x336   : > { %3442 = vmatpush.bf16.msra.mxu3 %v5369_v4  ;;  %3335 = vmatpush.bf16.msra.mxu2 %v5354_v28 }
 0x339   : > { %3256 = vmatpush.bf16.msrb.mxu1 %v5364_v8 }
 0x33a   : > { %3443 = vmatpush.bf16.msra.mxu3 %v5368_v61 }
 0x33d   : > { %3257 = vmatpush.bf16.msrb.mxu1 %v5363_v48 }
 0x33e   : > { %3444 = vmatpush.bf16.msra.mxu3 %v5367_v25 }
 0x341   : > { %v6493_v33 = vpop.f32.mrf.mxu1  ;;  %3258 = vmatpush.bf16.msrb.mxu1 %v5362_v29 }
 0x342   : > { %3445 = vmatpush.bf16.msra.mxu3 %v5366_v24 }
 0x344   : > { %2706 = vmatmul.bf16.gmra.mxu1 %v2625_v63  ;;  %2828 = vmatmul.bf16.gmra.mxu2 %v2747_v2  ;;  %v5361_v63 = vld [vmem:[#allocation12 + $0x58] sm:$0xff] }
 0x345   : > { %2950 = vmatmul.bf16.gmra.mxu3 %v2869_v18  ;;  %v5353_v2 = vld [vmem:[#allocation12 + $0x18] sm:$0xff]  ;;  %3259 = vmatpush.bf16.msrb.mxu1 %v5361_v63 }
 0x346   : > { %3336 = vmatpush.bf16.msra.mxu2 %v5353_v2 }
 0x347   : > { %v6495_v11 = vpop.f32.mrf.mxu2 }
 0x348   : > { %v6497_v21 = vpop.f32.mrf.mxu3 }
 0x349   : > { %v6499_v47 = vpop.f32.mrf.mxu1 }
 0x34a   : > { %3337 = vmatpush.bf16.msra.mxu2 %v5352_v57 }
 0x34e   : > { %3338 = vmatpush.bf16.msra.mxu2 %v5351_v22 }
 0x34f   : > { %v6501_v43 = vpop.f32.mrf.mxu2 }
 0x350   : > { %v6503_v56 = vpop.f32.mrf.mxu3 }
 0x352   : > { %3339 = vmatpush.bf16.msra.mxu2 %v5350_v30 }
 0x354   : > { %2711 = vmatmul.bf16.gmra.mxu1 %v2626_v37  ;;  %2833 = vmatmul.bf16.gmra.mxu2 %v2748_v19  ;;  %v5360_v19 = vld [vmem:[#allocation12 + $0x50] sm:$0xff] }
 0x355   : > { %2955 = vmatmul.bf16.gmra.mxu3 %v2870_v17  ;;  %v5378_v17 = vld [vmem:[#allocation12 + $0xe0] sm:$0xff]  ;;  %3260 = vmatpush.bf16.msrb.mxu1 %v5360_v19 }
 0x356   : > { %3555 = vmatpush.bf16.msrb.mxu0 %v5378_v17 }
 0x359   : > { %3261 = vmatpush.bf16.msrb.mxu1 %v5359_v1 }
 0x35a   : > { %3556 = vmatpush.bf16.msrb.mxu0 %v5377_v53 }
 0x35e   : > { %3557 = vmatpush.bf16.msrb.mxu0 %v5376_v41 }
 0x361   : > { %v6505_v52 = vpop.f32.mrf.mxu1 }
 0x362   : > { %3558 = vmatpush.bf16.msrb.mxu0 %v5375_v5 }
 0x364   : > { %2716 = vmatmul.bf16.gmra.mxu1 %v2627_v44  ;;  %2838 = vmatmul.bf16.gmra.mxu2 %v2749_v62  ;;  %v2467_v44 = vadd.f32 %v6495_v11, %v6493_v33  ;;  %v2469_v33 = vadd.f32 %v6501_v43, %v6499_v47 }
 0x365   : > { %2960 = vmatmul.bf16.gmra.mxu3 %v2871_v46  ;;  %v5358_v46 = vld [vmem:[#allocation12 + $0x40] sm:$0xff] }
 0x366   : > { %3262 = vmatpush.bf16.msrb.mxu1 %v5358_v46  ;;  %v2601_v36 = vadd.f32 %v6503_v56, %v2469_v33  ;;  %3559 = vmatpush.bf16.msrb.mxu0 %v5374_v32 }
 0x367   : > { %v6507_v27 = vpop.f32.mrf.mxu2 }
 0x368   : > { %v6509_v58 = vpop.f32.mrf.mxu3  ;;  %v2472_v20 = vadd.f32 %v6507_v27, %v6505_v52 }
 0x369   : > { %v6511_v38 = vpop.f32.mrf.mxu1 }
 0x36a   : > { %v2602_v4 = vadd.f32 %v6509_v58, %v2472_v20 }
 0x36f   : > { %v6513_v39 = vpop.f32.mrf.mxu2 }
 0x370   : > { %v6515_v54 = vpop.f32.mrf.mxu3  ;;  %v2474_v28 = vadd.f32 %v6513_v39, %v6511_v38 }
 0x374   : > { %3077 = vmatmul.bf16.vlgmr.msra.gmra.mxu1 %v2992_v26  ;;  %v2600_v26 = vadd.f32 %v6497_v21, %v2467_v44  ;;  %v6541_v21 = vld [vmem:[%s6826_s6] ss:$0 sm:$0xff]  ;;  %s5760_s6 = scalar_lea.hbm %s5759_s4, 128 }
 0x375   : > { %p5761_p1 = scmp.ne.s32.totalorder %s5759_s4, %s5760_s6  ;;  %p5766_p7 = scmp.lt.s32.totalorder %s5764_s24, %s5760_s6 }
 0x377   : > { %p5762_p3 = pnand %p5761_p1, %p6126_p0  ;;  %p5767_p8 = por %p5766_p7, %p5765_p13 }
 0x379   : > { %p5763_p5 = pneg %p5762_p3 }
 0x37b   : > { %p5768_p9 = pnand %p5767_p8, %p5763_p5 }
 0x381   : > { %v2399_v50 = vpop.f32.mrf.mxu1 }
 0x384   : > { %3082 = vmatmul.bf16.gmra.mxu1 %v2993_v6  ;;  %v3068_v6 = vpop.f32.mrf.mxu0 }
 0x387   : > { %v2476_v55 = vpop.f32.mrf.mxu2 }
 0x388   : > { %v2477_v40 = vadd.f32 %v2476_v55, %v2399_v50  ;;  %v2590_v0 = vpop.f32.mrf.mxu3 }
 0x389   : > { %v6519_v42 = vpop.f32.mrf.mxu1 }
 0x38a   : > { %v6517_v9 = vadd.f32 %v2590_v0, %v2477_v40 }
 0x38c   : > { %v3070_v48 = vpop.f32.mrf.mxu0 }
 0x38f   : > { %v6521_v34 = vpop.f32.mrf.mxu2 }
 0x390   : > { %v6523_v59 = vpop.f32.mrf.mxu3 }
 0x394   : > { %v3073_v2 = vpop.f32.mrf.mxu0 }
 0x39c   : > { %v3075_v46 = vpop.f32.mrf.mxu0 }
 0x3a1   : > { %v2404_v16 = vpop.f32.mrf.mxu1 }
 0x3a7   : > { %v2481_v18 = vpop.f32.mrf.mxu2 }
 0x3a8   : > { %v2482_v3 = vadd.f32 %v2481_v18, %v2404_v16  ;;  %v2595_v45 = vpop.f32.mrf.mxu3 }
 0x3a9   : > { %v6525_v12 = vpop.f32.mrf.mxu1 }
 0x3aa   : > { %v6527_v37 = vadd.f32 %v2595_v45, %v2482_v3  ;;  %v5389_v3 = vld [vmem:[#allocation12 + $0x138] sm:$0xff]  ;;  %v2603_v45 = vadd.f32 %v6515_v54, %v2474_v28 }
 0x3ab   : > { %3666 = vmatpush.bf16.msra.mxu1 %v5389_v3 }
 0x3af   : > { %v6529_v15 = vpop.f32.mrf.mxu2 }
 0x3b0   : > { %v6533_v62 = vpop.f32.mrf.mxu3 }
 0x3b1   : > { %v2702_v23 = vpop.f32.mrf.mxu1 }
 0x3b2   : > { %v2722_v51 = vadd.f32 %v2702_v23, %v2600_v26 }
 0x3b7   : > { %v2824_v50 = vpop.f32.mrf.mxu2 }
 0x3b8   : > { %v2844_v11 = vadd.f32 %v2824_v50, %v2722_v51  ;;  %v2946_v55 = vpop.f32.mrf.mxu3 }
 0x3b9   : > { %v2704_v40 = vpop.f32.mrf.mxu1 }
 0x3ba   : > { %v2966_v0 = vadd.f32 %v2946_v55, %v2844_v11  ;;  %v2723_v43 = vadd.f32 %v2704_v40, %v2601_v36  ;;  %v5388_v55 = vld [vmem:[#allocation12 + $0x130] sm:$0xff] }
 0x3bb   : > { %3667 = vmatpush.bf16.msra.mxu1 %v5388_v55 }
 0x3bc   : > { %v3088_v13 = vadd.f32 %v3068_v6, %v2966_v0 }
 0x3be   : > { %v3100_v47 = vadd.f32 %v6541_v21, %v3088_v13 }
 0x3bf   : > { %v2826_v10 = vpop.f32.mrf.mxu2 }
 0x3c0   : > { %vm3108_vm0 = vcmp.ge.f32.partialorder %v3100_v47, 0.0  ;;  %v3116_v8 = vmul.f32 0.2, %v3100_v47  ;;  %v2845_v35 = vadd.f32 %v2826_v10, %v2723_v43  ;;  %v2948_v49 = vpop.f32.mrf.mxu3  ;;  %v5387_v43 = vld [vmem:[#allocation12 + $0x128] sm:$0xff] }
 0x3c1   : > { %v2707_v60 = vpop.f32.mrf.mxu1  ;;  %3668 = vmatpush.bf16.msra.mxu1 %v5387_v43 }
 0x3c2   : > { %v3124_v7 = vsel %vm3108_vm0, %v3100_v47, %v3116_v8  ;;  %v2967_v56 = vadd.f32 %v2948_v49, %v2845_v35  ;;  %v2724_v52 = vadd.f32 %v2707_v60, %v2602_v4  ;;  %v5386_v4 = vld [vmem:[#allocation12 + $0x120] sm:$0xff] }
 0x3c3   : > { %3132 = vst [vmem:[%s6551_s17] sm:$0xff] %v3124_v7 }
 0x3c4   : > { %3142 = vst [vmem:[#allocation3 + $0x8] sm:$0xff] %v3124_v7  ;;  %v3089_v16 = vadd.f32 %v3070_v48, %v2967_v56 }
 0x3c5   : > { %3669 = vmatpush.bf16.msra.mxu1 %v5386_v4 }
 0x3c6   : > { %v3101_v29 = vadd.f32 %v6541_v21, %v3089_v16  ;;  %v2479_v16 = vadd.f32 %v6521_v34, %v6519_v42 }
 0x3c7   : > { %v2829_v27 = vpop.f32.mrf.mxu2 }
 0x3c8   : > { %vm3109_vm1 = vcmp.ge.f32.partialorder %v3101_v29, 0.0  ;;  %v3117_v31 = vmul.f32 0.2, %v3101_v29  ;;  %v2846_v61 = vadd.f32 %v2829_v27, %v2724_v52  ;;  %v2951_v63 = vpop.f32.mrf.mxu3  ;;  %v2605_v27 = vadd.f32 %v6523_v59, %v2479_v16 }
 0x3c9   : > { %v2709_v14 = vpop.f32.mrf.mxu1 }
 0x3ca   : > { %v3125_v18 = vsel %vm3109_vm1, %v3101_v29, %v3117_v31  ;;  %v2968_v25 = vadd.f32 %v2951_v63, %v2846_v61  ;;  %v2725_v39 = vadd.f32 %v2709_v14, %v2603_v45 }
 0x3cb   : > { %3133 = vst [vmem:[%s6551_s17 + $0x8] sm:$0xff] %v3125_v18  ;;  %v3369_v58 = vpack.c.bf16 %v3125_v18, %v3124_v7  ;;  %v3178_v23 = vld [vmem:[#allocation3 + $0x7] sm:$0xff] }
 0x3cc   : > { %3143 = vst [vmem:[#allocation3 + $0x10] sm:$0xff] %v3125_v18  ;;  %v3090_v19 = vadd.f32 %v3073_v2, %v2968_v25  ;;  %v3150_v30 = vld [vmem:[#allocation3 + $0x6] sm:$0xff] }
 0x3cd   : > { %3446 = vmatmul.bf16.vlgmr.msra.gmra.mxu3 %v3369_v58  ;;  %v5385_v2 = vld [vmem:[#allocation12 + $0x118] sm:$0xff] }
 0x3ce   : > { %v3102_v38 = vadd.f32 %v6541_v21, %v3090_v19  ;;  %3670 = vmatpush.bf16.msra.mxu1 %v5385_v2 }
 0x3cf   : > { %v2831_v57 = vpop.f32.mrf.mxu2 }
 0x3d0   : > { %vm3110_vm2 = vcmp.ge.f32.partialorder %v3102_v38, 0.0  ;;  %v3118_v17 = vmul.f32 0.2, %v3102_v38  ;;  %v2847_v24 = vadd.f32 %v2831_v57, %v2725_v39  ;;  %v2953_v1 = vpop.f32.mrf.mxu3 }
 0x3d1   : > { %v2712_v22 = vpop.f32.mrf.mxu1 }
 0x3d2   : > { %v3126_v53 = vsel %vm3110_vm2, %v3102_v38, %v3118_v17  ;;  %v2969_v44 = vadd.f32 %v2953_v1, %v2847_v24  ;;  %v2726_v56 = vadd.f32 %v2712_v22, %v6517_v9  ;;  %v5384_v9 = vld [vmem:[#allocation12 + $0x110] sm:$0xff]  ;;  %v2484_v38 = vadd.f32 %v6529_v15, %v6525_v12  ;;  %v5383_v17 = vld [vmem:[#allocation12 + $0x108] sm:$0xff] }
 0x3d3   : > { %3134 = vst [vmem:[%s6551_s17 + $0x10] sm:$0xff] %v3126_v53  ;;  %v3179_v54 = vld [vmem:[#allocation3 + $0xf] sm:$0xff]  ;;  %3671 = vmatpush.bf16.msra.mxu1 %v5384_v9 }
 0x3d4   : > { %v3151_v41 = vld [vmem:[#allocation3 + $0xe] sm:$0xff]  ;;  %3144 = vst [vmem:[#allocation3 + $0x18] sm:$0xff] %v3126_v53  ;;  %v3091_v26 = vadd.f32 %v3075_v46, %v2969_v44  ;;  %v3186_v51 = vpack.c.bf16 %v3179_v54, %v3178_v23  ;;  %v2607_v22 = vadd.f32 %v6533_v62, %v2484_v38 }
 0x3d5   : > { %v3158_v5 = vpack.c.bf16 %v3151_v41, %v3150_v30  ;;  %v3475_v40 = vld [vmem:[#allocation3 + $0x9] sm:$0xff] }
 0x3d6   : > { %v3103_v6 = vadd.f32 %v6541_v21, %v3091_v26  ;;  %3263 = vmatmul.bf16.vlgmr.msrb.gmra.mxu1 %v3186_v51  ;;  %v5397_v38 = vld [vmem:[#allocation13 + $0x38] sm:$0xff] }
 0x3d7   : > { %3340 = vmatmul.bf16.vlgmr.msra.gmra.mxu2 %v3158_v5  ;;  %v2834_v10 = vpop.f32.mrf.mxu2  ;;  %3672 = vmatpush.bf16.msra.mxu1 %v5383_v17  ;;  %v5382_v5 = vld [vmem:[#allocation12 + $0x100] sm:$0xff]  ;;  %v5396_v17 = vld [vmem:[#allocation13 + $0x30] sm:$0xff] }
 0x3d8   : > { %vm3111_vm3 = vcmp.ge.f32.partialorder %v3103_v6, 0.0  ;;  %v3119_v50 = vmul.f32 0.2, %v3103_v6  ;;  %v2956_v60 = vpop.f32.mrf.mxu3  ;;  %v2848_v29 = vadd.f32 %v2834_v10, %v2726_v56  ;;  %3939 = vmatpush.bf16.msrb.mxu3 %v5397_v38 }
 0x3d9   : > { %v2714_v33 = vpop.f32.mrf.mxu1 }
 0x3da   : > { %v3127_v11 = vsel %vm3111_vm3, %v3103_v6, %v3119_v50  ;;  %v2970_v28 = vadd.f32 %v2956_v60, %v2848_v29  ;;  %v2727_v61 = vadd.f32 %v2714_v33, %v2605_v27 }
 0x3db   : > { %3135 = vst [vmem:[%s6551_s17 + $0x18] sm:$0xff] %v3127_v11  ;;  %v3476_v0 = vld [vmem:[#allocation3 + $0x11] sm:$0xff]  ;;  %v3370_v32 = vpack.c.bf16 %v3127_v11, %v3126_v53  ;;  %3673 = vmatpush.bf16.msra.mxu1 %v5382_v5  ;;  %v5392_v5 = vld [vmem:[#allocation13 + $0x10] sm:$0xff] }
 0x3dc   : > { %3145 = vst [vmem:[#allocation3 + $0x20] sm:$0xff] %v3127_v11  ;;  %v3483_v36 = vpack.c.bf16 %v3476_v0, %v3475_v40  ;;  %v3180_v47 = vld [vmem:[#allocation3 + $0x17] sm:$0xff]  ;;  %3940 = vmatpush.bf16.msrb.mxu3 %v5396_v17 }
 0x3dd   : > { %3451 = vmatmul.bf16.gmra.mxu3 %v3370_v32  ;;  %v3152_v8 = vld [vmem:[#allocation3 + $0x16] sm:$0xff] }
 0x3de   : > { %3560 = vmatmul.bf16.vlgmr.msrb.gmra.mxu0 %v3483_v36 }
 0x3df   : > { %v2836_v52 = vpop.f32.mrf.mxu2 }
 0x3e0   : > { %v2958_v14 = vpop.f32.mrf.mxu3  ;;  %v2849_v18 = vadd.f32 %v2836_v52, %v2727_v61 }
 0x3e1   : > { %v2717_v13 = vpop.f32.mrf.mxu1 }
 0x3e2   : > { %v2971_v34 = vadd.f32 %v2958_v14, %v2849_v18  ;;  %v2728_v45 = vadd.f32 %v2717_v13, %v6527_v37 }
 0x3e3   : > { %v3181_v20 = vld [vmem:[#allocation3 + $0x1f] sm:$0xff] }
 0x3e4   : > { %v3153_v35 = vld [vmem:[#allocation3 + $0x1e] sm:$0xff]  ;;  %v3187_v49 = vpack.c.bf16 %v3181_v20, %v3180_v47 }
 0x3e5   : > { %v3159_v48 = vpack.c.bf16 %v3153_v35, %v3152_v8  ;;  %v3477_v46 = vld [vmem:[#allocation3 + $0x19] sm:$0xff] }
 0x3e6   : > { %3268 = vmatmul.bf16.gmra.mxu1 %v3187_v49  ;;  %v3591_v2 = vld [vmem:[#allocation3 + $0x1a] sm:$0xff] }
 0x3e7   : > { %3345 = vmatmul.bf16.gmra.mxu2 %v3159_v48  ;;  %v2839_v42 = vpop.f32.mrf.mxu2 }
 0x3e8   : > { %v2850_v39 = vadd.f32 %v2839_v42, %v2728_v45  ;;  %v2961_v24 = vpop.f32.mrf.mxu3  ;;  %v5404_v45 = vld [vmem:[#allocation13 + $0x70] sm:$0xff] }
 0x3e9   : > { %v2719_v7 = vpop.f32.mrf.mxu1 }
 0x3ea   : > { %v2972_v53 = vadd.f32 %v2961_v24, %v2850_v39  ;;  %v2729_v41 = vadd.f32 %v2719_v7, %v2607_v22  ;;  %v5403_v39 = vld [vmem:[#allocation13 + $0x68] sm:$0xff]  ;;  %v5402_v24 = vld [vmem:[#allocation13 + $0x60] sm:$0xff] }
 0x3eb   : > { %v5395_v22 = vld [vmem:[#allocation13 + $0x28] sm:$0xff] }
 0x3ec   : > { %3941 = vmatpush.bf16.msrb.mxu3 %v5395_v22 }
 0x3ef   : > { %v2841_v23 = vpop.f32.mrf.mxu2 }
 0x3f0   : > { %v2851_v26 = vadd.f32 %v2841_v23, %v2729_v41  ;;  %v2963_v6 = vpop.f32.mrf.mxu3  ;;  %v5413_v23 = vld [vmem:[#allocation13 + $0xb8] sm:$0xff] }
 0x3f1   : > { %v3078_v31 = vpop.f32.mrf.mxu1  ;;  %4045 = vmatpush.bf16.msra.mxu0 %v5413_v23 }
 0x3f2   : > { %v3092_v63 = vadd.f32 %v3078_v31, %v2970_v28  ;;  %v2973_v50 = vadd.f32 %v2963_v6, %v2851_v26  ;;  %v3590_v28 = vld [vmem:[#allocation3 + $0x12] sm:$0xff]  ;;  %v3589_v31 = vld [vmem:[#allocation3 + $0xa] sm:$0xff] }
 0x3f3   : > { %v3597_v61 = vpack.c.bf16 %v3590_v28, %v3589_v31  ;;  %v5411_v26 = vld [vmem:[#allocation13 + $0xa8] sm:$0xff]  ;;  %v5398_v6 = vld [vmem:[#allocation13 + $0x40] sm:$0xff] }
 0x3f4   : > { %v3104_v25 = vadd.f32 %v6541_v21, %v3092_v63 }
 0x3f6   : > { %vm3112_vm4 = vcmp.ge.f32.partialorder %v3104_v25, 0.0  ;;  %v3120_v3 = vmul.f32 0.2, %v3104_v25 }
 0x3f8   : > { %v3128_v58 = vsel %vm3112_vm4, %v3104_v25, %v3120_v3 }
 0x3f9   : > { %3136 = vst [vmem:[%s6551_s17 + $0x20] sm:$0xff] %v3128_v58  ;;  %v3080_v59 = vpop.f32.mrf.mxu1 }
 0x3fa   : > { %3146 = vst [vmem:[#allocation3 + $0x28] sm:$0xff] %v3128_v58  ;;  %v3093_v19 = vadd.f32 %v3080_v59, %v2971_v34 }
 0x3fc   : > { %v3105_v57 = vadd.f32 %v6541_v21, %v3093_v19 }
 0x3fe   : > { %vm3113_vm5 = vcmp.ge.f32.partialorder %v3105_v57, 0.0  ;;  %v3121_v1 = vmul.f32 0.2, %v3105_v57 }
 0x400   : > { %v3129_v44 = vsel %vm3113_vm5, %v3105_v57, %v3121_v1 }
 0x401   : > { %3137 = vst [vmem:[%s6551_s17 + $0x28] sm:$0xff] %v3129_v44  ;;  %v3083_v37 = vpop.f32.mrf.mxu1  ;;  %v3478_v54 = vld [vmem:[#allocation3 + $0x21] sm:$0xff]  ;;  %v3371_v30 = vpack.c.bf16 %v3129_v44, %v3128_v58 }
 0x402   : > { %3147 = vst [vmem:[#allocation3 + $0x30] sm:$0xff] %v3129_v44  ;;  %v3094_v12 = vadd.f32 %v3083_v37, %v2972_v53  ;;  %v3484_v15 = vpack.c.bf16 %v3478_v54, %v3477_v46  ;;  %v3182_v11 = vld [vmem:[#allocation3 + $0x27] sm:$0xff]  ;;  %v5394_v37 = vld [vmem:[#allocation13 + $0x20] sm:$0xff] }
 0x403   : > { %3456 = vmatmul.bf16.gmra.mxu3 %v3371_v30  ;;  %v3154_v0 = vld [vmem:[#allocation3 + $0x26] sm:$0xff] }
 0x404   : > { %v3106_v51 = vadd.f32 %v6541_v21, %v3094_v12  ;;  %3565 = vmatmul.bf16.gmra.mxu0 %v3484_v15  ;;  %v3592_v63 = vld [vmem:[#allocation3 + $0x22] sm:$0xff]  ;;  %3942 = vmatpush.bf16.msrb.mxu3 %v5394_v37  ;;  %v5399_v15 = vld [vmem:[#allocation13 + $0x48] sm:$0xff] }
 0x405   : > { %v3598_v14 = vpack.c.bf16 %v3592_v63, %v3591_v2  ;;  %v5405_v58 = vld [vmem:[#allocation13 + $0x78] sm:$0xff]  ;;  %v5400_v46 = vld [vmem:[#allocation13 + $0x50] sm:$0xff] }
 0x406   : > { %vm3114_vm6 = vcmp.ge.f32.partialorder %v3106_v51, 0.0  ;;  %v3122_v62 = vmul.f32 0.2, %v3106_v51  ;;  %3862 = vmatpush.bf16.msrb.mxu2 %v5405_v58  ;;  %v5401_v53 = vld [vmem:[#allocation13 + $0x58] sm:$0xff]  ;;  %v5412_v54 = vld [vmem:[#allocation13 + $0xb0] sm:$0xff] }
 0x407   : > { %4046 = vmatpush.bf16.msra.mxu0 %v5412_v54  ;;  %v5393_v12 = vld [vmem:[#allocation13 + $0x18] sm:$0xff] }
 0x408   : > { %v3130_v33 = vsel %vm3114_vm6, %v3106_v51, %v3122_v62  ;;  %3943 = vmatpush.bf16.msrb.mxu3 %v5393_v12  ;;  %v5410_v62 = vld [vmem:[#allocation13 + $0xa0] sm:$0xff] }
 0x409   : > { %3138 = vst [vmem:[%s6551_s17 + $0x30] sm:$0xff] %v3130_v33  ;;  %v3085_v55 = vpop.f32.mrf.mxu1  ;;  %v3183_v40 = vld [vmem:[#allocation3 + $0x2f] sm:$0xff] }
 0x40a   : > { %v3155_v32 = vld [vmem:[#allocation3 + $0x2e] sm:$0xff]  ;;  %3148 = vst [vmem:[#allocation3 + $0x38] sm:$0xff] %v3130_v33  ;;  %v3095_v36 = vadd.f32 %v3085_v55, %v2973_v50  ;;  %v3188_v13 = vpack.c.bf16 %v3183_v40, %v3182_v11  ;;  %3863 = vmatpush.bf16.msrb.mxu2 %v5404_v45  ;;  %v5391_v55 = vld [vmem:[#allocation13 + $0x8] sm:$0xff] }
 0x40b   : > { %v3160_v47 = vpack.c.bf16 %v3155_v32, %v3154_v0  ;;  %v3479_v8 = vld [vmem:[#allocation3 + $0x29] sm:$0xff]  ;;  %4047 = vmatpush.bf16.msra.mxu0 %v5411_v26  ;;  %v5408_v32 = vld [vmem:[#allocation13 + $0x90] sm:$0xff] }
 0x40c   : > { %v3107_v43 = vadd.f32 %v6541_v21, %v3095_v36  ;;  %3273 = vmatmul.bf16.gmra.mxu1 %v3188_v13  ;;  %v3593_v25 = vld [vmem:[#allocation3 + $0x2a] sm:$0xff]  ;;  %3944 = vmatpush.bf16.msrb.mxu3 %v5392_v5 }
 0x40d   : > { %3350 = vmatmul.bf16.gmra.mxu2 %v3160_v47  ;;  %v5409_v40 = vld [vmem:[#allocation13 + $0x98] sm:$0xff]  ;;  %v5390_v0 = vld [vmem:[#allocation13] sm:$0xff] }
 0x40e   : > { %vm3115_vm7 = vcmp.ge.f32.partialorder %v3107_v43, 0.0  ;;  %v3123_v10 = vmul.f32 0.2, %v3107_v43  ;;  %3864 = vmatpush.bf16.msrb.mxu2 %v5403_v39 }
 0x40f   : > { %4048 = vmatpush.bf16.msra.mxu0 %v5410_v62 }
 0x410   : > { %v3131_v20 = vsel %vm3115_vm7, %v3107_v43, %v3123_v10  ;;  %3945 = vmatpush.bf16.msrb.mxu3 %v5391_v55  ;;  %v5407_v43 = vld [vmem:[#allocation13 + $0x88] sm:$0xff] }
 0x411   : > { %3139 = vst [vmem:[%s6551_s17 + $0x38] sm:$0xff] %v3131_v20  ;;  %v3480_v35 = vld [vmem:[#allocation3 + $0x31] sm:$0xff]  ;;  %v3372_v49 = vpack.c.bf16 %v3131_v20, %v3130_v33 }
 0x412   : > { %3149 = vst [vmem:[#allocation3 + $0x40] sm:$0xff] %v3131_v20  ;;  %v3485_v48 = vpack.c.bf16 %v3480_v35, %v3479_v8  ;;  %v3184_v60 = vld [vmem:[#allocation3 + $0x37] sm:$0xff]  ;;  %3865 = vmatpush.bf16.msrb.mxu2 %v5402_v24 }
 0x413   : > { %3461 = vmatmul.bf16.gmra.mxu3 %v3372_v49  ;;  %v3156_v56 = vld [vmem:[#allocation3 + $0x36] sm:$0xff]  ;;  %4049 = vmatpush.bf16.msra.mxu0 %v5409_v40 }
 0x414   : > { %3570 = vmatmul.bf16.gmra.mxu0 %v3485_v48  ;;  %v3594_v18 = vld [vmem:[#allocation3 + $0x32] sm:$0xff]  ;;  %3946 = vmatpush.bf16.msrb.mxu3 %v5390_v0 }
 0x415   : > { %v3599_v9 = vpack.c.bf16 %v3594_v18, %v3593_v25  ;;  %v5406_v35 = vld [vmem:[#allocation13 + $0x80] sm:$0xff] }
 0x416   : > { %3866 = vmatpush.bf16.msrb.mxu2 %v5401_v53 }
 0x417   : > { %4050 = vmatpush.bf16.msra.mxu0 %v5408_v32 }
 0x419   : > { %v3185_v7 = vld [vmem:[#allocation3 + $0x3f] sm:$0xff] }
 0x41a   : > { %v3157_v4 = vld [vmem:[#allocation3 + $0x3e] sm:$0xff]  ;;  %v3189_v16 = vpack.c.bf16 %v3185_v7, %v3184_v60  ;;  %3867 = vmatpush.bf16.msrb.mxu2 %v5400_v46  ;;  %v6598_v60 = vld [vmem:[%s6827_s8] ss:$0 sm:$0xff] }
 0x41b   : > { %v3161_v29 = vpack.c.bf16 %v3157_v4, %v3156_v56  ;;  %v3481_v21 = vld [vmem:[#allocation3 + $0x39] sm:$0xff]  ;;  %v3482_v52 = vld [vmem:[#allocation3 + $0x41] sm:$0xff]  ;;  %4051 = vmatpush.bf16.msra.mxu0 %v5407_v43 }
 0x41c   : > { %3278 = vmatmul.bf16.gmra.mxu1 %v3189_v16  ;;  %v3486_v27 = vpack.c.bf16 %v3482_v52, %v3481_v21  ;;  %v3595_v3 = vld [vmem:[#allocation3 + $0x3a] sm:$0xff]  ;;  %v3596_v42 = vld [vmem:[#allocation3 + $0x42] sm:$0xff] }
 0x41d   : > { %3355 = vmatmul.bf16.gmra.mxu2 %v3161_v29  ;;  %v3600_v34 = vpack.c.bf16 %v3596_v42, %v3595_v3 }
 0x41e   : > { %3868 = vmatpush.bf16.msrb.mxu2 %v5399_v15 }
 0x41f   : > { %4052 = vmatpush.bf16.msra.mxu0 %v5406_v35 }
 0x422   : > { %3869 = vmatpush.bf16.msrb.mxu2 %v5398_v6 }
 0x424   : > { %3575 = vmatmul.bf16.gmra.mxu0 %v3486_v27 }
 0x426   : > { %5427 = vmatpush.bf16.msra.mxu2 %v5413_v23 }
 0x42a   : > { %5428 = vmatpush.bf16.msra.mxu2 %v5412_v54 }
 0x42c   : > { %3674 = vmatmul.bf16.vlgmr.msra.gmra.mxu1 %v3597_v61 }
 0x42e   : > { %5429 = vmatpush.bf16.msra.mxu2 %v5411_v26 }
 0x432   : > { %5430 = vmatpush.bf16.msra.mxu2 %v5410_v62 }
 0x436   : > { %5431 = vmatpush.bf16.msra.mxu2 %v5409_v40 }
 0x43a   : > { %5432 = vmatpush.bf16.msra.mxu2 %v5408_v32 }
 0x43c   : > { %3679 = vmatmul.bf16.gmra.mxu1 %v3598_v14 }
 0x43e   : > { %5433 = vmatpush.bf16.msra.mxu2 %v5407_v43 }
 0x442   : > { %5434 = vmatpush.bf16.msra.mxu2 %v5406_v35 }
 0x44c   : > { %3684 = vmatmul.bf16.gmra.mxu1 %v3599_v9 }
 0x450   : > { %v3447_v51 = vpop.f32.mrf.mxu3 }
 0x453   : > { %v3264_v59 = vpop.f32.mrf.mxu1 }
 0x458   : > { %v3449_v13 = vpop.f32.mrf.mxu3 }
 0x45a   : > { %v3341_v30 = vpop.f32.mrf.mxu2 }
 0x45b   : > { %v6580_v19 = vpop.f32.mrf.mxu1  ;;  %v3561_v33 = vpop.f32.mrf.mxu0  ;;  %v3342_v36 = vadd.f32 %v3341_v30, %v3264_v59 }
 0x45c   : > { %3689 = vmatmul.bf16.gmra.mxu1 %v3600_v34 }
 0x45d   : > { %v3467_v10 = vadd.f32 %v3447_v51, %v3342_v36 }
 0x45f   : > { %v3581_v49 = vadd.f32 %v3561_v33, %v3467_v10 }
 0x460   : > { %v3452_v4 = vpop.f32.mrf.mxu3 }
 0x462   : > { %v3343_v11 = vpop.f32.mrf.mxu2 }
 0x463   : > { %v6582_v57 = vpop.f32.mrf.mxu1  ;;  %v3563_v20 = vpop.f32.mrf.mxu0  ;;  %v3344_v48 = vadd.f32 %v3343_v11, %v6580_v19 }
 0x465   : > { %v3468_v16 = vadd.f32 %v3449_v13, %v3344_v48 }
 0x467   : > { %v3582_v28 = vadd.f32 %v3563_v20, %v3468_v16 }
 0x468   : > { %v3454_v18 = vpop.f32.mrf.mxu3 }
 0x46a   : > { %v3346_v8 = vpop.f32.mrf.mxu2 }
 0x46b   : > { %v6584_v1 = vpop.f32.mrf.mxu1  ;;  %v3347_v63 = vadd.f32 %v3346_v8, %v6582_v57 }
 0x46d   : > { %v3469_v25 = vadd.f32 %v3452_v4, %v3347_v63 }
 0x472   : > { %v3348_v27 = vpop.f32.mrf.mxu2 }
 0x473   : > { %v3349_v19 = vadd.f32 %v3348_v27, %v6584_v1 }
 0x475   : > { %v3470_v17 = vadd.f32 %v3454_v18, %v3349_v19 }
 0x481   : > { %v3566_v29 = vpop.f32.mrf.mxu0 }
 0x482   : > { %v3583_v34 = vadd.f32 %v3566_v29, %v3469_v25 }
 0x486   : > { %v3457_v57 = vpop.f32.mrf.mxu3 }
 0x489   : > { %v6586_v44 = vpop.f32.mrf.mxu1  ;;  %v3568_v9 = vpop.f32.mrf.mxu0 }
 0x48a   : > { %v3584_v22 = vadd.f32 %v3568_v9, %v3470_v17 }
 0x48e   : > { %v3459_v62 = vpop.f32.mrf.mxu3 }
 0x490   : > { %v3351_v42 = vpop.f32.mrf.mxu2 }
 0x491   : > { %v6588_v41 = vpop.f32.mrf.mxu1  ;;  %v3352_v53 = vadd.f32 %v3351_v42, %v6586_v44  ;;  %v3571_v23 = vpop.f32.mrf.mxu0 }
 0x493   : > { %v3471_v26 = vadd.f32 %v3457_v57, %v3352_v53 }
 0x495   : > { %v3585_v6 = vadd.f32 %v3571_v23, %v3471_v26 }
 0x496   : > { %v3462_v48 = vpop.f32.mrf.mxu3 }
 0x498   : > { %v3353_v46 = vpop.f32.mrf.mxu2 }
 0x499   : > { %v6590_v50 = vpop.f32.mrf.mxu1  ;;  %v3354_v44 = vadd.f32 %v3353_v46, %v6588_v41  ;;  %v3573_v13 = vpop.f32.mrf.mxu0 }
 0x49b   : > { %v3472_v10 = vadd.f32 %v3459_v62, %v3354_v44 }
 0x49d   : > { %v3586_v41 = vadd.f32 %v3573_v13, %v3472_v10 }
 0x49e   : > { %v3464_v42 = vpop.f32.mrf.mxu3 }
 0x4a0   : > { %v3356_v43 = vpop.f32.mrf.mxu2 }
 0x4a1   : > { %v6592_v47 = vpop.f32.mrf.mxu1  ;;  %v3357_v35 = vadd.f32 %v3356_v43, %v6590_v50  ;;  %v3576_v27 = vpop.f32.mrf.mxu0 }
 0x4a9   : > { %v3675_v7 = vpop.f32.mrf.mxu1 }
 0x4aa   : > { %v3695_v56 = vadd.f32 %v3675_v7, %v3581_v49 }
 0x4ac   : > { %v3707_v21 = vadd.f32 %v6598_v60, %v3695_v56 }
 0x4ae   : > { %vm3715_vm8 = vcmp.ge.f32.partialorder %v3707_v21, 0.0  ;;  %v3723_v52 = vmul.f32 0.2, %v3707_v21 }
 0x4b0   : > { %v3731_v31 = vsel %vm3715_vm8, %v3707_v21, %v3723_v52  ;;  %v3473_v21 = vadd.f32 %v3462_v48, %v3357_v35 }
 0x4b1   : > { %3739 = vst [vmem:[%s6602_s5] sm:$0xff] %v3731_v31  ;;  %v3677_v61 = vpop.f32.mrf.mxu1 }
 0x4b2   : > { %3749 = vst [vmem:[#allocation2 + $0x8] sm:$0xff] %v3731_v31  ;;  %v3696_v2 = vadd.f32 %v3677_v61, %v3582_v28  ;;  %v3358_v28 = vpop.f32.mrf.mxu2  ;;  %v3587_v61 = vadd.f32 %v3576_v27, %v3473_v21 }
 0x4b3   : > { %v3359_v50 = vadd.f32 %v3358_v28, %v6592_v47  ;;  %v3578_v47 = vpop.f32.mrf.mxu0 }
 0x4b4   : > { %v3708_v14 = vadd.f32 %v6598_v60, %v3696_v2 }
 0x4b6   : > { %vm3716_vm9 = vcmp.ge.f32.partialorder %v3708_v14, 0.0  ;;  %v3724_v3 = vmul.f32 0.2, %v3708_v14 }
 0x4b8   : > { %v3732_v58 = vsel %vm3716_vm9, %v3708_v14, %v3724_v3 }
 0x4b9   : > { %3740 = vst [vmem:[%s6602_s5 + $0x8] sm:$0xff] %v3732_v58  ;;  %v3680_v59 = vpop.f32.mrf.mxu1  ;;  %v3793_v45 = vpack.c.bf16 %v3732_v58, %v3731_v31  ;;  %v3757_v30 = vld [vmem:[#allocation2 + $0x7] sm:$0xff] }
 0x4ba   : > { %3750 = vst [vmem:[#allocation2 + $0x10] sm:$0xff] %v3732_v58  ;;  %v3697_v38 = vadd.f32 %v3680_v59, %v3583_v34  ;;  %v3474_v34 = vadd.f32 %v3464_v42, %v3359_v50 }
 0x4bb   : > { %3870 = vmatmul.bf16.vlgmr.msrb.gmra.mxu2 %v3793_v45 }
 0x4bc   : > { %v3709_v39 = vadd.f32 %v6598_v60, %v3697_v38  ;;  %v3588_v45 = vadd.f32 %v3578_v47, %v3474_v34 }
 0x4be   : > { %vm3717_vm10 = vcmp.ge.f32.partialorder %v3709_v39, 0.0  ;;  %v3725_v24 = vmul.f32 0.2, %v3709_v39 }
 0x4c0   : > { %v3733_v37 = vsel %vm3717_vm10, %v3709_v39, %v3725_v24 }
 0x4c1   : > { %3741 = vst [vmem:[%s6602_s5 + $0x10] sm:$0xff] %v3733_v37  ;;  %v3682_v54 = vpop.f32.mrf.mxu1  ;;  %v3758_v1 = vld [vmem:[#allocation2 + $0xf] sm:$0xff] }
 0x4c2   : > { %3751 = vst [vmem:[#allocation2 + $0x18] sm:$0xff] %v3733_v37  ;;  %v3698_v12 = vadd.f32 %v3682_v54, %v3584_v22  ;;  %v3765_v15 = vpack.c.bf16 %v3758_v1, %v3757_v30  ;;  %v3968_v55 = vld [vmem:[#allocation2 + $0x9] sm:$0xff] }
 0x4c4   : > { %v3710_v51 = vadd.f32 %v6598_v60, %v3698_v12  ;;  %3947 = vmatmul.bf16.vlgmr.msrb.gmra.mxu3 %v3765_v15 }
 0x4c6   : > { %vm3718_vm11 = vcmp.ge.f32.partialorder %v3710_v51, 0.0  ;;  %v3726_v5 = vmul.f32 0.2, %v3710_v51 }
 0x4c8   : > { %v3734_v33 = vsel %vm3718_vm11, %v3710_v51, %v3726_v5 }
 0x4c9   : > { %3742 = vst [vmem:[%s6602_s5 + $0x18] sm:$0xff] %v3734_v33  ;;  %v3685_v11 = vpop.f32.mrf.mxu1  ;;  %v3969_v40 = vld [vmem:[#allocation2 + $0x11] sm:$0xff]  ;;  %v3794_v0 = vpack.c.bf16 %v3734_v33, %v3733_v37 }
 0x4ca   : > { %3752 = vst [vmem:[#allocation2 + $0x20] sm:$0xff] %v3734_v33  ;;  %v3699_v32 = vadd.f32 %v3685_v11, %v3585_v6  ;;  %v3976_v36 = vpack.c.bf16 %v3969_v40, %v3968_v55  ;;  %v3759_v56 = vld [vmem:[#allocation2 + $0x17] sm:$0xff] }
 0x4cb   : > { %3875 = vmatmul.bf16.gmra.mxu2 %v3794_v0 }
 0x4cc   : > { %v3711_v20 = vadd.f32 %v6598_v60, %v3699_v32  ;;  %4053 = vmatmul.bf16.vlgmr.msra.gmra.mxu0 %v3976_v36 }
 0x4ce   : > { %vm3719_vm12 = vcmp.ge.f32.partialorder %v3711_v20, 0.0  ;;  %v3727_v8 = vmul.f32 0.2, %v3711_v20 }
 0x4d0   : > { %v3735_v49 = vsel %vm3719_vm12, %v3711_v20, %v3727_v8 }
 0x4d1   : > { %3743 = vst [vmem:[%s6602_s5 + $0x20] sm:$0xff] %v3735_v49  ;;  %v3687_v7 = vpop.f32.mrf.mxu1  ;;  %v3760_v4 = vld [vmem:[#allocation2 + $0x1f] sm:$0xff] }
 0x4d2   : > { %3753 = vst [vmem:[#allocation2 + $0x28] sm:$0xff] %v3735_v49  ;;  %v3700_v16 = vadd.f32 %v3687_v7, %v3586_v41  ;;  %v3766_v29 = vpack.c.bf16 %v3760_v4, %v3759_v56  ;;  %v3970_v14 = vld [vmem:[#allocation2 + $0x19] sm:$0xff] }
 0x4d4   : > { %v3712_v52 = vadd.f32 %v6598_v60, %v3700_v16  ;;  %3952 = vmatmul.bf16.gmra.mxu3 %v3766_v29 }
 0x4d6   : > { %vm3720_vm13 = vcmp.ge.f32.partialorder %v3712_v52, 0.0  ;;  %v3728_v31 = vmul.f32 0.2, %v3712_v52 }
 0x4d8   : > { %v3736_v63 = vsel %vm3720_vm13, %v3712_v52, %v3728_v31 }
 0x4d9   : > { %3744 = vst [vmem:[%s6602_s5 + $0x28] sm:$0xff] %v3736_v63  ;;  %v3690_v2 = vpop.f32.mrf.mxu1  ;;  %v3971_v18 = vld [vmem:[#allocation2 + $0x21] sm:$0xff]  ;;  %v3795_v25 = vpack.c.bf16 %v3736_v63, %v3735_v49 }
 0x4da   : > { %3754 = vst [vmem:[#allocation2 + $0x30] sm:$0xff] %v3736_v63  ;;  %v3701_v9 = vadd.f32 %v3690_v2, %v3587_v61  ;;  %v3977_v3 = vpack.c.bf16 %v3971_v18, %v3970_v14  ;;  %v3761_v39 = vld [vmem:[#allocation2 + $0x27] sm:$0xff] }
 0x4db   : > { %3880 = vmatmul.bf16.gmra.mxu2 %v3795_v25 }
 0x4dc   : > { %v3713_v58 = vadd.f32 %v6598_v60, %v3701_v9  ;;  %4058 = vmatmul.bf16.gmra.mxu0 %v3977_v3 }
 0x4de   : > { %vm3721_vm14 = vcmp.ge.f32.partialorder %v3713_v58, 0.0  ;;  %v3729_v59 = vmul.f32 0.2, %v3713_v58 }
 0x4e0   : > { %v3737_v19 = vsel %vm3721_vm14, %v3713_v58, %v3729_v59 }
 0x4e1   : > { %3745 = vst [vmem:[%s6602_s5 + $0x30] sm:$0xff] %v3737_v19  ;;  %v3692_v38 = vpop.f32.mrf.mxu1  ;;  %v3762_v57 = vld [vmem:[#allocation2 + $0x2f] sm:$0xff] }
 0x4e2   : > { %3755 = vst [vmem:[#allocation2 + $0x38] sm:$0xff] %v3737_v19  ;;  %v3702_v17 = vadd.f32 %v3692_v38, %v3588_v45  ;;  %v3767_v24 = vpack.c.bf16 %v3762_v57, %v3761_v39  ;;  %v3972_v37 = vld [vmem:[#allocation2 + $0x29] sm:$0xff] }
 0x4e4   : > { %v3714_v22 = vadd.f32 %v6598_v60, %v3702_v17  ;;  %3957 = vmatmul.bf16.gmra.mxu3 %v3767_v24 }
 0x4e6   : > { %vm3722_vm15 = vcmp.ge.f32.partialorder %v3714_v22, 0.0  ;;  %v3730_v53 = vmul.f32 0.2, %v3714_v22 }
 0x4e8   : > { %v3738_v23 = vsel %vm3722_vm15, %v3714_v22, %v3730_v53 }
 0x4e9   : > { %3746 = vst [vmem:[%s6602_s5 + $0x38] sm:$0xff] %v3738_v23  ;;  %v3973_v46 = vld [vmem:[#allocation2 + $0x31] sm:$0xff]  ;;  %v3796_v54 = vpack.c.bf16 %v3738_v23, %v3737_v19 }
 0x4ea   : > { %3756 = vst [vmem:[#allocation2 + $0x40] sm:$0xff] %v3738_v23  ;;  %v3978_v30 = vpack.c.bf16 %v3973_v46, %v3972_v37  ;;  %v3763_v1 = vld [vmem:[#allocation2 + $0x37] sm:$0xff] }
 0x4eb   : > { %3885 = vmatmul.bf16.gmra.mxu2 %v3796_v54 }
 0x4ec   : > { %4063 = vmatmul.bf16.gmra.mxu0 %v3978_v30 }
 0x4f1   : > { %v3764_v12 = vld [vmem:[#allocation2 + $0x3f] sm:$0xff] }
 0x4f2   : > { %v3768_v15 = vpack.c.bf16 %v3764_v12, %v3763_v1  ;;  %v3974_v60 = vld [vmem:[#allocation2 + $0x39] sm:$0xff]  ;;  %v3975_v26 = vld [vmem:[#allocation2 + $0x41] sm:$0xff] }
 0x4f3   : > { %v3979_v51 = vpack.c.bf16 %v3975_v26, %v3974_v60 }
 0x4f4   : > { %3962 = vmatmul.bf16.gmra.mxu3 %v3768_v15 }
 0x4fb   : > { %4068 = vmatmul.bf16.vlgmr.msra.gmra.mxu2 %v3979_v51 }
 0x4fc   : > { %5771 = shalt.err (!%p5768_p9)
}
 0x4fd   : > { %s5954_s23 = smov 128   ;;  %s5955_s9 = smov 8  }
 0x4fe   : > { %5458 = dma.vmem_to_hbm [thread:$0]  (%p6126_p0), %s4153_s16, 2048, %s4155_s13, %s6638_s2, %s5954_s23, %s5954_s23, %s5955_s9  }
 0x4ff   : > { %s4169_s28 = sshll.u32 %s6551_s17, 4  ;;  %s4186_s3 = sshll.u32 %s6602_s5, 4  ;;  %s4187_s3 = int_to_ptr.vmem [resolvable:$true] %s4186_s3  ;;  %s6660_s28 = int_to_ptr.vmem [resolvable:$true] %s4169_s28 }
 0x500   : > { %s6830_s24 = sld [smem:[#allocation44_spill]]  ;;  %s4188_s27 = sshll.u32 %s4185_s0, 4  ;;  %s4189_s27 = int_to_ptr.hbm [resolvable:$true] %s4188_s27 }
 0x501   : > { %s6662_s8 = scalar_lea.sflag [#allocation20], %s4107_s30  ;;  %s5786_s12 = sshra.s32 %s4189_s27, 4  ;;  %s5787_s12 = int_to_ptr.hbm [resolvable:$true] %s5786_s12 }
 0x502   : > { %s5788_s20 = scalar_lea.hbm %s5787_s12, 64  ;;  %s5792_s16 = scalar_lea.hbm %s6829_s14, 128 }
 0x503   : > { %p5789_p10 = scmp.ne.s32.totalorder %s5787_s12, %s5788_s20  ;;  %p5793_p2 = scmp.lt.s32.totalorder %s5787_s12, %s6829_s14 }
 0x504   : > { %p5794_p4 = scmp.lt.s32.totalorder %s5792_s16, %s5788_s20 }
 0x505   : > { %p5790_p11 = pnand %p5789_p10, %p6126_p0 }
 0x506   : > { %s4168_s7 = scalar_lea.hbm %s6830_s24, %s6630_s10  ;;  %p5795_p1 = por %p5794_p4, %p5793_p2 }
 0x507   : > { %p5791_p12 = pneg %p5790_p11 }
 0x509   : > { %p5796_p3 = pnand %p5795_p1, %p5791_p12 }
 0x50b   : > { %5799 = shalt.err (!%p5796_p3)
}
 0x50c   : > { %5460 = dma.vmem_to_hbm [thread:$0]  (%p6126_p0), %s4187_s3, 1024, %s4189_s27, %s6662_s8, %s5954_s23, %s5954_s23, %s5955_s9  }
 0x50d   : > { %s6678_s0 = sshll.u32 %s4168_s7, 4  ;;  %s5414_s30 = sshll.u32 %s6060_s25, 8  ;;  %s4172_s0 = int_to_ptr.hbm [resolvable:$true] %s6678_s0 }
 0x50e   : > { %s4135_s12 = sshll.u32 %s6215_s26, 4  ;;  %s6831_s17 = sld [smem:[#allocation42_spill]]  ;;  %s4136_s12 = int_to_ptr.vmem [resolvable:$true] %s4135_s12 }
 0x50f   : > { %s4103_s13 = scalar_lea.sflag [#allocation6], %s6161_s22 }
 0x514   : > { %s4134_s5 = scalar_lea.hbm %s6831_s17, %s5414_s30  ;;  %s5820_s25 = scalar_lea.hbm %s6831_s17, 512 }
 0x515   : > { %s4137_s16 = sshll.u32 %s4134_s5, 4  ;;  %s4138_s16 = int_to_ptr.hbm [resolvable:$true] %s4137_s16 }
 0x516   : > { %s5814_s4 = sshra.s32 %s4138_s16, 4  ;;  %s5815_s4 = int_to_ptr.hbm [resolvable:$true] %s5814_s4 }
 0x517   : > { %s5816_s14 = scalar_lea.hbm %s5815_s4, 256  ;;  %p5821_p8 = scmp.lt.s32.totalorder %s5815_s4, %s6831_s17 }
 0x518   : > { %p5817_p5 = scmp.ne.s32.totalorder %s5815_s4, %s5816_s14  ;;  %p5822_p9 = scmp.lt.s32.totalorder %s5820_s25, %s5816_s14 }
 0x51a   : > { %p5818_p13 = pnand %p5817_p5, %p6126_p0  ;;  %p5823_p10 = por %p5822_p9, %p5821_p8 }
 0x51c   : > { %p5819_p7 = pneg %p5818_p13 }
 0x51e   : > { %p5824_p11 = pnand %p5823_p10, %p5819_p7 }
 0x520   : > { %5827 = shalt.err (!%p5824_p11)
}
 0x521   : > { %5457 = dma.vmem_to_hbm [thread:$0]  (%p6126_p0), %s4136_s12, 4096, %s4138_s16, %s4103_s13, %s5954_s23, %s5954_s23, %s5955_s9  }
 0x522   : > { %s5842_s22 = sshra.s32 %s4172_s0, 4  ;;  %s5848_s6 = scalar_lea.hbm %s6830_s24, 128  ;;  %s5843_s22 = int_to_ptr.hbm [resolvable:$true] %s5842_s22 }
 0x523   : > { %s5844_s30 = scalar_lea.hbm %s5843_s22, 64  ;;  %p5849_p1 = scmp.lt.s32.totalorder %s5843_s22, %s6830_s24 }
 0x524   : > { %p5845_p12 = scmp.ne.s32.totalorder %s5843_s22, %s5844_s30  ;;  %p5850_p3 = scmp.lt.s32.totalorder %s5848_s6, %s5844_s30 }
 0x526   : > { %p5846_p2 = pnand %p5845_p12, %p6126_p0  ;;  %p5851_p5 = por %p5850_p3, %p5849_p1 }
 0x528   : > { %p5847_p4 = pneg %p5846_p2 }
 0x52a   : > { %p5852_p13 = pnand %p5851_p5, %p5847_p4 }
 0x52c   : > { %5855 = shalt.err (!%p5852_p13)
}
 0x52d   : > { %5459 = dma.vmem_to_hbm [thread:$0]  (%p6126_p0), %s6660_s28, 1024, %s4172_s0, %s6638_s2, %s5954_s23, %s5954_s23, %s5955_s9  }
 0x52e   : > { %s6832_s13 = sld [smem:[#allocation41_spill]]  ;;  %s6723_s3 = scalar_lea.vmem [#allocation21], %s6545_s1 }
 0x52f   : > { %s6833_s28 = sld [smem:[#allocation46_spill]]  ;;  %s4203_s7 = sshll.u32 %s6723_s3, 4  ;;  %s4204_s7 = int_to_ptr.vmem [resolvable:$true] %s4203_s7 }
 0x534   : > { %v5563_v33 = vld [vmem:[%s6832_s13] ss:$0 sm:$0xff] }
 0x535   : > { %s4202_s0 = scalar_lea.hbm %s6833_s28, %s6630_s10  ;;  %s5876_s10 = scalar_lea.hbm %s6833_s28, 128 }
 0x536   : > { %s4205_s25 = sshll.u32 %s4202_s0, 4  ;;  %s4206_s25 = int_to_ptr.hbm [resolvable:$true] %s4205_s25 }
 0x537   : > { %s5870_s26 = sshra.s32 %s4206_s25, 4  ;;  %s5871_s26 = int_to_ptr.hbm [resolvable:$true] %s5870_s26 }
 0x538   : > { %s5872_s27 = scalar_lea.hbm %s5871_s26, 64  ;;  %p5877_p10 = scmp.lt.s32.totalorder %s5871_s26, %s6833_s28 }
 0x539   : > { %p5873_p7 = scmp.ne.s32.totalorder %s5871_s26, %s5872_s27  ;;  %p5878_p11 = scmp.lt.s32.totalorder %s5876_s10, %s5872_s27 }
 0x53b   : > { %p5874_p8 = pnand %p5873_p7, %p6126_p0  ;;  %p5879_p12 = por %p5878_p11, %p5877_p10 }
 0x53d   : > { %p5875_p9 = pneg %p5874_p8 }
 0x53e   : > { %v3871_v5 = vpop.f32.mrf.mxu2 }
 0x53f   : > { %p5880_p2 = pnand %p5879_p12, %p5875_p9 }
 0x546   : > { %v3873_v62 = vpop.f32.mrf.mxu2 }
 0x547   : > { %v3948_v6 = vpop.f32.mrf.mxu3 }
 0x548   : > { %v3949_v44 = vadd.f32 %v3948_v6, %v3871_v5 }
 0x549   : > { %v4054_v11 = vpop.f32.mrf.mxu0 }
 0x54a   : > { %v4074_v55 = vadd.f32 %v4054_v11, %v3949_v44 }
 0x54c   : > { %v4086_v40 = vadd.f32 %v5563_v33, %v4074_v55 }
 0x54e   : > { %4094 = vst [vmem:[%s6723_s3] sm:$0xff] %v4086_v40  ;;  %v3876_v0 = vpop.f32.mrf.mxu2 }
 0x54f   : > { %v3950_v32 = vpop.f32.mrf.mxu3 }
 0x550   : > { %v3951_v36 = vadd.f32 %v3950_v32, %v3873_v62 }
 0x551   : > { %v4056_v13 = vpop.f32.mrf.mxu0 }
 0x552   : > { %v4075_v43 = vadd.f32 %v4056_v13, %v3951_v36 }
 0x554   : > { %v4087_v10 = vadd.f32 %v5563_v33, %v4075_v43 }
 0x556   : > { %4095 = vst [vmem:[%s6723_s3 + $0x8] sm:$0xff] %v4087_v10  ;;  %v3878_v20 = vpop.f32.mrf.mxu2 }
 0x557   : > { %v3953_v8 = vpop.f32.mrf.mxu3 }
 0x558   : > { %v3954_v41 = vadd.f32 %v3953_v8, %v3876_v0 }
 0x559   : > { %v4059_v35 = vpop.f32.mrf.mxu0 }
 0x55a   : > { %v4076_v49 = vadd.f32 %v4059_v35, %v3954_v41 }
 0x55c   : > { %v4088_v48 = vadd.f32 %v5563_v33, %v4076_v49 }
 0x55e   : > { %4096 = vst [vmem:[%s6723_s3 + $0x10] sm:$0xff] %v4088_v48  ;;  %v3881_v7 = vpop.f32.mrf.mxu2 }
 0x55f   : > { %v3955_v56 = vpop.f32.mrf.mxu3 }
 0x560   : > { %v3956_v4 = vadd.f32 %v3955_v56, %v3878_v20 }
 0x561   : > { %v4061_v16 = vpop.f32.mrf.mxu0 }
 0x562   : > { %v4077_v29 = vadd.f32 %v4061_v16, %v3956_v4 }
 0x564   : > { %v4089_v21 = vadd.f32 %v5563_v33, %v4077_v29 }
 0x566   : > { %4097 = vst [vmem:[%s6723_s3 + $0x18] sm:$0xff] %v4089_v21  ;;  %v3883_v52 = vpop.f32.mrf.mxu2 }
 0x567   : > { %v3958_v27 = vpop.f32.mrf.mxu3 }
 0x568   : > { %v3959_v28 = vadd.f32 %v3958_v27, %v3881_v7 }
 0x569   : > { %v4064_v31 = vpop.f32.mrf.mxu0 }
 0x56a   : > { %v4078_v61 = vadd.f32 %v4064_v31, %v3959_v28 }
 0x56c   : > { %v4090_v50 = vadd.f32 %v5563_v33, %v4078_v61 }
 0x56e   : > { %4098 = vst [vmem:[%s6723_s3 + $0x20] sm:$0xff] %v4090_v50  ;;  %v3886_v63 = vpop.f32.mrf.mxu2 }
 0x56f   : > { %v3960_v2 = vpop.f32.mrf.mxu3 }
 0x570   : > { %v3961_v14 = vadd.f32 %v3960_v2, %v3883_v52 }
 0x571   : > { %v4066_v18 = vpop.f32.mrf.mxu0 }
 0x572   : > { %v4079_v25 = vadd.f32 %v4066_v18, %v3961_v14 }
 0x574   : > { %v4091_v9 = vadd.f32 %v5563_v33, %v4079_v25 }
 0x576   : > { %4099 = vst [vmem:[%s6723_s3 + $0x28] sm:$0xff] %v4091_v9  ;;  %v3888_v3 = vpop.f32.mrf.mxu2 }
 0x577   : > { %v3963_v42 = vpop.f32.mrf.mxu3 }
 0x578   : > { %v3964_v34 = vadd.f32 %v3963_v42, %v3886_v63 }
 0x57e   : > { %v4069_v58 = vpop.f32.mrf.mxu2 }
 0x57f   : > { %v4080_v59 = vadd.f32 %v4069_v58, %v3964_v34  ;;  %v3965_v45 = vpop.f32.mrf.mxu3 }
 0x580   : > { %v3966_v19 = vadd.f32 %v3965_v45, %v3888_v3 }
 0x581   : > { %v4092_v47 = vadd.f32 %v5563_v33, %v4080_v59 }
 0x583   : > { %4100 = vst [vmem:[%s6723_s3 + $0x30] sm:$0xff] %v4092_v47 }
 0x586   : > { %v4071_v38 = vpop.f32.mrf.mxu2 }
 0x587   : > { %v4081_v39 = vadd.f32 %v4071_v38, %v3966_v19 }
 0x589   : > { %v4093_v57 = vadd.f32 %v5563_v33, %v4081_v39 }
 0x58b   : > { %4101 = vst [vmem:[%s6723_s3 + $0x38] sm:$0xff] %v4093_v57 }
 0x58c   : > { %5883 = shalt.err (!%p5880_p2)
}
 0x58d   : > { %5461 = dma.vmem_to_hbm [thread:$0]  (%p6126_p0), %s4204_s7, 1024, %s4206_s25, %s6662_s8, %s5954_s23, %s5954_s23, %s5955_s9  }
 0x58e PF: > { %s4220_s6 = sand.u32 1, %s5930_s18   ;;  %p6834_p4 = scmp.ge.s32.totalorder %s5942_s21, 2 }
 0x58f   : > { %s4221_s5 = scalar_lea.sflag [#allocation6], %s4220_s6 }
 0x590   : > { %p5488_p1 = pnand %p6834_p4, %p6134_p6 }
 0x592   : > { %p5489_p3 = pneg %p5488_p1 }
 0x594   : > { %5917 = dma.done.wait (%p5489_p3), %s4221_s5, 4096  }
 0x595   : > { %5919 = vsyncadd (%p5489_p3), %s4221_s5, 4294963200  ;;  %s6835_s4 = sadd.s32 4294967294, %s5942_s21  }
 0x596   : > { %s4230_s11 = sand.u32 1, %s6835_s4  }
 0x597   : > { %s4231_s12 = scalar_lea.sflag [#allocation17], %s4230_s11 }
 0x598   : > { %5921 = dma.done.wait (%p5489_p3), %s4231_s12, 3072  }
 0x599   : > { %5923 = vsyncadd (%p5489_p3), %s4231_s12, 4294964224  ;;  %s4251_s16 = scalar_lea.sflag [#allocation20], %s4230_s11 }
 0x59a   : > { %5925 = dma.done.wait (%p5489_p3), %s4251_s16, 2048  }
 0x59b   : > { %5927 = vsyncadd (%p5489_p3), %s4251_s16, 4294965248  ;;  %s6836_s8 = sld [smem:[#allocation29_spill]]  ;;  %p38_p0 = scmp.ge.s32.totalorder %s6102_s29, 4  }
 0x59c   : > { %s6837_s20 = sld [smem:[#allocation30_spill]]  ;;  %s6838_s18 = smov %s5934_s19 }
 0x59d   : > { %s6840_s21 = smov %s6102_s29  ;;  %40 = sbr.rel (!%p38_p0) target bundleno = 29 (0x1d), region = 379 }
 0x5a1   : > { %s6839_s19 = smov %s6836_s8 }
 0x5a2   :  { %4267 = vsyncpa [#allocation5], 1 }
 0x5a3   :  { %4269 = vsyncpa [#allocation5 + $0x1], 1 }
 0x5a4   :  { %4270 = vsyncpa [#allocation8], 1 }
 0x5a5   :  { %4271 = vsyncpa [#allocation11], 1 }
 0x5a6   :  { %4272 = vsyncpa [#allocation14], 1 }
 0x5a7   :  { %4273 = vsyncpa [#allocation6], 1 }
 0x5a8   :  { %4275 = vsyncpa [#allocation6 + $0x1], 1 }
 0x5a9   :  { %4276 = vsyncpa [#allocation17], 1 }
 0x5aa   :  { %4278 = vsyncpa [#allocation17 + $0x1], 1 }
 0x5ab   :  { %4279 = vsyncpa [#allocation20], 1 }
 0x5ac   :  { %4281 = vsyncpa [#allocation20 + $0x1], 1 }

</bundles_post_ra>
